<compile_context>
chip_gen: v7x
topology: tpu7x:2x2x1
jax: 0.10.0
libtpu: 0.0.40
codegen_flags: <defaults>
</compile_context>

<pallas_src>
import jax
import jax.numpy as jnp
from jax.experimental import pallas as pl
from jax.experimental.pallas import tpu as pltpu

N_LAYERS = 4


def _lstm_model_kernel(x_ref,                      # (T*Bp, I)  time-major, flattened
                       w_ih0, w_hh0, b0,
                       w_ih1, w_hh1, b1,
                       w_ih2, w_hh2, b2,
                       w_ih3, w_hh3, b3,
                       fc_w, fc_b, cls_w, cls_b,
                       relu_out_ref, cls_out_ref):  # (Bp, OUT), (Bp, Cp)
    Bp = relu_out_ref.shape[0]
    H = w_hh0.shape[0]
    T = x_ref.shape[0] // Bp

    w_ih = (w_ih0, w_ih1, w_ih2, w_ih3)
    w_hh = (w_hh0, w_hh1, w_hh2, w_hh3)
    bias = (b0, b1, b2, b3)

    layer_in = x_ref[...]                          # (T*Bp, in) value snapshot
    h_last = None
    for layer in range(N_LAYERS):                  # layers statically unrolled
        wi = w_ih[layer][...]                      # (in, 4H)
        wh = w_hh[layer][...]                      # (H, 4H)
        b = bias[layer][...]                       # (1, 4H)

        # Hoisted input projection: one batched matmul over all T*Bp rows.
        z_in = jnp.dot(layer_in, wi, preferred_element_type=jnp.float32) + b  # (T*Bp, 4H)

        h = jnp.zeros((Bp, H), jnp.float32)        # recurrent state lives in vregs
        c = jnp.zeros((Bp, H), jnp.float32)
        h_seq = []
        for t in range(T):                         # fully unrolled (T is static)
            z = z_in[t * Bp:(t + 1) * Bp, :] + jnp.dot(
                h, wh, preferred_element_type=jnp.float32)      # (Bp, 4H)
            # Full-vreg activation passes, then static sub-block slices (i,f,g,o).
            sig = jax.nn.sigmoid(z)
            th = jnp.tanh(z)
            i_g = sig[:, 0 * H:1 * H]
            f_g = sig[:, 1 * H:2 * H]
            g_g = th[:, 2 * H:3 * H]
            o_g = sig[:, 3 * H:4 * H]
            c = f_g * c + i_g * g_g
            h = o_g * jnp.tanh(c)
            if layer < N_LAYERS - 1:
                h_seq.append(h)                    # next layer's input, kept in vregs
        if layer < N_LAYERS - 1:
            layer_in = jnp.concatenate(h_seq, axis=0)   # (T*Bp, H), time-major
        h_last = h                                 # top layer: only final h needed

    # fc -> class head (pre-ReLU), ReLU applied only to the returned fc output.
    fc = jnp.dot(h_last, fc_w[...], preferred_element_type=jnp.float32) + fc_b[...]
    cls = jnp.dot(fc, cls_w[...], preferred_element_type=jnp.float32) + cls_b[...]
    relu_out_ref[...] = jnp.maximum(fc, 0.0)
    cls_out_ref[...] = cls


def init_params(key, input_size, hidden_size, out_features, num_classes):
    """PyTorch-style uniform(-1/sqrt(fan_in), 1/sqrt(fan_in)) init."""
    params = {"layers": []}
    bound = 1.0 / jnp.sqrt(jnp.float32(hidden_size))
    keys = jax.random.split(key, 4 * N_LAYERS + 4)
    k = 0
    for layer in range(N_LAYERS):
        in_sz = input_size if layer == 0 else hidden_size
        w_ih = jax.random.uniform(keys[k], (4 * hidden_size, in_sz),
                                  jnp.float32, -bound, bound); k += 1
        w_hh = jax.random.uniform(keys[k], (4 * hidden_size, hidden_size),
                                  jnp.float32, -bound, bound); k += 1
        b_ih = jax.random.uniform(keys[k], (4 * hidden_size,),
                                  jnp.float32, -bound, bound); k += 1
        b_hh = jax.random.uniform(keys[k], (4 * hidden_size,),
                                  jnp.float32, -bound, bound); k += 1
        params["layers"].append((w_ih, w_hh, b_ih, b_hh))
    fcb = 1.0 / jnp.sqrt(jnp.float32(hidden_size))
    params["fc_w"] = jax.random.uniform(keys[k], (out_features, hidden_size),
                                        jnp.float32, -fcb, fcb); k += 1
    params["fc_b"] = jax.random.uniform(keys[k], (out_features,),
                                        jnp.float32, -fcb, fcb); k += 1
    clsb = 1.0 / jnp.sqrt(jnp.float32(out_features))
    params["cls_w"] = jax.random.uniform(keys[k], (num_classes, out_features),
                                         jnp.float32, -clsb, clsb); k += 1
    params["cls_b"] = jax.random.uniform(keys[k], (num_classes,),
                                         jnp.float32, -clsb, clsb); k += 1
    return params


def prepare_kernel_params(params):
    """One-time host-side prep: transpose weights, fuse biases, pad class head to 128 lanes."""
    kp = {"layers": []}
    for (w_ih, w_hh, b_ih, b_hh) in params["layers"]:
        h4 = w_ih.shape[0]
        kp["layers"].append((jnp.transpose(w_ih),              # (in, 4H)
                             jnp.transpose(w_hh),              # (H, 4H)
                             (b_ih + b_hh).reshape(1, h4)))    # (1, 4H)
    out_f = params["fc_w"].shape[0]
    n_cls = params["cls_w"].shape[0]
    c_pad = ((n_cls + 127) // 128) * 128
    kp["fc_w"] = jnp.transpose(params["fc_w"])                 # (H, OUT)
    kp["fc_b"] = params["fc_b"].reshape(1, out_f)
    kp["cls_w"] = jnp.pad(jnp.transpose(params["cls_w"]),      # (OUT, C_pad)
                          ((0, 0), (0, c_pad - n_cls)))
    kp["cls_b"] = jnp.pad(params["cls_b"], (0, c_pad - n_cls)).reshape(1, c_pad)
    kp["num_classes"] = n_cls
    return kp


def lstm_model_forward(x, kparams):
    """x: (B, T, I) float32  ->  (relu(fc(h_T)), class_pred(fc(h_T)))."""
    B, T, I = x.shape
    OUT = kparams["fc_w"].shape[1]
    C_pad = kparams["cls_w"].shape[1]
    C = kparams["num_classes"]

    # Pad batch to a sublane multiple and flatten time-major (T, Bp, I) -> (T*Bp, I).
    B_pad = ((B + 7) // 8) * 8
    x_tbi = jnp.transpose(x, (1, 0, 2))
    x_tbi = jnp.pad(x_tbi, ((0, 0), (0, B_pad - B), (0, 0)))
    x_flat = x_tbi.reshape(T * B_pad, I)

    kernel_args = [x_flat]
    for (wi, wh, b) in kparams["layers"]:
        kernel_args += [wi, wh, b]
    kernel_args += [kparams["fc_w"], kparams["fc_b"], kparams["cls_w"], kparams["cls_b"]]

    vmem_spec = pl.BlockSpec(memory_space=pltpu.MemorySpace.VMEM)
    relu_out, cls_out = pl.pallas_call(
        _lstm_model_kernel,
        out_shape=(jax.ShapeDtypeStruct((B_pad, OUT), jnp.float32),
                   jax.ShapeDtypeStruct((B_pad, C_pad), jnp.float32)),
        in_specs=[vmem_spec] * len(kernel_args),
        out_specs=(vmem_spec, vmem_spec),
    )(*kernel_args)
    return relu_out[:B], cls_out[:B, :C]


def lstm_model_reference(x, params):
    """Pure-JAX reference of the same forward pass (correctness check)."""
    B, T, I = x.shape
    H = params["layers"][0][1].shape[1]
    seq = x
    for (w_ih, w_hh, b_ih, b_hh) in params["layers"]:
        h = jnp.zeros((B, H), jnp.float32)
        c = jnp.zeros((B, H), jnp.float32)
        outs = []
        for t in range(T):
            z = seq[:, t, :] @ w_ih.T + h @ w_hh.T + b_ih + b_hh
            i_g = jax.nn.sigmoid(z[:, 0 * H:1 * H])
            f_g = jax.nn.sigmoid(z[:, 1 * H:2 * H])
            g_g = jnp.tanh(z[:, 2 * H:3 * H])
            o_g = jax.nn.sigmoid(z[:, 3 * H:4 * H])
            c = f_g * c + i_g * g_g
            h = o_g * jnp.tanh(c)
            outs.append(h)
        seq = jnp.stack(outs, axis=1)
    h_last = seq[:, -1, :]
    fc = h_last @ params["fc_w"].T + params["fc_b"]
    cls = fc @ params["cls_w"].T + params["cls_b"]
    return jnp.maximum(fc, 0.0), cls


if __name__ == "__main__":
    B, T, INPUT_SIZE = 4, 8, 16      # (batch, "channels"=seq len, "timespan"=input_size)
    HIDDEN = 32
    OUT_FEATURES = 384
    NUM_CLASSES = 40

    key = jax.random.PRNGKey(0)
    k_x, k_p = jax.random.split(key)
    x = jax.random.normal(k_x, (B, T, INPUT_SIZE), jnp.float32)
    params = init_params(k_p, INPUT_SIZE, HIDDEN, OUT_FEATURES, NUM_CLASSES)
    kparams = prepare_kernel_params(params)      # host-side prep done once

    relu_out, cls_out = jax.block_until_ready(lstm_model_forward(x, kparams))

    ref_relu, ref_cls = lstm_model_reference(x, params)
    assert relu_out.shape == (B, OUT_FEATURES) and cls_out.shape == (B, NUM_CLASSES)
    assert jnp.allclose(relu_out, ref_relu, atol=1e-4, rtol=1e-4)
    assert jnp.allclose(cls_out, ref_cls, atol=1e-4, rtol=1e-4)

    print("KERNEL_OK")
</pallas_src>

<mosaic_0001>
module attributes {stable_mosaic.version = 11 : i64} {
  func.func @_lstm_model_kernel(%arg0: memref<64x16xf32, #tpu.memory_space<vmem>>, %arg1: memref<16x128xf32, #tpu.memory_space<vmem>>, %arg2: memref<32x128xf32, #tpu.memory_space<vmem>>, %arg3: memref<1x128xf32, #tpu.memory_space<vmem>>, %arg4: memref<32x128xf32, #tpu.memory_space<vmem>>, %arg5: memref<32x128xf32, #tpu.memory_space<vmem>>, %arg6: memref<1x128xf32, #tpu.memory_space<vmem>>, %arg7: memref<32x128xf32, #tpu.memory_space<vmem>>, %arg8: memref<32x128xf32, #tpu.memory_space<vmem>>, %arg9: memref<1x128xf32, #tpu.memory_space<vmem>>, %arg10: memref<32x128xf32, #tpu.memory_space<vmem>>, %arg11: memref<32x128xf32, #tpu.memory_space<vmem>>, %arg12: memref<1x128xf32, #tpu.memory_space<vmem>>, %arg13: memref<32x384xf32, #tpu.memory_space<vmem>>, %arg14: memref<1x384xf32, #tpu.memory_space<vmem>>, %arg15: memref<384x128xf32, #tpu.memory_space<vmem>>, %arg16: memref<1x128xf32, #tpu.memory_space<vmem>>, %arg17: memref<8x384xf32, #tpu.memory_space<vmem>>, %arg18: memref<8x128xf32, #tpu.memory_space<vmem>>) attributes {dimension_semantics = [], scalar_prefetch = 0 : i64, scratch_operands = 0 : i64, tpu.core_type = #tpu.core_type<tc>} {
    %c0 = arith.constant 0 : index
    %c0_0 = arith.constant 0 : index
    %0 = vector.load %arg0[%c0, %c0_0] : memref<64x16xf32, #tpu.memory_space<vmem>>, vector<64x16xf32>
    %c0_1 = arith.constant 0 : index
    %c0_2 = arith.constant 0 : index
    %1 = vector.load %arg1[%c0_1, %c0_2] : memref<16x128xf32, #tpu.memory_space<vmem>>, vector<16x128xf32>
    %c0_3 = arith.constant 0 : index
    %c0_4 = arith.constant 0 : index
    %2 = vector.load %arg2[%c0_3, %c0_4] : memref<32x128xf32, #tpu.memory_space<vmem>>, vector<32x128xf32>
    %c0_5 = arith.constant 0 : index
    %c0_6 = arith.constant 0 : index
    %3 = vector.load %arg3[%c0_5, %c0_6] : memref<1x128xf32, #tpu.memory_space<vmem>>, vector<1x128xf32>
    %cst = arith.constant dense<0.000000e+00> : vector<64x128xf32>
    %4 = tpu.matmul %0, %1, %cst {dimension_numbers = #tpu.dot_dimension_numbers<[1], [0], [0], [1], [0, 0, 1, 1], [], []>} : vector<64x16xf32>, vector<16x128xf32>, vector<64x128xf32> -> vector<64x128xf32>
    %5 = vector.broadcast %3 : vector<1x128xf32> to vector<64x128xf32>
    %6 = arith.addf %4, %5 : vector<64x128xf32>
    %cst_7 = arith.constant 0.000000e+00 : f32
    %7 = vector.broadcast %cst_7 : f32 to vector<8x32xf32>
    %cst_8 = arith.constant 0.000000e+00 : f32
    %8 = vector.broadcast %cst_8 : f32 to vector<8x32xf32>
    %9 = vector.extract_strided_slice %6 {offsets = [0, 0], sizes = [8, 128], strides = [1, 1]} : vector<64x128xf32> to vector<8x128xf32>
    %cst_9 = arith.constant dense<0.000000e+00> : vector<8x128xf32>
    %10 = tpu.matmul %7, %2, %cst_9 {dimension_numbers = #tpu.dot_dimension_numbers<[1], [0], [0], [1], [0, 0, 1, 1], [], []>} : vector<8x32xf32>, vector<32x128xf32>, vector<8x128xf32> -> vector<8x128xf32>
    %11 = arith.addf %9, %10 : vector<8x128xf32>
    %12 = arith.negf %11 : vector<8x128xf32>
    %13 = math.exp %12 : vector<8x128xf32>
    %cst_10 = arith.constant 1.000000e+00 : f32
    %14 = vector.broadcast %cst_10 : f32 to vector<8x128xf32>
    %15 = arith.addf %14, %13 : vector<8x128xf32>
    %16 = arith.divf %14, %15 : vector<8x128xf32>
    %17 = math.tanh %11 : vector<8x128xf32>
    %18 = vector.extract_strided_slice %16 {offsets = [0, 0], sizes = [8, 32], strides = [1, 1]} : vector<8x128xf32> to vector<8x32xf32>
    %19 = vector.extract_strided_slice %16 {offsets = [0, 32], sizes = [8, 32], strides = [1, 1]} : vector<8x128xf32> to vector<8x32xf32>
    %20 = vector.extract_strided_slice %17 {offsets = [0, 64], sizes = [8, 32], strides = [1, 1]} : vector<8x128xf32> to vector<8x32xf32>
    %21 = vector.extract_strided_slice %16 {offsets = [0, 96], sizes = [8, 32], strides = [1, 1]} : vector<8x128xf32> to vector<8x32xf32>
    %22 = arith.mulf %19, %8 : vector<8x32xf32>
    %23 = arith.mulf %18, %20 : vector<8x32xf32>
    %24 = arith.addf %22, %23 : vector<8x32xf32>
    %25 = math.tanh %24 : vector<8x32xf32>
    %26 = arith.mulf %21, %25 : vector<8x32xf32>
    %27 = vector.extract_strided_slice %6 {offsets = [8, 0], sizes = [8, 128], strides = [1, 1]} : vector<64x128xf32> to vector<8x128xf32>
    %cst_11 = arith.constant dense<0.000000e+00> : vector<8x128xf32>
    %28 = tpu.matmul %26, %2, %cst_11 {dimension_numbers = #tpu.dot_dimension_numbers<[1], [0], [0], [1], [0, 0, 1, 1], [], []>} : vector<8x32xf32>, vector<32x128xf32>, vector<8x128xf32> -> vector<8x128xf32>
    %29 = arith.addf %27, %28 : vector<8x128xf32>
    %30 = arith.negf %29 : vector<8x128xf32>
    %31 = math.exp %30 : vector<8x128xf32>
    %cst_12 = arith.constant 1.000000e+00 : f32
    %32 = vector.broadcast %cst_12 : f32 to vector<8x128xf32>
    %33 = arith.addf %32, %31 : vector<8x128xf32>
    %34 = arith.divf %32, %33 : vector<8x128xf32>
    %35 = math.tanh %29 : vector<8x128xf32>
    %36 = vector.extract_strided_slice %34 {offsets = [0, 0], sizes = [8, 32], strides = [1, 1]} : vector<8x128xf32> to vector<8x32xf32>
    %37 = vector.extract_strided_slice %34 {offsets = [0, 32], sizes = [8, 32], strides = [1, 1]} : vector<8x128xf32> to vector<8x32xf32>
    %38 = vector.extract_strided_slice %35 {offsets = [0, 64], sizes = [8, 32], strides = [1, 1]} : vector<8x128xf32> to vector<8x32xf32>
    %39 = vector.extract_strided_slice %34 {offsets = [0, 96], sizes = [8, 32], strides = [1, 1]} : vector<8x128xf32> to vector<8x32xf32>
    %40 = arith.mulf %37, %24 : vector<8x32xf32>
    %41 = arith.mulf %36, %38 : vector<8x32xf32>
    %42 = arith.addf %40, %41 : vector<8x32xf32>
    %43 = math.tanh %42 : vector<8x32xf32>
    %44 = arith.mulf %39, %43 : vector<8x32xf32>
    %45 = vector.extract_strided_slice %6 {offsets = [16, 0], sizes = [8, 128], strides = [1, 1]} : vector<64x128xf32> to vector<8x128xf32>
    %cst_13 = arith.constant dense<0.000000e+00> : vector<8x128xf32>
    %46 = tpu.matmul %44, %2, %cst_13 {dimension_numbers = #tpu.dot_dimension_numbers<[1], [0], [0], [1], [0, 0, 1, 1], [], []>} : vector<8x32xf32>, vector<32x128xf32>, vector<8x128xf32> -> vector<8x128xf32>
    %47 = arith.addf %45, %46 : vector<8x128xf32>
    %48 = arith.negf %47 : vector<8x128xf32>
    %49 = math.exp %48 : vector<8x128xf32>
    %cst_14 = arith.constant 1.000000e+00 : f32
    %50 = vector.broadcast %cst_14 : f32 to vector<8x128xf32>
    %51 = arith.addf %50, %49 : vector<8x128xf32>
    %52 = arith.divf %50, %51 : vector<8x128xf32>
    %53 = math.tanh %47 : vector<8x128xf32>
    %54 = vector.extract_strided_slice %52 {offsets = [0, 0], sizes = [8, 32], strides = [1, 1]} : vector<8x128xf32> to vector<8x32xf32>
    %55 = vector.extract_strided_slice %52 {offsets = [0, 32], sizes = [8, 32], strides = [1, 1]} : vector<8x128xf32> to vector<8x32xf32>
    %56 = vector.extract_strided_slice %53 {offsets = [0, 64], sizes = [8, 32], strides = [1, 1]} : vector<8x128xf32> to vector<8x32xf32>
    %57 = vector.extract_strided_slice %52 {offsets = [0, 96], sizes = [8, 32], strides = [1, 1]} : vector<8x128xf32> to vector<8x32xf32>
    %58 = arith.mulf %55, %42 : vector<8x32xf32>
    %59 = arith.mulf %54, %56 : vector<8x32xf32>
    %60 = arith.addf %58, %59 : vector<8x32xf32>
    %61 = math.tanh %60 : vector<8x32xf32>
    %62 = arith.mulf %57, %61 : vector<8x32xf32>
    %63 = vector.extract_strided_slice %6 {offsets = [24, 0], sizes = [8, 128], strides = [1, 1]} : vector<64x128xf32> to vector<8x128xf32>
    %cst_15 = arith.constant dense<0.000000e+00> : vector<8x128xf32>
    %64 = tpu.matmul %62, %2, %cst_15 {dimension_numbers = #tpu.dot_dimension_numbers<[1], [0], [0], [1], [0, 0, 1, 1], [], []>} : vector<8x32xf32>, vector<32x128xf32>, vector<8x128xf32> -> vector<8x128xf32>
    %65 = arith.addf %63, %64 : vector<8x128xf32>
    %66 = arith.negf %65 : vector<8x128xf32>
    %67 = math.exp %66 : vector<8x128xf32>
    %cst_16 = arith.constant 1.000000e+00 : f32
    %68 = vector.broadcast %cst_16 : f32 to vector<8x128xf32>
    %69 = arith.addf %68, %67 : vector<8x128xf32>
    %70 = arith.divf %68, %69 : vector<8x128xf32>
    %71 = math.tanh %65 : vector<8x128xf32>
    %72 = vector.extract_strided_slice %70 {offsets = [0, 0], sizes = [8, 32], strides = [1, 1]} : vector<8x128xf32> to vector<8x32xf32>
    %73 = vector.extract_strided_slice %70 {offsets = [0, 32], sizes = [8, 32], strides = [1, 1]} : vector<8x128xf32> to vector<8x32xf32>
    %74 = vector.extract_strided_slice %71 {offsets = [0, 64], sizes = [8, 32], strides = [1, 1]} : vector<8x128xf32> to vector<8x32xf32>
    %75 = vector.extract_strided_slice %70 {offsets = [0, 96], sizes = [8, 32], strides = [1, 1]} : vector<8x128xf32> to vector<8x32xf32>
    %76 = arith.mulf %73, %60 : vector<8x32xf32>
    %77 = arith.mulf %72, %74 : vector<8x32xf32>
    %78 = arith.addf %76, %77 : vector<8x32xf32>
    %79 = math.tanh %78 : vector<8x32xf32>
    %80 = arith.mulf %75, %79 : vector<8x32xf32>
    %81 = vector.extract_strided_slice %6 {offsets = [32, 0], sizes = [8, 128], strides = [1, 1]} : vector<64x128xf32> to vector<8x128xf32>
    %cst_17 = arith.constant dense<0.000000e+00> : vector<8x128xf32>
    %82 = tpu.matmul %80, %2, %cst_17 {dimension_numbers = #tpu.dot_dimension_numbers<[1], [0], [0], [1], [0, 0, 1, 1], [], []>} : vector<8x32xf32>, vector<32x128xf32>, vector<8x128xf32> -> vector<8x128xf32>
    %83 = arith.addf %81, %82 : vector<8x128xf32>
    %84 = arith.negf %83 : vector<8x128xf32>
    %85 = math.exp %84 : vector<8x128xf32>
    %cst_18 = arith.constant 1.000000e+00 : f32
    %86 = vector.broadcast %cst_18 : f32 to vector<8x128xf32>
    %87 = arith.addf %86, %85 : vector<8x128xf32>
    %88 = arith.divf %86, %87 : vector<8x128xf32>
    %89 = math.tanh %83 : vector<8x128xf32>
    %90 = vector.extract_strided_slice %88 {offsets = [0, 0], sizes = [8, 32], strides = [1, 1]} : vector<8x128xf32> to vector<8x32xf32>
    %91 = vector.extract_strided_slice %88 {offsets = [0, 32], sizes = [8, 32], strides = [1, 1]} : vector<8x128xf32> to vector<8x32xf32>
    %92 = vector.extract_strided_slice %89 {offsets = [0, 64], sizes = [8, 32], strides = [1, 1]} : vector<8x128xf32> to vector<8x32xf32>
    %93 = vector.extract_strided_slice %88 {offsets = [0, 96], sizes = [8, 32], strides = [1, 1]} : vector<8x128xf32> to vector<8x32xf32>
    %94 = arith.mulf %91, %78 : vector<8x32xf32>
    %95 = arith.mulf %90, %92 : vector<8x32xf32>
    %96 = arith.addf %94, %95 : vector<8x32xf32>
    %97 = math.tanh %96 : vector<8x32xf32>
    %98 = arith.mulf %93, %97 : vector<8x32xf32>
    %99 = vector.extract_strided_slice %6 {offsets = [40, 0], sizes = [8, 128], strides = [1, 1]} : vector<64x128xf32> to vector<8x128xf32>
    %cst_19 = arith.constant dense<0.000000e+00> : vector<8x128xf32>
    %100 = tpu.matmul %98, %2, %cst_19 {dimension_numbers = #tpu.dot_dimension_numbers<[1], [0], [0], [1], [0, 0, 1, 1], [], []>} : vector<8x32xf32>, vector<32x128xf32>, vector<8x128xf32> -> vector<8x128xf32>
    %101 = arith.addf %99, %100 : vector<8x128xf32>
    %102 = arith.negf %101 : vector<8x128xf32>
    %103 = math.exp %102 : vector<8x128xf32>
    %cst_20 = arith.constant 1.000000e+00 : f32
    %104 = vector.broadcast %cst_20 : f32 to vector<8x128xf32>
    %105 = arith.addf %104, %103 : vector<8x128xf32>
    %106 = arith.divf %104, %105 : vector<8x128xf32>
    %107 = math.tanh %101 : vector<8x128xf32>
    %108 = vector.extract_strided_slice %106 {offsets = [0, 0], sizes = [8, 32], strides = [1, 1]} : vector<8x128xf32> to vector<8x32xf32>
    %109 = vector.extract_strided_slice %106 {offsets = [0, 32], sizes = [8, 32], strides = [1, 1]} : vector<8x128xf32> to vector<8x32xf32>
    %110 = vector.extract_strided_slice %107 {offsets = [0, 64], sizes = [8, 32], strides = [1, 1]} : vector<8x128xf32> to vector<8x32xf32>
    %111 = vector.extract_strided_slice %106 {offsets = [0, 96], sizes = [8, 32], strides = [1, 1]} : vector<8x128xf32> to vector<8x32xf32>
    %112 = arith.mulf %109, %96 : vector<8x32xf32>
    %113 = arith.mulf %108, %110 : vector<8x32xf32>
    %114 = arith.addf %112, %113 : vector<8x32xf32>
    %115 = math.tanh %114 : vector<8x32xf32>
    %116 = arith.mulf %111, %115 : vector<8x32xf32>
    %117 = vector.extract_strided_slice %6 {offsets = [48, 0], sizes = [8, 128], strides = [1, 1]} : vector<64x128xf32> to vector<8x128xf32>
    %cst_21 = arith.constant dense<0.000000e+00> : vector<8x128xf32>
    %118 = tpu.matmul %116, %2, %cst_21 {dimension_numbers = #tpu.dot_dimension_numbers<[1], [0], [0], [1], [0, 0, 1, 1], [], []>} : vector<8x32xf32>, vector<32x128xf32>, vector<8x128xf32> -> vector<8x128xf32>
    %119 = arith.addf %117, %118 : vector<8x128xf32>
    %120 = arith.negf %119 : vector<8x128xf32>
    %121 = math.exp %120 : vector<8x128xf32>
    %cst_22 = arith.constant 1.000000e+00 : f32
    %122 = vector.broadcast %cst_22 : f32 to vector<8x128xf32>
    %123 = arith.addf %122, %121 : vector<8x128xf32>
    %124 = arith.divf %122, %123 : vector<8x128xf32>
    %125 = math.tanh %119 : vector<8x128xf32>
    %126 = vector.extract_strided_slice %124 {offsets = [0, 0], sizes = [8, 32], strides = [1, 1]} : vector<8x128xf32> to vector<8x32xf32>
    %127 = vector.extract_strided_slice %124 {offsets = [0, 32], sizes = [8, 32], strides = [1, 1]} : vector<8x128xf32> to vector<8x32xf32>
    %128 = vector.extract_strided_slice %125 {offsets = [0, 64], sizes = [8, 32], strides = [1, 1]} : vector<8x128xf32> to vector<8x32xf32>
    %129 = vector.extract_strided_slice %124 {offsets = [0, 96], sizes = [8, 32], strides = [1, 1]} : vector<8x128xf32> to vector<8x32xf32>
    %130 = arith.mulf %127, %114 : vector<8x32xf32>
    %131 = arith.mulf %126, %128 : vector<8x32xf32>
    %132 = arith.addf %130, %131 : vector<8x32xf32>
    %133 = math.tanh %132 : vector<8x32xf32>
    %134 = arith.mulf %129, %133 : vector<8x32xf32>
    %135 = vector.extract_strided_slice %6 {offsets = [56, 0], sizes = [8, 128], strides = [1, 1]} : vector<64x128xf32> to vector<8x128xf32>
    %cst_23 = arith.constant dense<0.000000e+00> : vector<8x128xf32>
    %136 = tpu.matmul %134, %2, %cst_23 {dimension_numbers = #tpu.dot_dimension_numbers<[1], [0], [0], [1], [0, 0, 1, 1], [], []>} : vector<8x32xf32>, vector<32x128xf32>, vector<8x128xf32> -> vector<8x128xf32>
    %137 = arith.addf %135, %136 : vector<8x128xf32>
    %138 = arith.negf %137 : vector<8x128xf32>
    %139 = math.exp %138 : vector<8x128xf32>
    %cst_24 = arith.constant 1.000000e+00 : f32
    %140 = vector.broadcast %cst_24 : f32 to vector<8x128xf32>
    %141 = arith.addf %140, %139 : vector<8x128xf32>
    %142 = arith.divf %140, %141 : vector<8x128xf32>
    %143 = math.tanh %137 : vector<8x128xf32>
    %144 = vector.extract_strided_slice %142 {offsets = [0, 0], sizes = [8, 32], strides = [1, 1]} : vector<8x128xf32> to vector<8x32xf32>
    %145 = vector.extract_strided_slice %142 {offsets = [0, 32], sizes = [8, 32], strides = [1, 1]} : vector<8x128xf32> to vector<8x32xf32>
    %146 = vector.extract_strided_slice %143 {offsets = [0, 64], sizes = [8, 32], strides = [1, 1]} : vector<8x128xf32> to vector<8x32xf32>
    %147 = vector.extract_strided_slice %142 {offsets = [0, 96], sizes = [8, 32], strides = [1, 1]} : vector<8x128xf32> to vector<8x32xf32>
    %148 = arith.mulf %145, %132 : vector<8x32xf32>
    %149 = arith.mulf %144, %146 : vector<8x32xf32>
    %150 = arith.addf %148, %149 : vector<8x32xf32>
    %151 = math.tanh %150 : vector<8x32xf32>
    %152 = arith.mulf %147, %151 : vector<8x32xf32>
    %153 = tpu.concatenate %26, %44, %62, %80, %98, %116, %134, %152 in 0 : vector<8x32xf32>, vector<8x32xf32>, vector<8x32xf32>, vector<8x32xf32>, vector<8x32xf32>, vector<8x32xf32>, vector<8x32xf32>, vector<8x32xf32> -> vector<64x32xf32>
    %c0_25 = arith.constant 0 : index
    %c0_26 = arith.constant 0 : index
    %154 = vector.load %arg4[%c0_25, %c0_26] : memref<32x128xf32, #tpu.memory_space<vmem>>, vector<32x128xf32>
    %c0_27 = arith.constant 0 : index
    %c0_28 = arith.constant 0 : index
    %155 = vector.load %arg5[%c0_27, %c0_28] : memref<32x128xf32, #tpu.memory_space<vmem>>, vector<32x128xf32>
    %c0_29 = arith.constant 0 : index
    %c0_30 = arith.constant 0 : index
    %156 = vector.load %arg6[%c0_29, %c0_30] : memref<1x128xf32, #tpu.memory_space<vmem>>, vector<1x128xf32>
    %cst_31 = arith.constant dense<0.000000e+00> : vector<64x128xf32>
    %157 = tpu.matmul %153, %154, %cst_31 {dimension_numbers = #tpu.dot_dimension_numbers<[1], [0], [0], [1], [0, 0, 1, 1], [], []>} : vector<64x32xf32>, vector<32x128xf32>, vector<64x128xf32> -> vector<64x128xf32>
    %158 = vector.broadcast %156 : vector<1x128xf32> to vector<64x128xf32>
    %159 = arith.addf %157, %158 : vector<64x128xf32>
    %cst_32 = arith.constant 0.000000e+00 : f32
    %160 = vector.broadcast %cst_32 : f32 to vector<8x32xf32>
    %cst_33 = arith.constant 0.000000e+00 : f32
    %161 = vector.broadcast %cst_33 : f32 to vector<8x32xf32>
    %162 = vector.extract_strided_slice %159 {offsets = [0, 0], sizes = [8, 128], strides = [1, 1]} : vector<64x128xf32> to vector<8x128xf32>
    %cst_34 = arith.constant dense<0.000000e+00> : vector<8x128xf32>
    %163 = tpu.matmul %160, %155, %cst_34 {dimension_numbers = #tpu.dot_dimension_numbers<[1], [0], [0], [1], [0, 0, 1, 1], [], []>} : vector<8x32xf32>, vector<32x128xf32>, vector<8x128xf32> -> vector<8x128xf32>
    %164 = arith.addf %162, %163 : vector<8x128xf32>
    %165 = arith.negf %164 : vector<8x128xf32>
    %166 = math.exp %165 : vector<8x128xf32>
    %cst_35 = arith.constant 1.000000e+00 : f32
    %167 = vector.broadcast %cst_35 : f32 to vector<8x128xf32>
    %168 = arith.addf %167, %166 : vector<8x128xf32>
    %169 = arith.divf %167, %168 : vector<8x128xf32>
    %170 = math.tanh %164 : vector<8x128xf32>
    %171 = vector.extract_strided_slice %169 {offsets = [0, 0], sizes = [8, 32], strides = [1, 1]} : vector<8x128xf32> to vector<8x32xf32>
    %172 = vector.extract_strided_slice %169 {offsets = [0, 32], sizes = [8, 32], strides = [1, 1]} : vector<8x128xf32> to vector<8x32xf32>
    %173 = vector.extract_strided_slice %170 {offsets = [0, 64], sizes = [8, 32], strides = [1, 1]} : vector<8x128xf32> to vector<8x32xf32>
    %174 = vector.extract_strided_slice %169 {offsets = [0, 96], sizes = [8, 32], strides = [1, 1]} : vector<8x128xf32> to vector<8x32xf32>
    %175 = arith.mulf %172, %161 : vector<8x32xf32>
    %176 = arith.mulf %171, %173 : vector<8x32xf32>
    %177 = arith.addf %175, %176 : vector<8x32xf32>
    %178 = math.tanh %177 : vector<8x32xf32>
    %179 = arith.mulf %174, %178 : vector<8x32xf32>
    %180 = vector.extract_strided_slice %159 {offsets = [8, 0], sizes = [8, 128], strides = [1, 1]} : vector<64x128xf32> to vector<8x128xf32>
    %cst_36 = arith.constant dense<0.000000e+00> : vector<8x128xf32>
    %181 = tpu.matmul %179, %155, %cst_36 {dimension_numbers = #tpu.dot_dimension_numbers<[1], [0], [0], [1], [0, 0, 1, 1], [], []>} : vector<8x32xf32>, vector<32x128xf32>, vector<8x128xf32> -> vector<8x128xf32>
    %182 = arith.addf %180, %181 : vector<8x128xf32>
    %183 = arith.negf %182 : vector<8x128xf32>
    %184 = math.exp %183 : vector<8x128xf32>
    %cst_37 = arith.constant 1.000000e+00 : f32
    %185 = vector.broadcast %cst_37 : f32 to vector<8x128xf32>
    %186 = arith.addf %185, %184 : vector<8x128xf32>
    %187 = arith.divf %185, %186 : vector<8x128xf32>
    %188 = math.tanh %182 : vector<8x128xf32>
    %189 = vector.extract_strided_slice %187 {offsets = [0, 0], sizes = [8, 32], strides = [1, 1]} : vector<8x128xf32> to vector<8x32xf32>
    %190 = vector.extract_strided_slice %187 {offsets = [0, 32], sizes = [8, 32], strides = [1, 1]} : vector<8x128xf32> to vector<8x32xf32>
    %191 = vector.extract_strided_slice %188 {offsets = [0, 64], sizes = [8, 32], strides = [1, 1]} : vector<8x128xf32> to vector<8x32xf32>
    %192 = vector.extract_strided_slice %187 {offsets = [0, 96], sizes = [8, 32], strides = [1, 1]} : vector<8x128xf32> to vector<8x32xf32>
    %193 = arith.mulf %190, %177 : vector<8x32xf32>
    %194 = arith.mulf %189, %191 : vector<8x32xf32>
    %195 = arith.addf %193, %194 : vector<8x32xf32>
    %196 = math.tanh %195 : vector<8x32xf32>
    %197 = arith.mulf %192, %196 : vector<8x32xf32>
    %198 = vector.extract_strided_slice %159 {offsets = [16, 0], sizes = [8, 128], strides = [1, 1]} : vector<64x128xf32> to vector<8x128xf32>
    %cst_38 = arith.constant dense<0.000000e+00> : vector<8x128xf32>
    %199 = tpu.matmul %197, %155, %cst_38 {dimension_numbers = #tpu.dot_dimension_numbers<[1], [0], [0], [1], [0, 0, 1, 1], [], []>} : vector<8x32xf32>, vector<32x128xf32>, vector<8x128xf32> -> vector<8x128xf32>
    %200 = arith.addf %198, %199 : vector<8x128xf32>
    %201 = arith.negf %200 : vector<8x128xf32>
    %202 = math.exp %201 : vector<8x128xf32>
    %cst_39 = arith.constant 1.000000e+00 : f32
    %203 = vector.broadcast %cst_39 : f32 to vector<8x128xf32>
    %204 = arith.addf %203, %202 : vector<8x128xf32>
    %205 = arith.divf %203, %204 : vector<8x128xf32>
    %206 = math.tanh %200 : vector<8x128xf32>
    %207 = vector.extract_strided_slice %205 {offsets = [0, 0], sizes = [8, 32], strides = [1, 1]} : vector<8x128xf32> to vector<8x32xf32>
    %208 = vector.extract_strided_slice %205 {offsets = [0, 32], sizes = [8, 32], strides = [1, 1]} : vector<8x128xf32> to vector<8x32xf32>
    %209 = vector.extract_strided_slice %206 {offsets = [0, 64], sizes = [8, 32], strides = [1, 1]} : vector<8x128xf32> to vector<8x32xf32>
    %210 = vector.extract_strided_slice %205 {offsets = [0, 96], sizes = [8, 32], strides = [1, 1]} : vector<8x128xf32> to vector<8x32xf32>
    %211 = arith.mulf %208, %195 : vector<8x32xf32>
    %212 = arith.mulf %207, %209 : vector<8x32xf32>
    %213 = arith.addf %211, %212 : vector<8x32xf32>
    %214 = math.tanh %213 : vector<8x32xf32>
    %215 = arith.mulf %210, %214 : vector<8x32xf32>
    %216 = vector.extract_strided_slice %159 {offsets = [24, 0], sizes = [8, 128], strides = [1, 1]} : vector<64x128xf32> to vector<8x128xf32>
    %cst_40 = arith.constant dense<0.000000e+00> : vector<8x128xf32>
    %217 = tpu.matmul %215, %155, %cst_40 {dimension_numbers = #tpu.dot_dimension_numbers<[1], [0], [0], [1], [0, 0, 1, 1], [], []>} : vector<8x32xf32>, vector<32x128xf32>, vector<8x128xf32> -> vector<8x128xf32>
    %218 = arith.addf %216, %217 : vector<8x128xf32>
    %219 = arith.negf %218 : vector<8x128xf32>
    %220 = math.exp %219 : vector<8x128xf32>
    %cst_41 = arith.constant 1.000000e+00 : f32
    %221 = vector.broadcast %cst_41 : f32 to vector<8x128xf32>
    %222 = arith.addf %221, %220 : vector<8x128xf32>
    %223 = arith.divf %221, %222 : vector<8x128xf32>
    %224 = math.tanh %218 : vector<8x128xf32>
    %225 = vector.extract_strided_slice %223 {offsets = [0, 0], sizes = [8, 32], strides = [1, 1]} : vector<8x128xf32> to vector<8x32xf32>
    %226 = vector.extract_strided_slice %223 {offsets = [0, 32], sizes = [8, 32], strides = [1, 1]} : vector<8x128xf32> to vector<8x32xf32>
    %227 = vector.extract_strided_slice %224 {offsets = [0, 64], sizes = [8, 32], strides = [1, 1]} : vector<8x128xf32> to vector<8x32xf32>
    %228 = vector.extract_strided_slice %223 {offsets = [0, 96], sizes = [8, 32], strides = [1, 1]} : vector<8x128xf32> to vector<8x32xf32>
    %229 = arith.mulf %226, %213 : vector<8x32xf32>
    %230 = arith.mulf %225, %227 : vector<8x32xf32>
    %231 = arith.addf %229, %230 : vector<8x32xf32>
    %232 = math.tanh %231 : vector<8x32xf32>
    %233 = arith.mulf %228, %232 : vector<8x32xf32>
    %234 = vector.extract_strided_slice %159 {offsets = [32, 0], sizes = [8, 128], strides = [1, 1]} : vector<64x128xf32> to vector<8x128xf32>
    %cst_42 = arith.constant dense<0.000000e+00> : vector<8x128xf32>
    %235 = tpu.matmul %233, %155, %cst_42 {dimension_numbers = #tpu.dot_dimension_numbers<[1], [0], [0], [1], [0, 0, 1, 1], [], []>} : vector<8x32xf32>, vector<32x128xf32>, vector<8x128xf32> -> vector<8x128xf32>
    %236 = arith.addf %234, %235 : vector<8x128xf32>
    %237 = arith.negf %236 : vector<8x128xf32>
    %238 = math.exp %237 : vector<8x128xf32>
    %cst_43 = arith.constant 1.000000e+00 : f32
    %239 = vector.broadcast %cst_43 : f32 to vector<8x128xf32>
    %240 = arith.addf %239, %238 : vector<8x128xf32>
    %241 = arith.divf %239, %240 : vector<8x128xf32>
    %242 = math.tanh %236 : vector<8x128xf32>
    %243 = vector.extract_strided_slice %241 {offsets = [0, 0], sizes = [8, 32], strides = [1, 1]} : vector<8x128xf32> to vector<8x32xf32>
    %244 = vector.extract_strided_slice %241 {offsets = [0, 32], sizes = [8, 32], strides = [1, 1]} : vector<8x128xf32> to vector<8x32xf32>
    %245 = vector.extract_strided_slice %242 {offsets = [0, 64], sizes = [8, 32], strides = [1, 1]} : vector<8x128xf32> to vector<8x32xf32>
    %246 = vector.extract_strided_slice %241 {offsets = [0, 96], sizes = [8, 32], strides = [1, 1]} : vector<8x128xf32> to vector<8x32xf32>
    %247 = arith.mulf %244, %231 : vector<8x32xf32>
    %248 = arith.mulf %243, %245 : vector<8x32xf32>
    %249 = arith.addf %247, %248 : vector<8x32xf32>
    %250 = math.tanh %249 : vector<8x32xf32>
    %251 = arith.mulf %246, %250 : vector<8x32xf32>
    %252 = vector.extract_strided_slice %159 {offsets = [40, 0], sizes = [8, 128], strides = [1, 1]} : vector<64x128xf32> to vector<8x128xf32>
    %cst_44 = arith.constant dense<0.000000e+00> : vector<8x128xf32>
    %253 = tpu.matmul %251, %155, %cst_44 {dimension_numbers = #tpu.dot_dimension_numbers<[1], [0], [0], [1], [0, 0, 1, 1], [], []>} : vector<8x32xf32>, vector<32x128xf32>, vector<8x128xf32> -> vector<8x128xf32>
    %254 = arith.addf %252, %253 : vector<8x128xf32>
    %255 = arith.negf %254 : vector<8x128xf32>
    %256 = math.exp %255 : vector<8x128xf32>
    %cst_45 = arith.constant 1.000000e+00 : f32
    %257 = vector.broadcast %cst_45 : f32 to vector<8x128xf32>
    %258 = arith.addf %257, %256 : vector<8x128xf32>
    %259 = arith.divf %257, %258 : vector<8x128xf32>
    %260 = math.tanh %254 : vector<8x128xf32>
    %261 = vector.extract_strided_slice %259 {offsets = [0, 0], sizes = [8, 32], strides = [1, 1]} : vector<8x128xf32> to vector<8x32xf32>
    %262 = vector.extract_strided_slice %259 {offsets = [0, 32], sizes = [8, 32], strides = [1, 1]} : vector<8x128xf32> to vector<8x32xf32>
    %263 = vector.extract_strided_slice %260 {offsets = [0, 64], sizes = [8, 32], strides = [1, 1]} : vector<8x128xf32> to vector<8x32xf32>
    %264 = vector.extract_strided_slice %259 {offsets = [0, 96], sizes = [8, 32], strides = [1, 1]} : vector<8x128xf32> to vector<8x32xf32>
    %265 = arith.mulf %262, %249 : vector<8x32xf32>
    %266 = arith.mulf %261, %263 : vector<8x32xf32>
    %267 = arith.addf %265, %266 : vector<8x32xf32>
    %268 = math.tanh %267 : vector<8x32xf32>
    %269 = arith.mulf %264, %268 : vector<8x32xf32>
    %270 = vector.extract_strided_slice %159 {offsets = [48, 0], sizes = [8, 128], strides = [1, 1]} : vector<64x128xf32> to vector<8x128xf32>
    %cst_46 = arith.constant dense<0.000000e+00> : vector<8x128xf32>
    %271 = tpu.matmul %269, %155, %cst_46 {dimension_numbers = #tpu.dot_dimension_numbers<[1], [0], [0], [1], [0, 0, 1, 1], [], []>} : vector<8x32xf32>, vector<32x128xf32>, vector<8x128xf32> -> vector<8x128xf32>
    %272 = arith.addf %270, %271 : vector<8x128xf32>
    %273 = arith.negf %272 : vector<8x128xf32>
    %274 = math.exp %273 : vector<8x128xf32>
    %cst_47 = arith.constant 1.000000e+00 : f32
    %275 = vector.broadcast %cst_47 : f32 to vector<8x128xf32>
    %276 = arith.addf %275, %274 : vector<8x128xf32>
    %277 = arith.divf %275, %276 : vector<8x128xf32>
    %278 = math.tanh %272 : vector<8x128xf32>
    %279 = vector.extract_strided_slice %277 {offsets = [0, 0], sizes = [8, 32], strides = [1, 1]} : vector<8x128xf32> to vector<8x32xf32>
    %280 = vector.extract_strided_slice %277 {offsets = [0, 32], sizes = [8, 32], strides = [1, 1]} : vector<8x128xf32> to vector<8x32xf32>
    %281 = vector.extract_strided_slice %278 {offsets = [0, 64], sizes = [8, 32], strides = [1, 1]} : vector<8x128xf32> to vector<8x32xf32>
    %282 = vector.extract_strided_slice %277 {offsets = [0, 96], sizes = [8, 32], strides = [1, 1]} : vector<8x128xf32> to vector<8x32xf32>
    %283 = arith.mulf %280, %267 : vector<8x32xf32>
    %284 = arith.mulf %279, %281 : vector<8x32xf32>
    %285 = arith.addf %283, %284 : vector<8x32xf32>
    %286 = math.tanh %285 : vector<8x32xf32>
    %287 = arith.mulf %282, %286 : vector<8x32xf32>
    %288 = vector.extract_strided_slice %159 {offsets = [56, 0], sizes = [8, 128], strides = [1, 1]} : vector<64x128xf32> to vector<8x128xf32>
    %cst_48 = arith.constant dense<0.000000e+00> : vector<8x128xf32>
    %289 = tpu.matmul %287, %155, %cst_48 {dimension_numbers = #tpu.dot_dimension_numbers<[1], [0], [0], [1], [0, 0, 1, 1], [], []>} : vector<8x32xf32>, vector<32x128xf32>, vector<8x128xf32> -> vector<8x128xf32>
    %290 = arith.addf %288, %289 : vector<8x128xf32>
    %291 = arith.negf %290 : vector<8x128xf32>
    %292 = math.exp %291 : vector<8x128xf32>
    %cst_49 = arith.constant 1.000000e+00 : f32
    %293 = vector.broadcast %cst_49 : f32 to vector<8x128xf32>
    %294 = arith.addf %293, %292 : vector<8x128xf32>
    %295 = arith.divf %293, %294 : vector<8x128xf32>
    %296 = math.tanh %290 : vector<8x128xf32>
    %297 = vector.extract_strided_slice %295 {offsets = [0, 0], sizes = [8, 32], strides = [1, 1]} : vector<8x128xf32> to vector<8x32xf32>
    %298 = vector.extract_strided_slice %295 {offsets = [0, 32], sizes = [8, 32], strides = [1, 1]} : vector<8x128xf32> to vector<8x32xf32>
    %299 = vector.extract_strided_slice %296 {offsets = [0, 64], sizes = [8, 32], strides = [1, 1]} : vector<8x128xf32> to vector<8x32xf32>
    %300 = vector.extract_strided_slice %295 {offsets = [0, 96], sizes = [8, 32], strides = [1, 1]} : vector<8x128xf32> to vector<8x32xf32>
    %301 = arith.mulf %298, %285 : vector<8x32xf32>
    %302 = arith.mulf %297, %299 : vector<8x32xf32>
    %303 = arith.addf %301, %302 : vector<8x32xf32>
    %304 = math.tanh %303 : vector<8x32xf32>
    %305 = arith.mulf %300, %304 : vector<8x32xf32>
    %306 = tpu.concatenate %179, %197, %215, %233, %251, %269, %287, %305 in 0 : vector<8x32xf32>, vector<8x32xf32>, vector<8x32xf32>, vector<8x32xf32>, vector<8x32xf32>, vector<8x32xf32>, vector<8x32xf32>, vector<8x32xf32> -> vector<64x32xf32>
    %c0_50 = arith.constant 0 : index
    %c0_51 = arith.constant 0 : index
    %307 = vector.load %arg7[%c0_50, %c0_51] : memref<32x128xf32, #tpu.memory_space<vmem>>, vector<32x128xf32>
    %c0_52 = arith.constant 0 : index
    %c0_53 = arith.constant 0 : index
    %308 = vector.load %arg8[%c0_52, %c0_53] : memref<32x128xf32, #tpu.memory_space<vmem>>, vector<32x128xf32>
    %c0_54 = arith.constant 0 : index
    %c0_55 = arith.constant 0 : index
    %309 = vector.load %arg9[%c0_54, %c0_55] : memref<1x128xf32, #tpu.memory_space<vmem>>, vector<1x128xf32>
    %cst_56 = arith.constant dense<0.000000e+00> : vector<64x128xf32>
    %310 = tpu.matmul %306, %307, %cst_56 {dimension_numbers = #tpu.dot_dimension_numbers<[1], [0], [0], [1], [0, 0, 1, 1], [], []>} : vector<64x32xf32>, vector<32x128xf32>, vector<64x128xf32> -> vector<64x128xf32>
    %311 = vector.broadcast %309 : vector<1x128xf32> to vector<64x128xf32>
    %312 = arith.addf %310, %311 : vector<64x128xf32>
    %cst_57 = arith.constant 0.000000e+00 : f32
    %313 = vector.broadcast %cst_57 : f32 to vector<8x32xf32>
    %cst_58 = arith.constant 0.000000e+00 : f32
    %314 = vector.broadcast %cst_58 : f32 to vector<8x32xf32>
    %315 = vector.extract_strided_slice %312 {offsets = [0, 0], sizes = [8, 128], strides = [1, 1]} : vector<64x128xf32> to vector<8x128xf32>
    %cst_59 = arith.constant dense<0.000000e+00> : vector<8x128xf32>
    %316 = tpu.matmul %313, %308, %cst_59 {dimension_numbers = #tpu.dot_dimension_numbers<[1], [0], [0], [1], [0, 0, 1, 1], [], []>} : vector<8x32xf32>, vector<32x128xf32>, vector<8x128xf32> -> vector<8x128xf32>
    %317 = arith.addf %315, %316 : vector<8x128xf32>
    %318 = arith.negf %317 : vector<8x128xf32>
    %319 = math.exp %318 : vector<8x128xf32>
    %cst_60 = arith.constant 1.000000e+00 : f32
    %320 = vector.broadcast %cst_60 : f32 to vector<8x128xf32>
    %321 = arith.addf %320, %319 : vector<8x128xf32>
    %322 = arith.divf %320, %321 : vector<8x128xf32>
    %323 = math.tanh %317 : vector<8x128xf32>
    %324 = vector.extract_strided_slice %322 {offsets = [0, 0], sizes = [8, 32], strides = [1, 1]} : vector<8x128xf32> to vector<8x32xf32>
    %325 = vector.extract_strided_slice %322 {offsets = [0, 32], sizes = [8, 32], strides = [1, 1]} : vector<8x128xf32> to vector<8x32xf32>
    %326 = vector.extract_strided_slice %323 {offsets = [0, 64], sizes = [8, 32], strides = [1, 1]} : vector<8x128xf32> to vector<8x32xf32>
    %327 = vector.extract_strided_slice %322 {offsets = [0, 96], sizes = [8, 32], strides = [1, 1]} : vector<8x128xf32> to vector<8x32xf32>
    %328 = arith.mulf %325, %314 : vector<8x32xf32>
    %329 = arith.mulf %324, %326 : vector<8x32xf32>
    %330 = arith.addf %328, %329 : vector<8x32xf32>
    %331 = math.tanh %330 : vector<8x32xf32>
    %332 = arith.mulf %327, %331 : vector<8x32xf32>
    %333 = vector.extract_strided_slice %312 {offsets = [8, 0], sizes = [8, 128], strides = [1, 1]} : vector<64x128xf32> to vector<8x128xf32>
    %cst_61 = arith.constant dense<0.000000e+00> : vector<8x128xf32>
    %334 = tpu.matmul %332, %308, %cst_61 {dimension_numbers = #tpu.dot_dimension_numbers<[1], [0], [0], [1], [0, 0, 1, 1], [], []>} : vector<8x32xf32>, vector<32x128xf32>, vector<8x128xf32> -> vector<8x128xf32>
    %335 = arith.addf %333, %334 : vector<8x128xf32>
    %336 = arith.negf %335 : vector<8x128xf32>
    %337 = math.exp %336 : vector<8x128xf32>
    %cst_62 = arith.constant 1.000000e+00 : f32
    %338 = vector.broadcast %cst_62 : f32 to vector<8x128xf32>
    %339 = arith.addf %338, %337 : vector<8x128xf32>
    %340 = arith.divf %338, %339 : vector<8x128xf32>
    %341 = math.tanh %335 : vector<8x128xf32>
    %342 = vector.extract_strided_slice %340 {offsets = [0, 0], sizes = [8, 32], strides = [1, 1]} : vector<8x128xf32> to vector<8x32xf32>
    %343 = vector.extract_strided_slice %340 {offsets = [0, 32], sizes = [8, 32], strides = [1, 1]} : vector<8x128xf32> to vector<8x32xf32>
    %344 = vector.extract_strided_slice %341 {offsets = [0, 64], sizes = [8, 32], strides = [1, 1]} : vector<8x128xf32> to vector<8x32xf32>
    %345 = vector.extract_strided_slice %340 {offsets = [0, 96], sizes = [8, 32], strides = [1, 1]} : vector<8x128xf32> to vector<8x32xf32>
    %346 = arith.mulf %343, %330 : vector<8x32xf32>
    %347 = arith.mulf %342, %344 : vector<8x32xf32>
    %348 = arith.addf %346, %347 : vector<8x32xf32>
    %349 = math.tanh %348 : vector<8x32xf32>
    %350 = arith.mulf %345, %349 : vector<8x32xf32>
    %351 = vector.extract_strided_slice %312 {offsets = [16, 0], sizes = [8, 128], strides = [1, 1]} : vector<64x128xf32> to vector<8x128xf32>
    %cst_63 = arith.constant dense<0.000000e+00> : vector<8x128xf32>
    %352 = tpu.matmul %350, %308, %cst_63 {dimension_numbers = #tpu.dot_dimension_numbers<[1], [0], [0], [1], [0, 0, 1, 1], [], []>} : vector<8x32xf32>, vector<32x128xf32>, vector<8x128xf32> -> vector<8x128xf32>
    %353 = arith.addf %351, %352 : vector<8x128xf32>
    %354 = arith.negf %353 : vector<8x128xf32>
    %355 = math.exp %354 : vector<8x128xf32>
    %cst_64 = arith.constant 1.000000e+00 : f32
    %356 = vector.broadcast %cst_64 : f32 to vector<8x128xf32>
    %357 = arith.addf %356, %355 : vector<8x128xf32>
    %358 = arith.divf %356, %357 : vector<8x128xf32>
    %359 = math.tanh %353 : vector<8x128xf32>
    %360 = vector.extract_strided_slice %358 {offsets = [0, 0], sizes = [8, 32], strides = [1, 1]} : vector<8x128xf32> to vector<8x32xf32>
    %361 = vector.extract_strided_slice %358 {offsets = [0, 32], sizes = [8, 32], strides = [1, 1]} : vector<8x128xf32> to vector<8x32xf32>
    %362 = vector.extract_strided_slice %359 {offsets = [0, 64], sizes = [8, 32], strides = [1, 1]} : vector<8x128xf32> to vector<8x32xf32>
    %363 = vector.extract_strided_slice %358 {offsets = [0, 96], sizes = [8, 32], strides = [1, 1]} : vector<8x128xf32> to vector<8x32xf32>
    %364 = arith.mulf %361, %348 : vector<8x32xf32>
    %365 = arith.mulf %360, %362 : vector<8x32xf32>
    %366 = arith.addf %364, %365 : vector<8x32xf32>
    %367 = math.tanh %366 : vector<8x32xf32>
    %368 = arith.mulf %363, %367 : vector<8x32xf32>
    %369 = vector.extract_strided_slice %312 {offsets = [24, 0], sizes = [8, 128], strides = [1, 1]} : vector<64x128xf32> to vector<8x128xf32>
    %cst_65 = arith.constant dense<0.000000e+00> : vector<8x128xf32>
    %370 = tpu.matmul %368, %308, %cst_65 {dimension_numbers = #tpu.dot_dimension_numbers<[1], [0], [0], [1], [0, 0, 1, 1], [], []>} : vector<8x32xf32>, vector<32x128xf32>, vector<8x128xf32> -> vector<8x128xf32>
    %371 = arith.addf %369, %370 : vector<8x128xf32>
    %372 = arith.negf %371 : vector<8x128xf32>
    %373 = math.exp %372 : vector<8x128xf32>
    %cst_66 = arith.constant 1.000000e+00 : f32
    %374 = vector.broadcast %cst_66 : f32 to vector<8x128xf32>
    %375 = arith.addf %374, %373 : vector<8x128xf32>
    %376 = arith.divf %374, %375 : vector<8x128xf32>
    %377 = math.tanh %371 : vector<8x128xf32>
    %378 = vector.extract_strided_slice %376 {offsets = [0, 0], sizes = [8, 32], strides = [1, 1]} : vector<8x128xf32> to vector<8x32xf32>
    %379 = vector.extract_strided_slice %376 {offsets = [0, 32], sizes = [8, 32], strides = [1, 1]} : vector<8x128xf32> to vector<8x32xf32>
    %380 = vector.extract_strided_slice %377 {offsets = [0, 64], sizes = [8, 32], strides = [1, 1]} : vector<8x128xf32> to vector<8x32xf32>
    %381 = vector.extract_strided_slice %376 {offsets = [0, 96], sizes = [8, 32], strides = [1, 1]} : vector<8x128xf32> to vector<8x32xf32>
    %382 = arith.mulf %379, %366 : vector<8x32xf32>
    %383 = arith.mulf %378, %380 : vector<8x32xf32>
    %384 = arith.addf %382, %383 : vector<8x32xf32>
    %385 = math.tanh %384 : vector<8x32xf32>
    %386 = arith.mulf %381, %385 : vector<8x32xf32>
    %387 = vector.extract_strided_slice %312 {offsets = [32, 0], sizes = [8, 128], strides = [1, 1]} : vector<64x128xf32> to vector<8x128xf32>
    %cst_67 = arith.constant dense<0.000000e+00> : vector<8x128xf32>
    %388 = tpu.matmul %386, %308, %cst_67 {dimension_numbers = #tpu.dot_dimension_numbers<[1], [0], [0], [1], [0, 0, 1, 1], [], []>} : vector<8x32xf32>, vector<32x128xf32>, vector<8x128xf32> -> vector<8x128xf32>
    %389 = arith.addf %387, %388 : vector<8x128xf32>
    %390 = arith.negf %389 : vector<8x128xf32>
    %391 = math.exp %390 : vector<8x128xf32>
    %cst_68 = arith.constant 1.000000e+00 : f32
    %392 = vector.broadcast %cst_68 : f32 to vector<8x128xf32>
    %393 = arith.addf %392, %391 : vector<8x128xf32>
    %394 = arith.divf %392, %393 : vector<8x128xf32>
    %395 = math.tanh %389 : vector<8x128xf32>
    %396 = vector.extract_strided_slice %394 {offsets = [0, 0], sizes = [8, 32], strides = [1, 1]} : vector<8x128xf32> to vector<8x32xf32>
    %397 = vector.extract_strided_slice %394 {offsets = [0, 32], sizes = [8, 32], strides = [1, 1]} : vector<8x128xf32> to vector<8x32xf32>
    %398 = vector.extract_strided_slice %395 {offsets = [0, 64], sizes = [8, 32], strides = [1, 1]} : vector<8x128xf32> to vector<8x32xf32>
    %399 = vector.extract_strided_slice %394 {offsets = [0, 96], sizes = [8, 32], strides = [1, 1]} : vector<8x128xf32> to vector<8x32xf32>
    %400 = arith.mulf %397, %384 : vector<8x32xf32>
    %401 = arith.mulf %396, %398 : vector<8x32xf32>
    %402 = arith.addf %400, %401 : vector<8x32xf32>
    %403 = math.tanh %402 : vector<8x32xf32>
    %404 = arith.mulf %399, %403 : vector<8x32xf32>
    %405 = vector.extract_strided_slice %312 {offsets = [40, 0], sizes = [8, 128], strides = [1, 1]} : vector<64x128xf32> to vector<8x128xf32>
    %cst_69 = arith.constant dense<0.000000e+00> : vector<8x128xf32>
    %406 = tpu.matmul %404, %308, %cst_69 {dimension_numbers = #tpu.dot_dimension_numbers<[1], [0], [0], [1], [0, 0, 1, 1], [], []>} : vector<8x32xf32>, vector<32x128xf32>, vector<8x128xf32> -> vector<8x128xf32>
    %407 = arith.addf %405, %406 : vector<8x128xf32>
    %408 = arith.negf %407 : vector<8x128xf32>
    %409 = math.exp %408 : vector<8x128xf32>
    %cst_70 = arith.constant 1.000000e+00 : f32
    %410 = vector.broadcast %cst_70 : f32 to vector<8x128xf32>
    %411 = arith.addf %410, %409 : vector<8x128xf32>
    %412 = arith.divf %410, %411 : vector<8x128xf32>
    %413 = math.tanh %407 : vector<8x128xf32>
    %414 = vector.extract_strided_slice %412 {offsets = [0, 0], sizes = [8, 32], strides = [1, 1]} : vector<8x128xf32> to vector<8x32xf32>
    %415 = vector.extract_strided_slice %412 {offsets = [0, 32], sizes = [8, 32], strides = [1, 1]} : vector<8x128xf32> to vector<8x32xf32>
    %416 = vector.extract_strided_slice %413 {offsets = [0, 64], sizes = [8, 32], strides = [1, 1]} : vector<8x128xf32> to vector<8x32xf32>
    %417 = vector.extract_strided_slice %412 {offsets = [0, 96], sizes = [8, 32], strides = [1, 1]} : vector<8x128xf32> to vector<8x32xf32>
    %418 = arith.mulf %415, %402 : vector<8x32xf32>
    %419 = arith.mulf %414, %416 : vector<8x32xf32>
    %420 = arith.addf %418, %419 : vector<8x32xf32>
    %421 = math.tanh %420 : vector<8x32xf32>
    %422 = arith.mulf %417, %421 : vector<8x32xf32>
    %423 = vector.extract_strided_slice %312 {offsets = [48, 0], sizes = [8, 128], strides = [1, 1]} : vector<64x128xf32> to vector<8x128xf32>
    %cst_71 = arith.constant dense<0.000000e+00> : vector<8x128xf32>
    %424 = tpu.matmul %422, %308, %cst_71 {dimension_numbers = #tpu.dot_dimension_numbers<[1], [0], [0], [1], [0, 0, 1, 1], [], []>} : vector<8x32xf32>, vector<32x128xf32>, vector<8x128xf32> -> vector<8x128xf32>
    %425 = arith.addf %423, %424 : vector<8x128xf32>
    %426 = arith.negf %425 : vector<8x128xf32>
    %427 = math.exp %426 : vector<8x128xf32>
    %cst_72 = arith.constant 1.000000e+00 : f32
    %428 = vector.broadcast %cst_72 : f32 to vector<8x128xf32>
    %429 = arith.addf %428, %427 : vector<8x128xf32>
    %430 = arith.divf %428, %429 : vector<8x128xf32>
    %431 = math.tanh %425 : vector<8x128xf32>
    %432 = vector.extract_strided_slice %430 {offsets = [0, 0], sizes = [8, 32], strides = [1, 1]} : vector<8x128xf32> to vector<8x32xf32>
    %433 = vector.extract_strided_slice %430 {offsets = [0, 32], sizes = [8, 32], strides = [1, 1]} : vector<8x128xf32> to vector<8x32xf32>
    %434 = vector.extract_strided_slice %431 {offsets = [0, 64], sizes = [8, 32], strides = [1, 1]} : vector<8x128xf32> to vector<8x32xf32>
    %435 = vector.extract_strided_slice %430 {offsets = [0, 96], sizes = [8, 32], strides = [1, 1]} : vector<8x128xf32> to vector<8x32xf32>
    %436 = arith.mulf %433, %420 : vector<8x32xf32>
    %437 = arith.mulf %432, %434 : vector<8x32xf32>
    %438 = arith.addf %436, %437 : vector<8x32xf32>
    %439 = math.tanh %438 : vector<8x32xf32>
    %440 = arith.mulf %435, %439 : vector<8x32xf32>
    %441 = vector.extract_strided_slice %312 {offsets = [56, 0], sizes = [8, 128], strides = [1, 1]} : vector<64x128xf32> to vector<8x128xf32>
    %cst_73 = arith.constant dense<0.000000e+00> : vector<8x128xf32>
    %442 = tpu.matmul %440, %308, %cst_73 {dimension_numbers = #tpu.dot_dimension_numbers<[1], [0], [0], [1], [0, 0, 1, 1], [], []>} : vector<8x32xf32>, vector<32x128xf32>, vector<8x128xf32> -> vector<8x128xf32>
    %443 = arith.addf %441, %442 : vector<8x128xf32>
    %444 = arith.negf %443 : vector<8x128xf32>
    %445 = math.exp %444 : vector<8x128xf32>
    %cst_74 = arith.constant 1.000000e+00 : f32
    %446 = vector.broadcast %cst_74 : f32 to vector<8x128xf32>
    %447 = arith.addf %446, %445 : vector<8x128xf32>
    %448 = arith.divf %446, %447 : vector<8x128xf32>
    %449 = math.tanh %443 : vector<8x128xf32>
    %450 = vector.extract_strided_slice %448 {offsets = [0, 0], sizes = [8, 32], strides = [1, 1]} : vector<8x128xf32> to vector<8x32xf32>
    %451 = vector.extract_strided_slice %448 {offsets = [0, 32], sizes = [8, 32], strides = [1, 1]} : vector<8x128xf32> to vector<8x32xf32>
    %452 = vector.extract_strided_slice %449 {offsets = [0, 64], sizes = [8, 32], strides = [1, 1]} : vector<8x128xf32> to vector<8x32xf32>
    %453 = vector.extract_strided_slice %448 {offsets = [0, 96], sizes = [8, 32], strides = [1, 1]} : vector<8x128xf32> to vector<8x32xf32>
    %454 = arith.mulf %451, %438 : vector<8x32xf32>
    %455 = arith.mulf %450, %452 : vector<8x32xf32>
    %456 = arith.addf %454, %455 : vector<8x32xf32>
    %457 = math.tanh %456 : vector<8x32xf32>
    %458 = arith.mulf %453, %457 : vector<8x32xf32>
    %459 = tpu.concatenate %332, %350, %368, %386, %404, %422, %440, %458 in 0 : vector<8x32xf32>, vector<8x32xf32>, vector<8x32xf32>, vector<8x32xf32>, vector<8x32xf32>, vector<8x32xf32>, vector<8x32xf32>, vector<8x32xf32> -> vector<64x32xf32>
    %c0_75 = arith.constant 0 : index
    %c0_76 = arith.constant 0 : index
    %460 = vector.load %arg10[%c0_75, %c0_76] : memref<32x128xf32, #tpu.memory_space<vmem>>, vector<32x128xf32>
    %c0_77 = arith.constant 0 : index
    %c0_78 = arith.constant 0 : index
    %461 = vector.load %arg11[%c0_77, %c0_78] : memref<32x128xf32, #tpu.memory_space<vmem>>, vector<32x128xf32>
    %c0_79 = arith.constant 0 : index
    %c0_80 = arith.constant 0 : index
    %462 = vector.load %arg12[%c0_79, %c0_80] : memref<1x128xf32, #tpu.memory_space<vmem>>, vector<1x128xf32>
    %cst_81 = arith.constant dense<0.000000e+00> : vector<64x128xf32>
    %463 = tpu.matmul %459, %460, %cst_81 {dimension_numbers = #tpu.dot_dimension_numbers<[1], [0], [0], [1], [0, 0, 1, 1], [], []>} : vector<64x32xf32>, vector<32x128xf32>, vector<64x128xf32> -> vector<64x128xf32>
    %464 = vector.broadcast %462 : vector<1x128xf32> to vector<64x128xf32>
    %465 = arith.addf %463, %464 : vector<64x128xf32>
    %cst_82 = arith.constant 0.000000e+00 : f32
    %466 = vector.broadcast %cst_82 : f32 to vector<8x32xf32>
    %cst_83 = arith.constant 0.000000e+00 : f32
    %467 = vector.broadcast %cst_83 : f32 to vector<8x32xf32>
    %468 = vector.extract_strided_slice %465 {offsets = [0, 0], sizes = [8, 128], strides = [1, 1]} : vector<64x128xf32> to vector<8x128xf32>
    %cst_84 = arith.constant dense<0.000000e+00> : vector<8x128xf32>
    %469 = tpu.matmul %466, %461, %cst_84 {dimension_numbers = #tpu.dot_dimension_numbers<[1], [0], [0], [1], [0, 0, 1, 1], [], []>} : vector<8x32xf32>, vector<32x128xf32>, vector<8x128xf32> -> vector<8x128xf32>
    %470 = arith.addf %468, %469 : vector<8x128xf32>
    %471 = arith.negf %470 : vector<8x128xf32>
    %472 = math.exp %471 : vector<8x128xf32>
    %cst_85 = arith.constant 1.000000e+00 : f32
    %473 = vector.broadcast %cst_85 : f32 to vector<8x128xf32>
    %474 = arith.addf %473, %472 : vector<8x128xf32>
    %475 = arith.divf %473, %474 : vector<8x128xf32>
    %476 = math.tanh %470 : vector<8x128xf32>
    %477 = vector.extract_strided_slice %475 {offsets = [0, 0], sizes = [8, 32], strides = [1, 1]} : vector<8x128xf32> to vector<8x32xf32>
    %478 = vector.extract_strided_slice %475 {offsets = [0, 32], sizes = [8, 32], strides = [1, 1]} : vector<8x128xf32> to vector<8x32xf32>
    %479 = vector.extract_strided_slice %476 {offsets = [0, 64], sizes = [8, 32], strides = [1, 1]} : vector<8x128xf32> to vector<8x32xf32>
    %480 = vector.extract_strided_slice %475 {offsets = [0, 96], sizes = [8, 32], strides = [1, 1]} : vector<8x128xf32> to vector<8x32xf32>
    %481 = arith.mulf %478, %467 : vector<8x32xf32>
    %482 = arith.mulf %477, %479 : vector<8x32xf32>
    %483 = arith.addf %481, %482 : vector<8x32xf32>
    %484 = math.tanh %483 : vector<8x32xf32>
    %485 = arith.mulf %480, %484 : vector<8x32xf32>
    %486 = vector.extract_strided_slice %465 {offsets = [8, 0], sizes = [8, 128], strides = [1, 1]} : vector<64x128xf32> to vector<8x128xf32>
    %cst_86 = arith.constant dense<0.000000e+00> : vector<8x128xf32>
    %487 = tpu.matmul %485, %461, %cst_86 {dimension_numbers = #tpu.dot_dimension_numbers<[1], [0], [0], [1], [0, 0, 1, 1], [], []>} : vector<8x32xf32>, vector<32x128xf32>, vector<8x128xf32> -> vector<8x128xf32>
    %488 = arith.addf %486, %487 : vector<8x128xf32>
    %489 = arith.negf %488 : vector<8x128xf32>
    %490 = math.exp %489 : vector<8x128xf32>
    %cst_87 = arith.constant 1.000000e+00 : f32
    %491 = vector.broadcast %cst_87 : f32 to vector<8x128xf32>
    %492 = arith.addf %491, %490 : vector<8x128xf32>
    %493 = arith.divf %491, %492 : vector<8x128xf32>
    %494 = math.tanh %488 : vector<8x128xf32>
    %495 = vector.extract_strided_slice %493 {offsets = [0, 0], sizes = [8, 32], strides = [1, 1]} : vector<8x128xf32> to vector<8x32xf32>
    %496 = vector.extract_strided_slice %493 {offsets = [0, 32], sizes = [8, 32], strides = [1, 1]} : vector<8x128xf32> to vector<8x32xf32>
    %497 = vector.extract_strided_slice %494 {offsets = [0, 64], sizes = [8, 32], strides = [1, 1]} : vector<8x128xf32> to vector<8x32xf32>
    %498 = vector.extract_strided_slice %493 {offsets = [0, 96], sizes = [8, 32], strides = [1, 1]} : vector<8x128xf32> to vector<8x32xf32>
    %499 = arith.mulf %496, %483 : vector<8x32xf32>
    %500 = arith.mulf %495, %497 : vector<8x32xf32>
    %501 = arith.addf %499, %500 : vector<8x32xf32>
    %502 = math.tanh %501 : vector<8x32xf32>
    %503 = arith.mulf %498, %502 : vector<8x32xf32>
    %504 = vector.extract_strided_slice %465 {offsets = [16, 0], sizes = [8, 128], strides = [1, 1]} : vector<64x128xf32> to vector<8x128xf32>
    %cst_88 = arith.constant dense<0.000000e+00> : vector<8x128xf32>
    %505 = tpu.matmul %503, %461, %cst_88 {dimension_numbers = #tpu.dot_dimension_numbers<[1], [0], [0], [1], [0, 0, 1, 1], [], []>} : vector<8x32xf32>, vector<32x128xf32>, vector<8x128xf32> -> vector<8x128xf32>
    %506 = arith.addf %504, %505 : vector<8x128xf32>
    %507 = arith.negf %506 : vector<8x128xf32>
    %508 = math.exp %507 : vector<8x128xf32>
    %cst_89 = arith.constant 1.000000e+00 : f32
    %509 = vector.broadcast %cst_89 : f32 to vector<8x128xf32>
    %510 = arith.addf %509, %508 : vector<8x128xf32>
    %511 = arith.divf %509, %510 : vector<8x128xf32>
    %512 = math.tanh %506 : vector<8x128xf32>
    %513 = vector.extract_strided_slice %511 {offsets = [0, 0], sizes = [8, 32], strides = [1, 1]} : vector<8x128xf32> to vector<8x32xf32>
    %514 = vector.extract_strided_slice %511 {offsets = [0, 32], sizes = [8, 32], strides = [1, 1]} : vector<8x128xf32> to vector<8x32xf32>
    %515 = vector.extract_strided_slice %512 {offsets = [0, 64], sizes = [8, 32], strides = [1, 1]} : vector<8x128xf32> to vector<8x32xf32>
    %516 = vector.extract_strided_slice %511 {offsets = [0, 96], sizes = [8, 32], strides = [1, 1]} : vector<8x128xf32> to vector<8x32xf32>
    %517 = arith.mulf %514, %501 : vector<8x32xf32>
    %518 = arith.mulf %513, %515 : vector<8x32xf32>
    %519 = arith.addf %517, %518 : vector<8x32xf32>
    %520 = math.tanh %519 : vector<8x32xf32>
    %521 = arith.mulf %516, %520 : vector<8x32xf32>
    %522 = vector.extract_strided_slice %465 {offsets = [24, 0], sizes = [8, 128], strides = [1, 1]} : vector<64x128xf32> to vector<8x128xf32>
    %cst_90 = arith.constant dense<0.000000e+00> : vector<8x128xf32>
    %523 = tpu.matmul %521, %461, %cst_90 {dimension_numbers = #tpu.dot_dimension_numbers<[1], [0], [0], [1], [0, 0, 1, 1], [], []>} : vector<8x32xf32>, vector<32x128xf32>, vector<8x128xf32> -> vector<8x128xf32>
    %524 = arith.addf %522, %523 : vector<8x128xf32>
    %525 = arith.negf %524 : vector<8x128xf32>
    %526 = math.exp %525 : vector<8x128xf32>
    %cst_91 = arith.constant 1.000000e+00 : f32
    %527 = vector.broadcast %cst_91 : f32 to vector<8x128xf32>
    %528 = arith.addf %527, %526 : vector<8x128xf32>
    %529 = arith.divf %527, %528 : vector<8x128xf32>
    %530 = math.tanh %524 : vector<8x128xf32>
    %531 = vector.extract_strided_slice %529 {offsets = [0, 0], sizes = [8, 32], strides = [1, 1]} : vector<8x128xf32> to vector<8x32xf32>
    %532 = vector.extract_strided_slice %529 {offsets = [0, 32], sizes = [8, 32], strides = [1, 1]} : vector<8x128xf32> to vector<8x32xf32>
    %533 = vector.extract_strided_slice %530 {offsets = [0, 64], sizes = [8, 32], strides = [1, 1]} : vector<8x128xf32> to vector<8x32xf32>
    %534 = vector.extract_strided_slice %529 {offsets = [0, 96], sizes = [8, 32], strides = [1, 1]} : vector<8x128xf32> to vector<8x32xf32>
    %535 = arith.mulf %532, %519 : vector<8x32xf32>
    %536 = arith.mulf %531, %533 : vector<8x32xf32>
    %537 = arith.addf %535, %536 : vector<8x32xf32>
    %538 = math.tanh %537 : vector<8x32xf32>
    %539 = arith.mulf %534, %538 : vector<8x32xf32>
    %540 = vector.extract_strided_slice %465 {offsets = [32, 0], sizes = [8, 128], strides = [1, 1]} : vector<64x128xf32> to vector<8x128xf32>
    %cst_92 = arith.constant dense<0.000000e+00> : vector<8x128xf32>
    %541 = tpu.matmul %539, %461, %cst_92 {dimension_numbers = #tpu.dot_dimension_numbers<[1], [0], [0], [1], [0, 0, 1, 1], [], []>} : vector<8x32xf32>, vector<32x128xf32>, vector<8x128xf32> -> vector<8x128xf32>
    %542 = arith.addf %540, %541 : vector<8x128xf32>
    %543 = arith.negf %542 : vector<8x128xf32>
    %544 = math.exp %543 : vector<8x128xf32>
    %cst_93 = arith.constant 1.000000e+00 : f32
    %545 = vector.broadcast %cst_93 : f32 to vector<8x128xf32>
    %546 = arith.addf %545, %544 : vector<8x128xf32>
    %547 = arith.divf %545, %546 : vector<8x128xf32>
    %548 = math.tanh %542 : vector<8x128xf32>
    %549 = vector.extract_strided_slice %547 {offsets = [0, 0], sizes = [8, 32], strides = [1, 1]} : vector<8x128xf32> to vector<8x32xf32>
    %550 = vector.extract_strided_slice %547 {offsets = [0, 32], sizes = [8, 32], strides = [1, 1]} : vector<8x128xf32> to vector<8x32xf32>
    %551 = vector.extract_strided_slice %548 {offsets = [0, 64], sizes = [8, 32], strides = [1, 1]} : vector<8x128xf32> to vector<8x32xf32>
    %552 = vector.extract_strided_slice %547 {offsets = [0, 96], sizes = [8, 32], strides = [1, 1]} : vector<8x128xf32> to vector<8x32xf32>
    %553 = arith.mulf %550, %537 : vector<8x32xf32>
    %554 = arith.mulf %549, %551 : vector<8x32xf32>
    %555 = arith.addf %553, %554 : vector<8x32xf32>
    %556 = math.tanh %555 : vector<8x32xf32>
    %557 = arith.mulf %552, %556 : vector<8x32xf32>
    %558 = vector.extract_strided_slice %465 {offsets = [40, 0], sizes = [8, 128], strides = [1, 1]} : vector<64x128xf32> to vector<8x128xf32>
    %cst_94 = arith.constant dense<0.000000e+00> : vector<8x128xf32>
    %559 = tpu.matmul %557, %461, %cst_94 {dimension_numbers = #tpu.dot_dimension_numbers<[1], [0], [0], [1], [0, 0, 1, 1], [], []>} : vector<8x32xf32>, vector<32x128xf32>, vector<8x128xf32> -> vector<8x128xf32>
    %560 = arith.addf %558, %559 : vector<8x128xf32>
    %561 = arith.negf %560 : vector<8x128xf32>
    %562 = math.exp %561 : vector<8x128xf32>
    %cst_95 = arith.constant 1.000000e+00 : f32
    %563 = vector.broadcast %cst_95 : f32 to vector<8x128xf32>
    %564 = arith.addf %563, %562 : vector<8x128xf32>
    %565 = arith.divf %563, %564 : vector<8x128xf32>
    %566 = math.tanh %560 : vector<8x128xf32>
    %567 = vector.extract_strided_slice %565 {offsets = [0, 0], sizes = [8, 32], strides = [1, 1]} : vector<8x128xf32> to vector<8x32xf32>
    %568 = vector.extract_strided_slice %565 {offsets = [0, 32], sizes = [8, 32], strides = [1, 1]} : vector<8x128xf32> to vector<8x32xf32>
    %569 = vector.extract_strided_slice %566 {offsets = [0, 64], sizes = [8, 32], strides = [1, 1]} : vector<8x128xf32> to vector<8x32xf32>
    %570 = vector.extract_strided_slice %565 {offsets = [0, 96], sizes = [8, 32], strides = [1, 1]} : vector<8x128xf32> to vector<8x32xf32>
    %571 = arith.mulf %568, %555 : vector<8x32xf32>
    %572 = arith.mulf %567, %569 : vector<8x32xf32>
    %573 = arith.addf %571, %572 : vector<8x32xf32>
    %574 = math.tanh %573 : vector<8x32xf32>
    %575 = arith.mulf %570, %574 : vector<8x32xf32>
    %576 = vector.extract_strided_slice %465 {offsets = [48, 0], sizes = [8, 128], strides = [1, 1]} : vector<64x128xf32> to vector<8x128xf32>
    %cst_96 = arith.constant dense<0.000000e+00> : vector<8x128xf32>
    %577 = tpu.matmul %575, %461, %cst_96 {dimension_numbers = #tpu.dot_dimension_numbers<[1], [0], [0], [1], [0, 0, 1, 1], [], []>} : vector<8x32xf32>, vector<32x128xf32>, vector<8x128xf32> -> vector<8x128xf32>
    %578 = arith.addf %576, %577 : vector<8x128xf32>
    %579 = arith.negf %578 : vector<8x128xf32>
    %580 = math.exp %579 : vector<8x128xf32>
    %cst_97 = arith.constant 1.000000e+00 : f32
    %581 = vector.broadcast %cst_97 : f32 to vector<8x128xf32>
    %582 = arith.addf %581, %580 : vector<8x128xf32>
    %583 = arith.divf %581, %582 : vector<8x128xf32>
    %584 = math.tanh %578 : vector<8x128xf32>
    %585 = vector.extract_strided_slice %583 {offsets = [0, 0], sizes = [8, 32], strides = [1, 1]} : vector<8x128xf32> to vector<8x32xf32>
    %586 = vector.extract_strided_slice %583 {offsets = [0, 32], sizes = [8, 32], strides = [1, 1]} : vector<8x128xf32> to vector<8x32xf32>
    %587 = vector.extract_strided_slice %584 {offsets = [0, 64], sizes = [8, 32], strides = [1, 1]} : vector<8x128xf32> to vector<8x32xf32>
    %588 = vector.extract_strided_slice %583 {offsets = [0, 96], sizes = [8, 32], strides = [1, 1]} : vector<8x128xf32> to vector<8x32xf32>
    %589 = arith.mulf %586, %573 : vector<8x32xf32>
    %590 = arith.mulf %585, %587 : vector<8x32xf32>
    %591 = arith.addf %589, %590 : vector<8x32xf32>
    %592 = math.tanh %591 : vector<8x32xf32>
    %593 = arith.mulf %588, %592 : vector<8x32xf32>
    %594 = vector.extract_strided_slice %465 {offsets = [56, 0], sizes = [8, 128], strides = [1, 1]} : vector<64x128xf32> to vector<8x128xf32>
    %cst_98 = arith.constant dense<0.000000e+00> : vector<8x128xf32>
    %595 = tpu.matmul %593, %461, %cst_98 {dimension_numbers = #tpu.dot_dimension_numbers<[1], [0], [0], [1], [0, 0, 1, 1], [], []>} : vector<8x32xf32>, vector<32x128xf32>, vector<8x128xf32> -> vector<8x128xf32>
    %596 = arith.addf %594, %595 : vector<8x128xf32>
    %597 = arith.negf %596 : vector<8x128xf32>
    %598 = math.exp %597 : vector<8x128xf32>
    %cst_99 = arith.constant 1.000000e+00 : f32
    %599 = vector.broadcast %cst_99 : f32 to vector<8x128xf32>
    %600 = arith.addf %599, %598 : vector<8x128xf32>
    %601 = arith.divf %599, %600 : vector<8x128xf32>
    %602 = math.tanh %596 : vector<8x128xf32>
    %603 = vector.extract_strided_slice %601 {offsets = [0, 0], sizes = [8, 32], strides = [1, 1]} : vector<8x128xf32> to vector<8x32xf32>
    %604 = vector.extract_strided_slice %601 {offsets = [0, 32], sizes = [8, 32], strides = [1, 1]} : vector<8x128xf32> to vector<8x32xf32>
    %605 = vector.extract_strided_slice %602 {offsets = [0, 64], sizes = [8, 32], strides = [1, 1]} : vector<8x128xf32> to vector<8x32xf32>
    %606 = vector.extract_strided_slice %601 {offsets = [0, 96], sizes = [8, 32], strides = [1, 1]} : vector<8x128xf32> to vector<8x32xf32>
    %607 = arith.mulf %604, %591 : vector<8x32xf32>
    %608 = arith.mulf %603, %605 : vector<8x32xf32>
    %609 = arith.addf %607, %608 : vector<8x32xf32>
    %610 = math.tanh %609 : vector<8x32xf32>
    %611 = arith.mulf %606, %610 : vector<8x32xf32>
    %c0_100 = arith.constant 0 : index
    %c0_101 = arith.constant 0 : index
    %612 = vector.load %arg13[%c0_100, %c0_101] : memref<32x384xf32, #tpu.memory_space<vmem>>, vector<32x384xf32>
    %cst_102 = arith.constant dense<0.000000e+00> : vector<8x384xf32>
    %613 = tpu.matmul %611, %612, %cst_102 {dimension_numbers = #tpu.dot_dimension_numbers<[1], [0], [0], [1], [0, 0, 1, 1], [], []>} : vector<8x32xf32>, vector<32x384xf32>, vector<8x384xf32> -> vector<8x384xf32>
    %c0_103 = arith.constant 0 : index
    %c0_104 = arith.constant 0 : index
    %614 = vector.load %arg14[%c0_103, %c0_104] : memref<1x384xf32, #tpu.memory_space<vmem>>, vector<1x384xf32>
    %615 = vector.broadcast %614 : vector<1x384xf32> to vector<8x384xf32>
    %616 = arith.addf %613, %615 : vector<8x384xf32>
    %c0_105 = arith.constant 0 : index
    %c0_106 = arith.constant 0 : index
    %617 = vector.load %arg15[%c0_105, %c0_106] : memref<384x128xf32, #tpu.memory_space<vmem>>, vector<384x128xf32>
    %cst_107 = arith.constant dense<0.000000e+00> : vector<8x128xf32>
    %618 = tpu.matmul %616, %617, %cst_107 {dimension_numbers = #tpu.dot_dimension_numbers<[1], [0], [0], [1], [0, 0, 1, 1], [], []>} : vector<8x384xf32>, vector<384x128xf32>, vector<8x128xf32> -> vector<8x128xf32>
    %c0_108 = arith.constant 0 : index
    %c0_109 = arith.constant 0 : index
    %619 = vector.load %arg16[%c0_108, %c0_109] : memref<1x128xf32, #tpu.memory_space<vmem>>, vector<1x128xf32>
    %620 = vector.broadcast %619 : vector<1x128xf32> to vector<8x128xf32>
    %621 = arith.addf %618, %620 : vector<8x128xf32>
    %cst_110 = arith.constant 0.000000e+00 : f32
    %622 = vector.broadcast %cst_110 : f32 to vector<8x384xf32>
    %623 = arith.maximumf %616, %622 : vector<8x384xf32>
    %c0_111 = arith.constant 0 : index
    %c0_112 = arith.constant 0 : index
    %624 = vector.load %arg17[%c0_111, %c0_112] : memref<8x384xf32, #tpu.memory_space<vmem>>, vector<8x384xf32>
    tpu.vector_store %arg17[%c0_111, %c0_112], %623 {strides = array<i32>} : memref<8x384xf32, #tpu.memory_space<vmem>>, vector<8x384xf32>,
    %c0_113 = arith.constant 0 : index
    %c0_114 = arith.constant 0 : index
    %625 = vector.load %arg18[%c0_113, %c0_114] : memref<8x128xf32, #tpu.memory_space<vmem>>, vector<8x128xf32>
    tpu.vector_store %arg18[%c0_113, %c0_114], %621 {strides = array<i32>} : memref<8x128xf32, #tpu.memory_space<vmem>>, vector<8x128xf32>,
    return
  }
}

</mosaic_0001>

<bundles_post_ra>
// kernel: tpu_custom_call.1
= control target key start
LH: loop header
LB: loop body
LE: loop exit
PB: predicated region body
PF: predicated region fallthrough
CT: control target
= control target key end

     0   :  { %s7032_s0 = inlined_call_operand.vmem [shape: f32[64,16], index: 0, kind: input, shape index: {}]   ;;  %s7033_s1 = inlined_call_operand.hbm [shape: f32[16,128], index: 1, kind: input, shape index: {}]   ;;  %s7034_s2 = inlined_call_operand.vmem [shape: f32[32,128], index: 2, kind: input, shape index: {}]   ;;  %s7035_s3 = inlined_call_operand.vmem [shape: f32[1,128], index: 3, kind: input, shape index: {}]   ;;  %s7036_s4 = inlined_call_operand.hbm [shape: f32[32,128], index: 4, kind: input, shape index: {}]   ;;  %s7037_s5 = inlined_call_operand.hbm [shape: f32[32,128], index: 5, kind: input, shape index: {}]   ;;  %s7038_s6 = inlined_call_operand.hbm [shape: f32[1,128], index: 6, kind: input, shape index: {}]   ;;  %s7039_s7 = inlined_call_operand.hbm [shape: f32[32,128], index: 7, kind: input, shape index: {}]   ;;  %s7040_s8 = inlined_call_operand.hbm [shape: f32[32,128], index: 8, kind: input, shape index: {}]   ;;  %s7041_s9 = inlined_call_operand.hbm [shape: f32[1,128], index: 9, kind: input, shape index: {}]   ;;  %s7042_s10 = inlined_call_operand.hbm [shape: f32[32,128], index: 10, kind: input, shape index: {}]   ;;  %s7043_s11 = inlined_call_operand.hbm [shape: f32[32,128], index: 11, kind: input, shape index: {}]   ;;  %s7044_s12 = inlined_call_operand.hbm [shape: f32[1,128], index: 12, kind: input, shape index: {}]   ;;  %s7045_s13 = inlined_call_operand.vmem [shape: f32[32,384], index: 13, kind: input, shape index: {}]   ;;  %s7046_s14 = inlined_call_operand.vmem [shape: f32[1,384], index: 14, kind: input, shape index: {}]   ;;  %s7047_s15 = inlined_call_operand.hbm [shape: f32[384,128], index: 15, kind: input, shape index: {}]   ;;  %s7048_s16 = inlined_call_operand.vmem [shape: f32[1,128], index: 16, kind: input, shape index: {}]   ;;  %s7049_s17 = inlined_call_operand.hbm [shape: f32[8,384], index: 17, kind: output, shape index: {0}]   ;;  %s7050_s18 = inlined_call_operand.hbm [shape: f32[8,128], index: 18, kind: output, shape index: {1}]  }
   0x1   :  { %7054 = sst [smem:[#allocation31_spill]] %s7032_s0 }
   0x2   :  { %7055 = sst [smem:[#allocation32_spill]] %s7033_s1 }
   0x3   :  { %7056 = sst [smem:[#allocation33_spill]] %s7034_s2 }
   0x4   :  { %24 = vsyncpa [#allocation3], 0 }
   0x5   :  { %25 = vsyncpa [#allocation6], 0 }
   0x6   :  { %26 = vsyncpa [#allocation9], 0 }
   0x7   :  { %27 = vsyncpa [#allocation12], 0 }
   0x8   :  { %28 = vsyncpa [#allocation15], 0 }
   0x9   :  { %29 = vsyncpa [#allocation18], 0 }
   0xa   :  { %30 = vsyncpa [#allocation4], 0 }
   0xb   :  { %31 = vsyncpa [#allocation22], 0  ;;  %s6028_s27 = smov [#allocation5]   ;;  %s6029_s29 = smov [#allocation8]  }
   0xc   :  { %s55_s28 = sshll.u32 %s6028_s27, 4  ;;  %s80_s30 = sshll.u32 %s6029_s29, 4  ;;  %s56_s28 = int_to_ptr.vmem [resolvable:$true] %s55_s28  ;;  %s6143_s30 = int_to_ptr.vmem [resolvable:$true] %s80_s30 }
   0xd   :  { %s5726_s1 = scalar_lea.hbm %s7036_s4, 512 }
   0xe   :  { %p5727_p0 = scmp.ne.s32.totalorder %s7036_s4, %s5726_s1  ;;  %p5730_p1 = scmp.lt.u32.totalorder %s5726_s1, %s7036_s4 }
  0x10   :  { %p5732_p2 = pnand %p5730_p1, %p5727_p0 }
  0x12   :  { %5735 = shalt.err (!%p5732_p2)
}
  0x13   :  { %s5736_s23 = scalar_lea.vmem %s56_s28, 512  ;;  %p5741_p4 = scmp.lt.s32.totalorder %s56_s28, %s56_s28 }
  0x14   :  { %p5737_p3 = scmp.ne.s32.totalorder %s56_s28, %s5736_s23  ;;  %p5742_p5 = scmp.lt.s32.totalorder %s5736_s23, %s5736_s23 }
  0x16   :  { %p5743_p6 = por %p5742_p5, %p5741_p4 }
  0x18   :  { %p5744_p7 = pnand %p5743_p6, %p5737_p3 }
  0x1a   :  { %5747 = shalt.err (!%p5744_p7)
}
  0x1b   :  { %s6030_s24 = smov 128   ;;  %s6031_s25 = smov 8  }
  0x1c   :  { %61 = dma.hbm_to_vmem [thread:$0]  %s7036_s4, 512, %s56_s28, [#allocation6], %s6030_s24, %s6030_s24, %s6031_s25  }
  0x1d   :  { %s5748_s19 = scalar_lea.hbm %s7038_s6, 16 }
  0x1e   :  { %p5749_p8 = scmp.ne.s32.totalorder %s7038_s6, %s5748_s19  ;;  %p5752_p9 = scmp.lt.u32.totalorder %s5748_s19, %s7038_s6 }
  0x20   :  { %p5754_p10 = pnand %p5752_p9, %p5749_p8 }
  0x22   :  { %5757 = shalt.err (!%p5754_p10)
}
  0x23   :  { %s5758_s2 = scalar_lea.vmem %s6143_s30, 16  ;;  %s5762_s4 = scalar_lea.vmem %s6143_s30, 32 }
  0x24   :  { %p5759_p11 = scmp.ne.s32.totalorder %s6143_s30, %s5758_s2  ;;  %p5763_p12 = scmp.lt.s32.totalorder %s6143_s30, %s6143_s30 }
  0x25   :  { %p5764_p13 = scmp.lt.s32.totalorder %s5762_s4, %s5758_s2 }
  0x27   :  { %p5765_p0 = por %p5764_p13, %p5763_p12 }
  0x29   :  { %p5766_p1 = pnand %p5765_p0, %p5759_p11 }
  0x2b   :  { %5769 = shalt.err (!%p5766_p1)
}
  0x2c   :  { %83 = dma.hbm_to_vmem [thread:$0]  %s7038_s6, 16, %s6143_s30, [#allocation9]  }
  0x2d   :  { %s6032_s26 = smov [#allocation11]   ;;  %s6033_s29 = smov [#allocation14]  }
  0x2e   :  { %s101_s27 = sshll.u32 %s6032_s26, 4  ;;  %s123_s0 = sshll.u32 %s6033_s29, 4  ;;  %s102_s27 = int_to_ptr.vmem [resolvable:$true] %s101_s27  ;;  %s6178_s0 = int_to_ptr.vmem [resolvable:$true] %s123_s0 }
  0x2f   :  { %s5770_s20 = scalar_lea.hbm %s7040_s8, 512 }
  0x30   :  { %p5771_p2 = scmp.ne.s32.totalorder %s7040_s8, %s5770_s20  ;;  %p5774_p3 = scmp.lt.u32.totalorder %s5770_s20, %s7040_s8 }
  0x32   :  { %p5776_p4 = pnand %p5774_p3, %p5771_p2 }
  0x34   :  { %5779 = shalt.err (!%p5776_p4)
}
  0x35   :  { %s5780_s6 = scalar_lea.vmem %s102_s27, 512  ;;  %p5785_p6 = scmp.lt.s32.totalorder %s102_s27, %s102_s27 }
  0x36   :  { %p5781_p5 = scmp.ne.s32.totalorder %s102_s27, %s5780_s6  ;;  %p5786_p7 = scmp.lt.s32.totalorder %s5780_s6, %s5780_s6 }
  0x38   :  { %p5787_p8 = por %p5786_p7, %p5785_p6 }
  0x3a   :  { %p5788_p9 = pnand %p5787_p8, %p5781_p5 }
  0x3c   :  { %5791 = shalt.err (!%p5788_p9)
}
  0x3d   :  { %107 = dma.hbm_to_vmem [thread:$0]  %s7040_s8, 512, %s102_s27, [#allocation12], %s6030_s24, %s6030_s24, %s6031_s25  }
  0x3e   :  { %s5792_s29 = scalar_lea.hbm %s7042_s10, 512 }
  0x3f   :  { %p5793_p10 = scmp.ne.s32.totalorder %s7042_s10, %s5792_s29  ;;  %p5796_p11 = scmp.lt.u32.totalorder %s5792_s29, %s7042_s10 }
  0x41   :  { %p5798_p12 = pnand %p5796_p11, %p5793_p10 }
  0x43   :  { %5801 = shalt.err (!%p5798_p12)
}
  0x44   :  { %s5802_s22 = scalar_lea.vmem %s6178_s0, 512  ;;  %p5807_p0 = scmp.lt.s32.totalorder %s6178_s0, %s6178_s0 }
  0x45   :  { %p5803_p13 = scmp.ne.s32.totalorder %s6178_s0, %s5802_s22  ;;  %p5808_p1 = scmp.lt.s32.totalorder %s5802_s22, %s5802_s22 }
  0x47   :  { %p5809_p2 = por %p5808_p1, %p5807_p0 }
  0x49   :  { %p5810_p3 = pnand %p5809_p2, %p5803_p13 }
  0x4b   :  { %5813 = shalt.err (!%p5810_p3)
}
  0x4c   :  { %129 = dma.hbm_to_vmem [thread:$0]  %s7042_s10, 512, %s6178_s0, [#allocation15], %s6030_s24, %s6030_s24, %s6031_s25  }
  0x4d   :  { %s6034_s2 = smov [#allocation17]   ;;  %s6035_s6 = smov [#allocation2]  }
  0x4e   :  { %s148_s4 = sshll.u32 %s6034_s2, 4  ;;  %s39_s30 = sshll.u32 %s6035_s6, 4  ;;  %s149_s4 = int_to_ptr.vmem [resolvable:$true] %s148_s4  ;;  %s6215_s30 = int_to_ptr.vmem [resolvable:$true] %s39_s30 }
  0x4f   :  { %s5814_s26 = scalar_lea.hbm %s7044_s12, 16 }
  0x50   :  { %p5815_p4 = scmp.ne.s32.totalorder %s7044_s12, %s5814_s26  ;;  %p5818_p5 = scmp.lt.u32.totalorder %s5814_s26, %s7044_s12 }
  0x52   :  { %p5820_p6 = pnand %p5818_p5, %p5815_p4 }
  0x54   :  { %5823 = shalt.err (!%p5820_p6)
}
  0x55   :  { %s5824_s10 = scalar_lea.vmem %s149_s4, 16  ;;  %s5828_s0 = scalar_lea.vmem %s149_s4, 32 }
  0x56   :  { %p5825_p7 = scmp.ne.s32.totalorder %s149_s4, %s5824_s10  ;;  %p5829_p8 = scmp.lt.s32.totalorder %s149_s4, %s149_s4 }
  0x57   :  { %p5830_p9 = scmp.lt.s32.totalorder %s5828_s0, %s5824_s10 }
  0x59   :  { %p5831_p10 = por %p5830_p9, %p5829_p8 }
  0x5b   :  { %p5832_p11 = pnand %p5831_p10, %p5825_p7 }
  0x5d   :  { %5835 = shalt.err (!%p5832_p11)
}
  0x5e   :  { %151 = dma.hbm_to_vmem [thread:$0]  %s7044_s12, 16, %s149_s4, [#allocation18]  }
  0x5f   :  { %s7057_s2 = sld [smem:[#allocation32_spill]] }
  0x65   :  { %s5836_s6 = scalar_lea.hbm %s7057_s2, 256 }
  0x66   :  { %p5837_p12 = scmp.ne.s32.totalorder %s7057_s2, %s5836_s6  ;;  %p5840_p13 = scmp.lt.u32.totalorder %s5836_s6, %s7057_s2 }
  0x68   :  { %p5842_p0 = pnand %p5840_p13, %p5837_p12 }
  0x6a   :  { %5845 = shalt.err (!%p5842_p0)
}
  0x6b   :  { %s5846_s19 = scalar_lea.vmem %s6215_s30, 256  ;;  %p5851_p2 = scmp.lt.s32.totalorder %s6215_s30, %s6215_s30 }
  0x6c   :  { %p5847_p1 = scmp.ne.s32.totalorder %s6215_s30, %s5846_s19  ;;  %p5852_p3 = scmp.lt.s32.totalorder %s5846_s19, %s5846_s19 }
  0x6e   :  { %p5853_p4 = por %p5852_p3, %p5851_p2 }
  0x70   :  { %p5854_p5 = pnand %p5853_p4, %p5847_p1 }
  0x72   :  { %5857 = shalt.err (!%p5854_p5)
}
  0x73   :  { %45 = dma.hbm_to_vmem [thread:$0]  %s7057_s2, 256, %s6215_s30, [#allocation3], %s6030_s24, %s6030_s24, %s6031_s25  }
  0x74   :  { %s6036_s1 = smov [#allocation7]   ;;  %s6037_s10 = smov [#allocation10]  }
  0x75   :  { %s67_s20 = sshll.u32 %s6036_s1, 4  ;;  %s89_s0 = sshll.u32 %s6037_s10, 4  ;;  %s68_s20 = int_to_ptr.vmem [resolvable:$true] %s67_s20  ;;  %s6249_s0 = int_to_ptr.vmem [resolvable:$true] %s89_s0 }
  0x76   :  { %s5858_s8 = scalar_lea.hbm %s7037_s5, 512 }
  0x77   :  { %p5859_p6 = scmp.ne.s32.totalorder %s7037_s5, %s5858_s8  ;;  %p5862_p7 = scmp.lt.u32.totalorder %s5858_s8, %s7037_s5 }
  0x79   :  { %p5864_p8 = pnand %p5862_p7, %p5859_p6 }
  0x7b   :  { %5867 = shalt.err (!%p5864_p8)
}
  0x7c   :  { %s5868_s30 = scalar_lea.vmem %s68_s20, 512  ;;  %p5873_p10 = scmp.lt.s32.totalorder %s68_s20, %s68_s20 }
  0x7d   :  { %p5869_p9 = scmp.ne.s32.totalorder %s68_s20, %s5868_s30  ;;  %p5874_p11 = scmp.lt.s32.totalorder %s5868_s30, %s5868_s30 }
  0x7f   :  { %p5875_p12 = por %p5874_p11, %p5873_p10 }
  0x81   :  { %p5876_p13 = pnand %p5875_p12, %p5869_p9 }
  0x83   :  { %5879 = shalt.err (!%p5876_p13)
}
  0x84   :  { %73 = dma.hbm_to_vmem [thread:$0]  %s7037_s5, 512, %s68_s20, [#allocation6], %s6030_s24, %s6030_s24, %s6031_s25  }
  0x85   :  { %s5880_s12 = scalar_lea.hbm %s7039_s7, 512 }
  0x86   :  { %p5881_p0 = scmp.ne.s32.totalorder %s7039_s7, %s5880_s12  ;;  %p5884_p1 = scmp.lt.u32.totalorder %s5880_s12, %s7039_s7 }
  0x88   :  { %p5886_p2 = pnand %p5884_p1, %p5881_p0 }
  0x8a   :  { %5889 = shalt.err (!%p5886_p2)
}
  0x8b   :  { %s5890_s22 = scalar_lea.vmem %s6249_s0, 512  ;;  %p5895_p4 = scmp.lt.s32.totalorder %s6249_s0, %s6249_s0 }
  0x8c   :  { %p5891_p3 = scmp.ne.s32.totalorder %s6249_s0, %s5890_s22  ;;  %p5896_p5 = scmp.lt.s32.totalorder %s5890_s22, %s5890_s22 }
  0x8e   :  { %p5897_p6 = por %p5896_p5, %p5895_p4 }
  0x90   :  { %p5898_p7 = pnand %p5897_p6, %p5891_p3 }
  0x92   :  { %5901 = shalt.err (!%p5898_p7)
}
  0x93   :  { %95 = dma.hbm_to_vmem [thread:$0]  %s7039_s7, 512, %s6249_s0, [#allocation9], %s6030_s24, %s6030_s24, %s6031_s25  }
  0x94   :  { %s6038_s8 = smov [#allocation13]   ;;  %s6039_s6 = smov [#allocation16]  }
  0x95   :  { %s114_s27 = sshll.u32 %s6038_s8, 4  ;;  %s135_s28 = sshll.u32 %s6039_s6, 4  ;;  %s115_s27 = int_to_ptr.vmem [resolvable:$true] %s114_s27  ;;  %s6286_s28 = int_to_ptr.vmem [resolvable:$true] %s135_s28 }
  0x96   :  { %s5902_s2 = scalar_lea.hbm %s7041_s9, 16 }
  0x97   :  { %p5903_p8 = scmp.ne.s32.totalorder %s7041_s9, %s5902_s2  ;;  %p5906_p9 = scmp.lt.u32.totalorder %s5902_s2, %s7041_s9 }
  0x99   :  { %p5908_p10 = pnand %p5906_p9, %p5903_p8 }
  0x9b   :  { %5911 = shalt.err (!%p5908_p10)
}
  0x9c   :  { %s5912_s7 = scalar_lea.vmem %s115_s27, 16  ;;  %s5916_s0 = scalar_lea.vmem %s115_s27, 32 }
  0x9d   :  { %p5913_p11 = scmp.ne.s32.totalorder %s115_s27, %s5912_s7  ;;  %p5917_p12 = scmp.lt.s32.totalorder %s115_s27, %s115_s27 }
  0x9e   :  { %p5918_p13 = scmp.lt.s32.totalorder %s5916_s0, %s5912_s7 }
  0xa0   :  { %p5919_p0 = por %p5918_p13, %p5917_p12 }
  0xa2   :  { %p5920_p1 = pnand %p5919_p0, %p5913_p11 }
  0xa4   :  { %5923 = shalt.err (!%p5920_p1)
}
  0xa5   :  { %117 = dma.hbm_to_vmem [thread:$0]  %s7041_s9, 16, %s115_s27, [#allocation12]  }
  0xa6   :  { %s5924_s22 = scalar_lea.hbm %s7043_s11, 512 }
  0xa7   :  { %p5925_p2 = scmp.ne.s32.totalorder %s7043_s11, %s5924_s22  ;;  %p5928_p3 = scmp.lt.u32.totalorder %s5924_s22, %s7043_s11 }
  0xa9   :  { %p5930_p4 = pnand %p5928_p3, %p5925_p2 }
  0xab   :  { %5933 = shalt.err (!%p5930_p4)
}
  0xac   :  { %s5934_s23 = scalar_lea.vmem %s6286_s28, 512  ;;  %p5939_p6 = scmp.lt.s32.totalorder %s6286_s28, %s6286_s28 }
  0xad   :  { %p5935_p5 = scmp.ne.s32.totalorder %s6286_s28, %s5934_s23  ;;  %p5940_p7 = scmp.lt.s32.totalorder %s5934_s23, %s5934_s23 }
  0xaf   :  { %p5941_p8 = por %p5940_p7, %p5939_p6 }
  0xb1   :  { %p5942_p9 = pnand %p5941_p8, %p5935_p5 }
  0xb3   :  { %5945 = shalt.err (!%p5942_p9)
}
  0xb4   :  { %141 = dma.hbm_to_vmem [thread:$0]  %s7043_s11, 512, %s6286_s28, [#allocation15], %s6030_s24, %s6030_s24, %s6031_s25  }
  0xb5   :  { %s6040_s30 = smov [#allocation19]   ;;  %s5946_s19 = scalar_lea.hbm %s7047_s15, 6144 }
  0xb6   :  { %s161_s2 = sshll.u32 %s6040_s30, 4  ;;  %p5947_p10 = scmp.ne.s32.totalorder %s7047_s15, %s5946_s19  ;;  %s162_s2 = int_to_ptr.vmem [resolvable:$true] %s161_s2 }
  0xb7   :  { %p5950_p11 = scmp.lt.u32.totalorder %s5946_s19, %s7047_s15 }
  0xb9   :  { %p5952_p12 = pnand %p5950_p11, %p5947_p10 }
  0xbb   :  { %5955 = shalt.err (!%p5952_p12)
}
  0xbc   :  { %s5956_s1 = scalar_lea.vmem %s162_s2, 6144  ;;  %p5961_p0 = scmp.lt.s32.totalorder %s162_s2, %s162_s2 }
  0xbd   :  { %p5957_p13 = scmp.ne.s32.totalorder %s162_s2, %s5956_s1  ;;  %p5962_p1 = scmp.lt.s32.totalorder %s5956_s1, %s5956_s1 }
  0xbf   :  { %p5963_p2 = por %p5962_p1, %p5961_p0 }
  0xc1   :  { %p5964_p3 = pnand %p5963_p2, %p5957_p13 }
  0xc3   :  { %5967 = shalt.err (!%p5964_p3)
}
  0xc4   :  { %167 = dma.hbm_to_vmem [thread:$0]  %s7047_s15, 6144, %s162_s2, [#allocation18], %s6030_s24, %s6030_s24, %s6031_s25  }
  0xc5   :  { %6012 = dma.done.wait [#allocation3], 256  }
  0xc6   :  { %6013 = vsyncadd [#allocation3], 4294967040 }
  0xc7   :  { %6014 = dma.done.wait [#allocation6], 1024  }
  0xc8   :  { %6015 = vsyncadd [#allocation6], 4294966272 }
  0xc9   :  { %6016 = dma.done.wait [#allocation9], 528  }
  0xca   :  { %6017 = vsyncadd [#allocation9], 4294966768 }
  0xcb   :  { %6018 = dma.done.wait [#allocation12], 528  }
  0xcc   :  { %6019 = vsyncadd [#allocation12], 4294966768 }
  0xcd   :  { %6020 = dma.done.wait [#allocation15], 1024  }
  0xce   :  { %6021 = vsyncadd [#allocation15], 4294966272 }
  0xcf   :  { %6022 = dma.done.wait [#allocation18], 6160  }
  0xd0   :  { %6023 = vsyncadd [#allocation18], 4294961136  ;;  %v6041_v0 = vmov 0.0|0.0   ;;  %vm6042_vm0 = vmmov 0   ;;  %v6043_v1 = vmov 0.0   ;;  %vm224_vm1 = vcmask 130048  }
  0xd1   :  { %5164 = vmatprep.subr.bf16.mxu1 %v6041_v0  ;;  %4710 = vmatprep.mubr.msk.f32.mxu1 %vm6042_vm0, %v6043_v1  ;;  %v211_v2 = vld [vmem:[#allocation2] sm:$0xff]  ;;  %v212_v3 = vld [vmem:[#allocation2 + $0x8] sm:$0xff]  ;;  %s7058_s25 = sld [smem:[#allocation33_spill]]  ;;  %s7059_s20 = sld [smem:[#allocation31_spill]]  ;;  %vm354_vm2 = vcmask 261120  }
  0xd2   :  { %v5160_v5 = vpack.c.bf16 %v212_v3, %v211_v2  ;;  %v6381_v13 = vld [vmem:[%s7035_s3] ss:$0 sm:$0xff]  ;;  %s6044_s29 = smov 64   ;;  %s6045_s3 = smov 32  }
  0xd4   :  { %5161 = vmatprep.subr.bf16.mxu0 %v5160_v5 }
  0xd5   :  { %5163 = vmatpush3.bf16.msra.mxu0 %v5160_v5 }
  0xd6   :  { %5176 = vmatprep.subr.bf16.mxu0 %v6041_v0 }
  0xd7   :  { %v213_v4 = vld [vmem:[%s7058_s25] sm:$0xff]  ;;  %v214_v6 = vld [vmem:[%s7058_s25 + $0x8] sm:$0xff]  ;;  %v215_v9 = vld [vmem:[%s7058_s25 + $0x10] sm:$0xff] }
  0xd8   :  { %v203_v7 = vld [vmem:[%s7059_s20] sm:$0xff]  ;;  %v6347_v8 = vpack.c.bf16 %v214_v6, %v213_v4  ;;  %v216_v10 = vld [vmem:[%s7058_s25 + $0x18] sm:$0xff]  ;;  %v204_v11 = vld [vmem:[%s7059_s20 + $0x8] sm:$0xff] }
  0xd9   :  { %4690 = vmatprep.mubr.msk.f32.mxu0 %vm224_vm1, %v203_v7  ;;  %v6360_v12 = vpack.c.bf16 %v216_v10, %v215_v9  ;;  %v205_v48 = vld [vmem:[%s7059_s20 + $0x10] sm:$0xff]  ;;  %v206_v49 = vld [vmem:[%s7059_s20 + $0x18] sm:$0xff]  ;;  %v207_v50 = vld [vmem:[%s7059_s20 + $0x20] sm:$0xff] }
  0xda   :  { %5166 = vmatpush3.bf16.msra.mxu1 %v6347_v8  ;;  %4691 = vmatmul.mubr.msk.f32.vlgmr.msra.gmra.mrb[0].mxu0 %vm224_vm1, %v204_v11  ;;  %v208_v51 = vld [vmem:[%s7059_s20 + $0x28] sm:$0xff]  ;;  %v209_v52 = vld [vmem:[%s7059_s20 + $0x30] sm:$0xff]  ;;  %v210_v53 = vld [vmem:[%s7059_s20 + $0x38] sm:$0xff] }
  0xdb   :  { %5167 = vmatprep.subr.bf16.mxu1 %v6041_v0  ;;  %5178 = vmatpush3.bf16.msra.mxu0 %v6347_v8 }
  0xdc   :  { %5179 = vmatprep.subr.bf16.mxu0 %v6041_v0  ;;  %4693 = vmatprep.mubr.msk.f32.mxu0 %vm224_vm1, %v205_v48 }
  0xde   :  { %5169 = vmatpush3.bf16.msra.mxu1 %v6360_v12  ;;  %4694 = vmatmul.mubr.msk.f32.gmra.mrb[2].mxu0 %vm224_vm1, %v206_v49 }
  0xdf   :  { %5170 = vmatprep.subr.bf16.mxu1 %v6041_v0  ;;  %5181 = vmatpush3.bf16.msra.mxu0 %v6360_v12 }
  0xe0   :  { %5188 = vmatprep.subr.bf16.mxu0 %v6041_v0  ;;  %4696 = vmatprep.mubr.msk.f32.mxu0 %vm224_vm1, %v207_v50 }
  0xe1   :  { %4711 = vmatmul.mubr.f32.vlgmr.msra.gmra.mrb[0].mxu1 %v6043_v1 }
  0xe2   :  { %5172 = vmatpush3.bf16.msra.mxu1 %v6347_v8  ;;  %4721 = vmatprep.mubr.msk.f32.mxu1 %vm6042_vm0, %v6043_v1 }
  0xe3   :  { %5173 = vmatprep.subr.bf16.mxu1 %v6041_v0  ;;  %4697 = vmatmul.mubr.msk.f32.gmra.mrb[4].mxu0 %vm224_vm1, %v208_v51 }
  0xe4   :  { %4699 = vmatprep.mubr.msk.f32.mxu0 %vm224_vm1, %v209_v52 }
  0xe6   :  { %5175 = vmatpush3.bf16.msra.mxu1 %v6360_v12 }
  0xe7   :  { %5182 = vmatprep.subr.bf16.mxu1 %v6041_v0  ;;  %4700 = vmatmul.mubr.msk.f32.gmra.mrb[6].mxu0 %vm224_vm1, %v210_v53 }
  0xe8   :  { %4732 = vmatprep.mubr.msk.f32.mxu0 %vm6042_vm0, %v6043_v1 }
 0x1ad   :  { %v4692_v14 = vpop.f32.mrb[0].mxu0 }
 0x1ae   :  { %v315_v15 = vpop.f32.mrb[1].mxu0  ;;  %v321_v34 = vadd.f32 %v4692_v14, %v6381_v13 }
 0x1af   :  { %v316_v16 = vadd.f32 %v6381_v13, %v315_v15 }
 0x1b1   :  { %v4695_v57 = vpop.f32.mrb[2].mxu0 }
 0x1b2   :  { %v325_v58 = vpop.f32.mrb[3].mxu0 }
 0x1b3   :  { %v326_v2 = vadd.f32 %v6381_v13, %v325_v58 }
 0x1b4   :  { %v424_v17 = vpop.f32.mrb[0].mxu1 }
 0x1b5   :  { %v428_v18 = vadd.f32 %v424_v17, %v316_v16  ;;  %v4712_v19 = vpop.f32.mrb[1].mxu1 }
 0x1b6   :  { %v6429_v59 = vpop.f32.mrb[4].mxu0 }
 0x1b7   :  { %5470 = vtanh.f32 %v428_v18  ;;  %v4333_v21 = vmul.f32 -1.442695, %v428_v18  ;;  %v6431_v60 = vpop.f32.mrb[5].mxu0 }
 0x1b9   :  { %5472 = vpow2.f32 %v4333_v21 }
 0x1ba   :  { %v6433_v61 = vpop.f32.mrb[6].mxu0 }
 0x1bb   :  { %v6435_v62 = vpop.f32.mrb[7].mxu0 }
 0x1c1   :  { %v5471_v20 = vpop.eup %5470 }
 0x1c2   :  { %438 = vrot.lane.b32.xlu0 %v5471_v20, %s6044_s29 }
 0x1c3   :  { %v5473_v22 = vpop.eup %5472 }
 0x1c4   :  { %v432_v23 = vadd.f32 1.0, %v5473_v22 }
 0x1c6   :  { %5474 = vrcp.f32 %v432_v23  ;;  %v331_v23 = vadd.f32 %v4695_v57, %v6381_v13 }
 0x1d0   :  { %v5475_v24 = vpop.eup %5474 }
 0x1d1   :  { %v436_v27 = vmul.f32 0.0, %v5475_v24 }
 0x234   :  { %v439_v25 = vpop.permute.xlu0 %438 }
 0x235   :  { %v441_v26 = vmul.f32 %v5475_v24, %v439_v25 }
 0x237   :  { %443 = vrot.lane.b32.xlu0 %v441_v26, %s6045_s3 }
 0x2a9   :  { %v444_v28 = vpop.permute.xlu0 %443 }
 0x2aa   :  { %v446_v29 = vadd.f32 %v444_v28, %v436_v27 }
 0x2ac   :  { %5476 = vtanh.f32 %v446_v29 }
 0x2b6   :  { %v5477_v30 = vpop.eup %5476 }
 0x2b7   :  { %449 = vrot.lane.b32.xlu1 %v5477_v30, %s6044_s29 }
 0x329   :  { %v450_v31 = vpop.permute.xlu1 %449 }
 0x32a   :  { %v452_v32 = vmul.f32 %v5475_v24, %v450_v31 }
 0x32c   :  { %454 = vrot.lane.b32.xlu1 %v452_v32, %s6045_s3 }
 0x39e   :  { %v6388_v33 = vpop.permute.xlu1 %454 }
 0x39f   :  { %4722 = vmatmul.mubr.msk.f32.vlgmr.msra.gmra.mrb[2].mxu1 %vm354_vm2, %v6388_v33 }
 0x3a0   :  { %5184 = vmatpush3.bf16.msra.mxu1 %v6347_v8  ;;  %4743 = vmatprep.mubr.msk.f32.mxu1 %vm6042_vm0, %v6043_v1 }
 0x3a1   :  { %5185 = vmatprep.subr.bf16.mxu1 %v6041_v0 }
 0x3a4   :  { %5187 = vmatpush3.bf16.msra.mxu1 %v6360_v12 }
 0x3a5   :  { %5194 = vmatprep.subr.bf16.mxu1 %v6041_v0 }
 0x472   :  { %v524_v35 = vpop.f32.mrb[2].mxu1 }
 0x473   :  { %v528_v36 = vadd.f32 %v524_v35, %v321_v34  ;;  %v4723_v37 = vpop.f32.mrb[3].mxu1 }
 0x475   :  { %5478 = vtanh.f32 %v528_v36  ;;  %v4335_v39 = vmul.f32 -1.442695, %v528_v36 }
 0x477   :  { %5480 = vpow2.f32 %v4335_v39 }
 0x47f   :  { %v5479_v38 = vpop.eup %5478 }
 0x480   :  { %538 = vrot.lane.b32.xlu0 %v5479_v38, %s6044_s29 }
 0x481   :  { %v5481_v40 = vpop.eup %5480 }
 0x482   :  { %v532_v41 = vadd.f32 1.0, %v5481_v40 }
 0x484   :  { %5482 = vrcp.f32 %v532_v41 }
 0x48e   :  { %v5483_v42 = vpop.eup %5482 }
 0x48f   :  { %v536_v45 = vmul.f32 %v5483_v42, %v446_v29 }
 0x4f2   :  { %v539_v43 = vpop.permute.xlu0 %538 }
 0x4f3   :  { %v541_v44 = vmul.f32 %v5483_v42, %v539_v43 }
 0x4f5   :  { %543 = vrot.lane.b32.xlu1 %v541_v44, %s6045_s3 }
 0x567   :  { %v544_v46 = vpop.permute.xlu1 %543 }
 0x568   :  { %v546_v47 = vadd.f32 %v544_v46, %v536_v45 }
 0x56a   :  { %5484 = vtanh.f32 %v546_v47 }
 0x574   :  { %v5485_v54 = vpop.eup %5484 }
 0x575   :  { %549 = vrot.lane.b32.xlu0 %v5485_v54, %s6044_s29 }
 0x5e7   :  { %v550_v55 = vpop.permute.xlu0 %549 }
 0x5e8   :  { %v552_v56 = vmul.f32 %v5483_v42, %v550_v55  ;;  %v336_v42 = vadd.f32 %v6381_v13, %v6431_v60 }
 0x5ea   :  { %554 = vrot.lane.b32.xlu1 %v552_v56, %s6045_s3 }
 0x65c   :  { %v6437_v63 = vpop.permute.xlu1 %554 }
 0x65d   :  { %4733 = vmatmul.mubr.msk.f32.vlgmr.msra.gmra.mrb[8].mxu0 %vm354_vm2, %v6437_v63 }
 0x65e   :  { %5190 = vmatpush3.bf16.msra.mxu0 %v6347_v8  ;;  %4754 = vmatprep.mubr.msk.f32.mxu0 %vm6042_vm0, %v6043_v1 }
 0x65f   :  { %5191 = vmatprep.subr.bf16.mxu0 %v6041_v0 }
 0x662   :  { %5193 = vmatpush3.bf16.msra.mxu0 %v6360_v12 }
 0x663   :  { %5200 = vmatprep.subr.bf16.mxu0 %v6041_v0 }
 0x730   :  { %v624_v3 = vpop.f32.mrb[8].mxu0 }
 0x731   :  { %v628_v4 = vadd.f32 %v624_v3, %v326_v2  ;;  %v4734_v5 = vpop.f32.mrb[9].mxu0  ;;  %v341_v2 = vadd.f32 %v6429_v59, %v6381_v13 }
 0x733   :  { %5486 = vtanh.f32 %v628_v4  ;;  %v4337_v7 = vmul.f32 -1.442695, %v628_v4 }
 0x735   :  { %5488 = vpow2.f32 %v4337_v7 }
 0x73d   :  { %v5487_v6 = vpop.eup %5486 }
 0x73e   :  { %638 = vrot.lane.b32.xlu0 %v5487_v6, %s6044_s29 }
 0x73f   :  { %v5489_v9 = vpop.eup %5488 }
 0x740   :  { %v632_v10 = vadd.f32 1.0, %v5489_v9 }
 0x742   :  { %5490 = vrcp.f32 %v632_v10 }
 0x74c   :  { %v5491_v11 = vpop.eup %5490 }
 0x74d   :  { %v636_v16 = vmul.f32 %v5491_v11, %v546_v47 }
 0x7b0   :  { %v639_v14 = vpop.permute.xlu0 %638 }
 0x7b1   :  { %v641_v15 = vmul.f32 %v5491_v11, %v639_v14 }
 0x7b3   :  { %643 = vrot.lane.b32.xlu1 %v641_v15, %s6045_s3 }
 0x825   :  { %v644_v17 = vpop.permute.xlu1 %643 }
 0x826   :  { %v646_v18 = vadd.f32 %v644_v17, %v636_v16  ;;  %v1153_v16 = vld [vmem:[#allocation5] sm:$0xff]  ;;  %v1154_v17 = vld [vmem:[#allocation5 + $0x8] sm:$0xff] }
 0x828   :  { %5492 = vtanh.f32 %v646_v18 }
 0x832   :  { %v5493_v19 = vpop.eup %5492 }
 0x833   :  { %649 = vrot.lane.b32.xlu0 %v5493_v19, %s6044_s29 }
 0x8a5   :  { %v650_v20 = vpop.permute.xlu0 %649 }
 0x8a6   :  { %v652_v21 = vmul.f32 %v5491_v11, %v650_v20 }
 0x8a8   :  { %654 = vrot.lane.b32.xlu1 %v652_v21, %s6045_s3 }
 0x91a   :  { %v6452_v22 = vpop.permute.xlu1 %654 }
 0x91b   :  { %4744 = vmatmul.mubr.msk.f32.vlgmr.msra.gmra.mrb[4].mxu1 %vm354_vm2, %v6452_v22 }
 0x91c   :  { %5196 = vmatpush3.bf16.msra.mxu1 %v6347_v8  ;;  %4765 = vmatprep.mubr.msk.f32.mxu1 %vm6042_vm0, %v6043_v1 }
 0x91d   :  { %5197 = vmatprep.subr.bf16.mxu1 %v6041_v0 }
 0x920   :  { %5199 = vmatpush3.bf16.msra.mxu1 %v6360_v12 }
 0x921   :  { %5206 = vmatprep.subr.bf16.mxu1 %v6041_v0 }
 0x9ee   :  { %v724_v24 = vpop.f32.mrb[4].mxu1 }
 0x9ef   :  { %v728_v25 = vadd.f32 %v724_v24, %v331_v23  ;;  %v4745_v26 = vpop.f32.mrb[5].mxu1  ;;  %v1155_v23 = vld [vmem:[#allocation5 + $0x10] sm:$0xff]  ;;  %v1156_v24 = vld [vmem:[#allocation5 + $0x18] sm:$0xff] }
 0x9f1   :  { %5494 = vtanh.f32 %v728_v25  ;;  %v4339_v28 = vmul.f32 -1.442695, %v728_v25  ;;  %v5216_v25 = vpack.c.bf16 %v1156_v24, %v1155_v23 }
 0x9f3   :  { %5496 = vpow2.f32 %v4339_v28 }
 0x9fb   :  { %v5495_v27 = vpop.eup %5494 }
 0x9fc   :  { %738 = vrot.lane.b32.xlu0 %v5495_v27, %s6044_s29 }
 0x9fd   :  { %v5497_v29 = vpop.eup %5496 }
 0x9fe   :  { %v732_v30 = vadd.f32 1.0, %v5497_v29 }
 0xa00   :  { %5498 = vrcp.f32 %v732_v30 }
 0xa0a   :  { %v5499_v31 = vpop.eup %5498 }
 0xa0b   :  { %v736_v35 = vmul.f32 %v5499_v31, %v646_v18  ;;  %v5212_v18 = vpack.c.bf16 %v1154_v17, %v1153_v16 }
 0xa6e   :  { %v739_v32 = vpop.permute.xlu0 %738 }
 0xa6f   :  { %v741_v34 = vmul.f32 %v5499_v31, %v739_v32 }
 0xa71   :  { %743 = vrot.lane.b32.xlu1 %v741_v34, %s6045_s3 }
 0xae3   :  { %v744_v36 = vpop.permute.xlu1 %743 }
 0xae4   :  { %v746_v37 = vadd.f32 %v744_v36, %v736_v35 }
 0xae6   :  { %5500 = vtanh.f32 %v746_v37 }
 0xaf0   :  { %v5501_v38 = vpop.eup %5500 }
 0xaf1   :  { %749 = vrot.lane.b32.xlu0 %v5501_v38, %s6044_s29 }
 0xb63   :  { %v750_v39 = vpop.permute.xlu0 %749 }
 0xb64   :  { %v752_v40 = vmul.f32 %v5499_v31, %v750_v39 }
 0xb66   :  { %754 = vrot.lane.b32.xlu1 %v752_v40, %s6045_s3 }
 0xbd8   :  { %v6467_v41 = vpop.permute.xlu1 %754 }
 0xbd9   :  { %4755 = vmatmul.mubr.msk.f32.vlgmr.msra.gmra.mrb[10].mxu0 %vm354_vm2, %v6467_v41 }
 0xbda   :  { %5202 = vmatpush3.bf16.msra.mxu0 %v6347_v8  ;;  %4776 = vmatprep.mubr.msk.f32.mxu0 %vm6042_vm0, %v6043_v1 }
 0xbdb   :  { %5203 = vmatprep.subr.bf16.mxu0 %v6041_v0 }
 0xbde   :  { %5205 = vmatpush3.bf16.msra.mxu0 %v6360_v12 }
 0xbdf   :  { %5213 = vmatprep.subr.bf16.mxu0 %v5212_v18 }
 0xcac   :  { %v824_v43 = vpop.f32.mrb[10].mxu0 }
 0xcad   :  { %v828_v44 = vadd.f32 %v824_v43, %v336_v42  ;;  %v4756_v45 = vpop.f32.mrb[11].mxu0 }
 0xcae   :  { %v1157_v45 = vld [vmem:[#allocation7] sm:$0xff] }
 0xcaf   :  { %5502 = vtanh.f32 %v828_v44  ;;  %v4341_v47 = vmul.f32 -1.442695, %v828_v44 }
 0xcb1   :  { %5504 = vpow2.f32 %v4341_v47 }
 0xcb9   :  { %v5503_v46 = vpop.eup %5502 }
 0xcba   :  { %838 = vrot.lane.b32.xlu0 %v5503_v46, %s6044_s29  ;;  %v1158_v46 = vld [vmem:[#allocation7 + $0x8] sm:$0xff] }
 0xcbb   :  { %v5505_v48 = vpop.eup %5504  ;;  %v6525_v47 = vpack.c.bf16 %v1158_v46, %v1157_v45 }
 0xcbc   :  { %v832_v49 = vadd.f32 1.0, %v5505_v48  ;;  %v1159_v48 = vld [vmem:[#allocation7 + $0x10] sm:$0xff] }
 0xcbe   :  { %5506 = vrcp.f32 %v832_v49  ;;  %v1160_v49 = vld [vmem:[#allocation7 + $0x18] sm:$0xff] }
 0xcc8   :  { %v5507_v50 = vpop.eup %5506 }
 0xcc9   :  { %v836_v53 = vmul.f32 %v5507_v50, %v746_v37 }
 0xd2c   :  { %v839_v51 = vpop.permute.xlu0 %838 }
 0xd2d   :  { %v841_v52 = vmul.f32 %v5507_v50, %v839_v51 }
 0xd2f   :  { %843 = vrot.lane.b32.xlu1 %v841_v52, %s6045_s3 }
 0xda1   :  { %v844_v54 = vpop.permute.xlu1 %843 }
 0xda2   :  { %v846_v55 = vadd.f32 %v844_v54, %v836_v53  ;;  %v351_v54 = vadd.f32 %v6433_v61, %v6381_v13 }
 0xda4   :  { %5508 = vtanh.f32 %v846_v55 }
 0xdae   :  { %v5509_v56 = vpop.eup %5508 }
 0xdaf   :  { %849 = vrot.lane.b32.xlu0 %v5509_v56, %s6044_s29 }
 0xe21   :  { %v850_v57 = vpop.permute.xlu0 %849 }
 0xe22   :  { %v852_v58 = vmul.f32 %v5507_v50, %v850_v57  ;;  %v6529_v50 = vpack.c.bf16 %v1160_v49, %v1159_v48 }
 0xe24   :  { %854 = vrot.lane.b32.xlu1 %v852_v58, %s6045_s3  ;;  %v6551_v58 = vld [vmem:[#allocation8] ss:$0 sm:$0xff] }
 0xe96   :  { %v855_v60 = vpop.permute.xlu1 %854 }
 0xe97   :  { %4766 = vmatmul.mubr.msk.f32.vlgmr.msra.gmra.mrb[6].mxu1 %vm354_vm2, %v855_v60 }
 0xe98   :  { %5208 = vmatpush3.bf16.msra.mxu1 %v6347_v8  ;;  %4787 = vmatprep.mubr.msk.f32.mxu1 %vm6042_vm0, %v6043_v1 }
 0xe99   :  { %5209 = vmatprep.subr.bf16.mxu1 %v6041_v0 }
 0xe9c   :  { %5211 = vmatpush3.bf16.msra.mxu1 %v6360_v12 }
 0xe9d   :  { %5220 = vmatprep.subr.bf16.mxu1 %v6041_v0 }
 0xf6a   :  { %v924_v3 = vpop.f32.mrb[6].mxu1 }
 0xf6b   :  { %v928_v4 = vadd.f32 %v924_v3, %v341_v2  ;;  %v4767_v5 = vpop.f32.mrb[7].mxu1 }
 0xf6d   :  { %5510 = vtanh.f32 %v928_v4  ;;  %v4343_v8 = vmul.f32 -1.442695, %v928_v4 }
 0xf6f   :  { %5512 = vpow2.f32 %v4343_v8 }
 0xf77   :  { %v5511_v6 = vpop.eup %5510 }
 0xf78   :  { %938 = vrot.lane.b32.xlu0 %v5511_v6, %s6044_s29 }
 0xf79   :  { %v5513_v7 = vpop.eup %5512 }
 0xf7a   :  { %v932_v9 = vadd.f32 1.0, %v5513_v7 }
 0xf7c   :  { %5514 = vrcp.f32 %v932_v9 }
 0xf86   :  { %v5515_v10 = vpop.eup %5514 }
 0xf87   :  { %v936_v14 = vmul.f32 %v5515_v10, %v846_v55 }
 0xfea   :  { %v939_v11 = vpop.permute.xlu0 %938 }
 0xfeb   :  { %v941_v12 = vmul.f32 %v5515_v10, %v939_v11 }
 0xfed   :  { %943 = vrot.lane.b32.xlu1 %v941_v12, %s6045_s3 }
0x105f   :  { %v944_v15 = vpop.permute.xlu1 %943 }
0x1060   :  { %v946_v59 = vadd.f32 %v944_v15, %v936_v14 }
0x1062   :  { %5516 = vtanh.f32 %v946_v59 }
0x106c   :  { %v5517_v19 = vpop.eup %5516 }
0x106d   :  { %949 = vrot.lane.b32.xlu0 %v5517_v19, %s6044_s29 }
0x10df   :  { %v950_v20 = vpop.permute.xlu0 %949 }
0x10e0   :  { %v952_v21 = vmul.f32 %v5515_v10, %v950_v20 }
0x10e2   :  { %954 = vrot.lane.b32.xlu1 %v952_v21, %s6045_s3 }
0x1154   :  { %v955_v26 = vpop.permute.xlu1 %954 }
0x1155   :  { %4777 = vmatmul.mubr.msk.f32.vlgmr.msra.gmra.mrb[12].mxu0 %vm354_vm2, %v955_v26 }
0x1156   :  { %5215 = vmatpush3.bf16.msra.mxu0 %v5212_v18  ;;  %4798 = vmatprep.mubr.msk.f32.mxu0 %vm354_vm2, %v6388_v33  ;;  %v346_v33 = vadd.f32 %v6381_v13, %v6435_v62 }
0x1157   :  { %5217 = vmatprep.subr.bf16.mxu0 %v5216_v25 }
0x115a   :  { %5219 = vmatpush3.bf16.msra.mxu0 %v5216_v25 }
0x115b   :  { %5232 = vmatprep.subr.bf16.mxu0 %v6041_v0 }
0x115d   :  { %4799 = vmatmul.mubr.msk.f32.vlgmr.msra.gmra.mrb[14].mxu0 %vm354_vm2, %v6437_v63 }
0x115e   :  { %4801 = vmatprep.mubr.msk.f32.mxu0 %vm354_vm2, %v6452_v22  ;;  %5234 = vmatpush3.bf16.msra.mxu0 %v6525_v47 }
0x115f   :  { %5235 = vmatprep.subr.bf16.mxu0 %v6041_v0 }
0x1161   :  { %4802 = vmatmul.mubr.msk.f32.gmra.mrb[16].mxu0 %vm354_vm2, %v6467_v41 }
0x1162   :  { %4804 = vmatprep.mubr.msk.f32.mxu0 %vm354_vm2, %v855_v60  ;;  %5237 = vmatpush3.bf16.msra.mxu0 %v6529_v50 }
0x1163   :  { %5244 = vmatprep.subr.bf16.mxu0 %v6041_v0 }
0x1165   :  { %4805 = vmatmul.mubr.msk.f32.gmra.mrb[18].mxu0 %vm354_vm2, %v955_v26 }
0x1228   :  { %v1024_v27 = vpop.f32.mrb[12].mxu0 }
0x1229   :  { %v1028_v28 = vadd.f32 %v1024_v27, %v346_v33  ;;  %v4778_v29 = vpop.f32.mrb[13].mxu0 }
0x122b   :  { %5518 = vtanh.f32 %v1028_v28  ;;  %v4345_v36 = vmul.f32 -1.442695, %v1028_v28 }
0x122d   :  { %5520 = vpow2.f32 %v4345_v36 }
0x1230   :  { %v6509_v30 = vpop.f32.mrb[14].mxu0 }
0x1231   :  { %v1239_v63 = vpop.f32.mrb[15].mxu0 }
0x1232   :  { %v1240_v60 = vadd.f32 %v6551_v58, %v1239_v63  ;;  %v1245_v63 = vadd.f32 %v6509_v30, %v6551_v58 }
0x1234   :  { %v6511_v31 = vpop.f32.mrb[16].mxu0 }
0x1235   :  { %v5519_v22 = vpop.eup %5518  ;;  %v6513_v32 = vpop.f32.mrb[17].mxu0 }
0x1236   :  { %1038 = vrot.lane.b32.xlu0 %v5519_v22, %s6044_s29 }
0x1237   :  { %v5521_v62 = vpop.eup %5520 }
0x1238   :  { %v6516_v34 = vpop.f32.mrb[18].mxu0  ;;  %v1032_v37 = vadd.f32 1.0, %v5521_v62 }
0x1239   :  { %v6518_v35 = vpop.f32.mrb[19].mxu0 }
0x123a   :  { %5522 = vrcp.f32 %v1032_v37 }
0x1244   :  { %v5523_v38 = vpop.eup %5522 }
0x1245   :  { %v1036_v41 = vmul.f32 %v5523_v38, %v946_v59 }
0x12a8   :  { %v1039_v39 = vpop.permute.xlu0 %1038 }
0x12a9   :  { %v1041_v40 = vmul.f32 %v5523_v38, %v1039_v39 }
0x12ab   :  { %1043 = vrot.lane.b32.xlu1 %v1041_v40, %s6045_s3 }
0x131d   :  { %v1044_v42 = vpop.permute.xlu1 %1043 }
0x131e   :  { %v6521_v43 = vadd.f32 %v1044_v42, %v1036_v41 }
0x1320   :  { %5524 = vtanh.f32 %v6521_v43 }
0x132a   :  { %v5525_v44 = vpop.eup %5524 }
0x132b   :  { %1049 = vrot.lane.b32.xlu0 %v5525_v44, %s6044_s29 }
0x139d   :  { %v1050_v51 = vpop.permute.xlu0 %1049 }
0x139e   :  { %v1052_v52 = vmul.f32 %v5523_v38, %v1050_v51 }
0x13a0   :  { %1054 = vrot.lane.b32.xlu1 %v1052_v52, %s6045_s3 }
0x1412   :  { %v1055_v53 = vpop.permute.xlu1 %1054 }
0x1413   :  { %4788 = vmatmul.mubr.msk.f32.vlgmr.msra.gmra.mrb[8].mxu1 %vm354_vm2, %v1055_v53  ;;  %4807 = vmatprep.mubr.msk.f32.mxu0 %vm354_vm2, %v1055_v53 }
0x1414   :  { %5222 = vmatpush3.bf16.msra.mxu1 %v6525_v47  ;;  %4818 = vmatprep.mubr.msk.f32.mxu1 %vm6042_vm0, %v6043_v1 }
0x1415   :  { %5223 = vmatprep.subr.bf16.mxu1 %v6041_v0 }
0x1418   :  { %5225 = vmatpush3.bf16.msra.mxu1 %v6529_v50 }
0x1419   :  { %5226 = vmatprep.subr.bf16.mxu1 %v6041_v0 }
0x141b   :  { %4819 = vmatmul.mubr.f32.vlgmr.msra.gmra.mrb[10].mxu1 %v6043_v1 }
0x141c   :  { %5228 = vmatpush3.bf16.msra.mxu1 %v6525_v47  ;;  %4829 = vmatprep.mubr.msk.f32.mxu1 %vm6042_vm0, %v6043_v1 }
0x141d   :  { %5229 = vmatprep.subr.bf16.mxu1 %v6041_v0 }
0x1420   :  { %5231 = vmatpush3.bf16.msra.mxu1 %v6529_v50 }
0x1421   :  { %5238 = vmatprep.subr.bf16.mxu1 %v6041_v0 }
0x14e6   :  { %v1124_v55 = vpop.f32.mrb[8].mxu1 }
0x14e7   :  { %v1128_v56 = vadd.f32 %v1124_v55, %v351_v54  ;;  %v4789_v57 = vpop.f32.mrb[9].mxu1  ;;  %v1250_v55 = vadd.f32 %v6551_v58, %v6513_v32 }
0x14e9   :  { %v4347_v59 = vmul.f32 -1.442695, %v1128_v56 }
0x14ee   :  { %v1344_v2 = vpop.f32.mrb[10].mxu1 }
0x14ef   :  { %v1348_v3 = vadd.f32 %v1344_v2, %v1240_v60  ;;  %v4820_v4 = vpop.f32.mrb[11].mxu1 }
0x14f1   :  { %5526 = vtanh.f32 %v1348_v3  ;;  %v4357_v6 = vmul.f32 -1.442695, %v1348_v3 }
0x14f3   :  { %5528 = vpow2.f32 %v4357_v6 }
0x14fb   :  { %v5527_v5 = vpop.eup %5526 }
0x14fc   :  { %1358 = vrot.lane.b32.xlu0 %v5527_v5, %s6044_s29 }
0x14fd   :  { %v5529_v8 = vpop.eup %5528 }
0x14fe   :  { %v1352_v7 = vadd.f32 1.0, %v5529_v8 }
0x1500   :  { %5530 = vrcp.f32 %v1352_v7 }
0x150a   :  { %v5531_v13 = vpop.eup %5530 }
0x150b   :  { %v1356_v10 = vmul.f32 0.0, %v5531_v13 }
0x156e   :  { %v1359_v61 = vpop.permute.xlu0 %1358 }
0x156f   :  { %v1361_v9 = vmul.f32 %v5531_v13, %v1359_v61 }
0x1571   :  { %1363 = vrot.lane.b32.xlu1 %v1361_v9, %s6045_s3 }
0x15e3   :  { %v1364_v11 = vpop.permute.xlu1 %1363 }
0x15e4   :  { %v1366_v12 = vadd.f32 %v1364_v11, %v1356_v10 }
0x15e6   :  { %5532 = vtanh.f32 %v1366_v12 }
0x15e7   :  { %5534 = vtanh.f32 %v1128_v56 }
0x15e8   :  { %5536 = vpow2.f32 %v4347_v59 }
0x15f0   :  { %v5533_v14 = vpop.eup %5532 }
0x15f1   :  { %1369 = vrot.lane.b32.xlu0 %v5533_v14, %s6044_s29  ;;  %v5535_v15 = vpop.eup %5534  ;;  %v1255_v14 = vadd.f32 %v6511_v31, %v6551_v58 }
0x15f2   :  { %v5537_v16 = vpop.eup %5536 }
0x15f3   :  { %v1132_v17 = vadd.f32 1.0, %v5537_v16 }
0x15f5   :  { %1138 = vrot.lane.b32.xlu0 %v5535_v15, %s6044_s29  ;;  %5538 = vrcp.f32 %v1132_v17 }
0x15ff   :  { %v5539_v20 = vpop.eup %5538 }
0x1600   :  { %v1136_v25 = vmul.f32 %v5539_v20, %v6521_v43 }
0x1663   :  { %v1370_v18 = vpop.permute.xlu0 %1369 }
0x1664   :  { %v1372_v19 = vmul.f32 %v5531_v13, %v1370_v18 }
0x1666   :  { %1374 = vrot.lane.b32.xlu1 %v1372_v19, %s6045_s3 }
0x1667   :  { %v1139_v21 = vpop.permute.xlu0 %1138 }
0x1668   :  { %v1141_v23 = vmul.f32 %v5539_v20, %v1139_v21 }
0x166a   :  { %1143 = vrot.lane.b32.xlu0 %v1141_v23, %s6045_s3 }
0x16d8   :  { %v6560_v24 = vpop.permute.xlu1 %1374 }
0x16d9   :  { %4830 = vmatmul.mubr.msk.f32.vlgmr.msra.gmra.mrb[12].mxu1 %vm354_vm2, %v6560_v24 }
0x16da   :  { %5240 = vmatpush3.bf16.msra.mxu1 %v6525_v47  ;;  %4851 = vmatprep.mubr.msk.f32.mxu1 %vm6042_vm0, %v6043_v1 }
0x16db   :  { %5241 = vmatprep.subr.bf16.mxu1 %v6041_v0 }
0x16dc   :  { %v1144_v26 = vpop.permute.xlu0 %1143 }
0x16dd   :  { %v1146_v33 = vadd.f32 %v1144_v26, %v1136_v25 }
0x16de   :  { %5243 = vmatpush3.bf16.msra.mxu1 %v6529_v50 }
0x16df   :  { %5540 = vtanh.f32 %v1146_v33  ;;  %5250 = vmatprep.subr.bf16.mxu1 %v6041_v0 }
0x16e9   :  { %v5541_v27 = vpop.eup %5540 }
0x16ea   :  { %1149 = vrot.lane.b32.xlu0 %v5541_v27, %s6044_s29 }
0x175c   :  { %v1150_v28 = vpop.permute.xlu0 %1149 }
0x175d   :  { %v1152_v29 = vmul.f32 %v5539_v20, %v1150_v28 }
0x175f   :  { %1169 = vrot.lane.b32.xlu0 %v1152_v29, %s6045_s3 }
0x17ac   :  { %v1444_v22 = vpop.f32.mrb[12].mxu1 }
0x17ad   :  { %v1448_v36 = vadd.f32 %v1444_v22, %v1245_v63  ;;  %v4831_v62 = vpop.f32.mrb[13].mxu1  ;;  %v1260_v22 = vadd.f32 %v6551_v58, %v6518_v35 }
0x17af   :  { %5542 = vtanh.f32 %v1448_v36  ;;  %v4359_v39 = vmul.f32 -1.442695, %v1448_v36 }
0x17b1   :  { %5544 = vpow2.f32 %v4359_v39 }
0x17b9   :  { %v5543_v37 = vpop.eup %5542 }
0x17ba   :  { %1458 = vrot.lane.b32.xlu1 %v5543_v37, %s6044_s29 }
0x17bb   :  { %v5545_v40 = vpop.eup %5544 }
0x17bc   :  { %v1452_v41 = vadd.f32 1.0, %v5545_v40 }
0x17be   :  { %5546 = vrcp.f32 %v1452_v41 }
0x17c8   :  { %v5547_v42 = vpop.eup %5546 }
0x17c9   :  { %v1456_v44 = vmul.f32 %v5547_v42, %v1366_v12 }
0x17d1   :  { %v1170_v38 = vpop.permute.xlu0 %1169 }
0x17d2   :  { %4808 = vmatmul.mubr.msk.f32.gmra.mrb[20].mxu0 %vm354_vm2, %v1170_v38 }
0x17d3   :  { %4840 = vmatprep.mubr.msk.f32.mxu0 %vm6042_vm0, %v6043_v1 }
0x182c   :  { %v1459_v30 = vpop.permute.xlu1 %1458 }
0x182d   :  { %v1461_v43 = vmul.f32 %v5547_v42, %v1459_v30 }
0x182f   :  { %1463 = vrot.lane.b32.xlu1 %v1461_v43, %s6045_s3 }
0x18a1   :  { %v1464_v45 = vpop.permute.xlu1 %1463 }
0x18a2   :  { %v1466_v46 = vadd.f32 %v1464_v45, %v1456_v44 }
0x18a4   :  { %5548 = vtanh.f32 %v1466_v46 }
0x18a5   :  { %v6580_v48 = vpop.f32.mrb[20].mxu0 }
0x18a6   :  { %v6582_v49 = vpop.f32.mrb[21].mxu0 }
0x18ae   :  { %v5549_v51 = vpop.eup %5548 }
0x18af   :  { %1469 = vrot.lane.b32.xlu1 %v5549_v51, %s6044_s29 }
0x1921   :  { %v1470_v52 = vpop.permute.xlu1 %1469 }
0x1922   :  { %v1472_v53 = vmul.f32 %v5547_v42, %v1470_v52 }
0x1924   :  { %1474 = vrot.lane.b32.xlu1 %v1472_v53, %s6045_s3 }
0x1996   :  { %v6586_v54 = vpop.permute.xlu1 %1474 }
0x1997   :  { %4841 = vmatmul.mubr.msk.f32.vlgmr.msra.gmra.mrb[22].mxu0 %vm354_vm2, %v6586_v54 }
0x1998   :  { %5246 = vmatpush3.bf16.msra.mxu0 %v6525_v47  ;;  %4862 = vmatprep.mubr.msk.f32.mxu0 %vm6042_vm0, %v6043_v1 }
0x1999   :  { %5247 = vmatprep.subr.bf16.mxu0 %v6041_v0 }
0x199c   :  { %5249 = vmatpush3.bf16.msra.mxu0 %v6529_v50 }
0x199d   :  { %5256 = vmatprep.subr.bf16.mxu0 %v6041_v0 }
0x1a6a   :  { %v1544_v56 = vpop.f32.mrb[22].mxu0 }
0x1a6b   :  { %v1548_v57 = vadd.f32 %v1544_v56, %v1250_v55  ;;  %v4842_v60 = vpop.f32.mrb[23].mxu0  ;;  %v1265_v55 = vadd.f32 %v6516_v34, %v6551_v58 }
0x1a6d   :  { %5550 = vtanh.f32 %v1548_v57  ;;  %v4361_v3 = vmul.f32 -1.442695, %v1548_v57 }
0x1a6f   :  { %5552 = vpow2.f32 %v4361_v3 }
0x1a77   :  { %v5551_v2 = vpop.eup %5550 }
0x1a78   :  { %1558 = vrot.lane.b32.xlu0 %v5551_v2, %s6044_s29 }
0x1a79   :  { %v5553_v4 = vpop.eup %5552 }
0x1a7a   :  { %v1552_v5 = vadd.f32 1.0, %v5553_v4 }
0x1a7c   :  { %5554 = vrcp.f32 %v1552_v5 }
0x1a86   :  { %v5555_v6 = vpop.eup %5554 }
0x1a87   :  { %v1556_v13 = vmul.f32 %v5555_v6, %v1466_v46 }
0x1aea   :  { %v1559_v8 = vpop.permute.xlu0 %1558 }
0x1aeb   :  { %v1561_v7 = vmul.f32 %v5555_v6, %v1559_v8 }
0x1aed   :  { %1563 = vrot.lane.b32.xlu1 %v1561_v7, %s6045_s3 }
0x1b5f   :  { %v1564_v61 = vpop.permute.xlu1 %1563 }
0x1b60   :  { %v1566_v32 = vadd.f32 %v1564_v61, %v1556_v13  ;;  %v2073_v13 = vld [vmem:[#allocation10] sm:$0xff]  ;;  %v2074_v61 = vld [vmem:[#allocation10 + $0x8] sm:$0xff] }
0x1b62   :  { %5556 = vtanh.f32 %v1566_v32 }
0x1b6c   :  { %v5557_v9 = vpop.eup %5556 }
0x1b6d   :  { %1569 = vrot.lane.b32.xlu0 %v5557_v9, %s6044_s29 }
0x1bdf   :  { %v1570_v10 = vpop.permute.xlu0 %1569 }
0x1be0   :  { %v1572_v11 = vmul.f32 %v5555_v6, %v1570_v10 }
0x1be2   :  { %1574 = vrot.lane.b32.xlu1 %v1572_v11, %s6045_s3 }
0x1c54   :  { %v6602_v12 = vpop.permute.xlu1 %1574 }
0x1c55   :  { %4852 = vmatmul.mubr.msk.f32.vlgmr.msra.gmra.mrb[14].mxu1 %vm354_vm2, %v6602_v12 }
0x1c56   :  { %5252 = vmatpush3.bf16.msra.mxu1 %v6525_v47  ;;  %4873 = vmatprep.mubr.msk.f32.mxu1 %vm6042_vm0, %v6043_v1 }
0x1c57   :  { %5253 = vmatprep.subr.bf16.mxu1 %v6041_v0 }
0x1c5a   :  { %5255 = vmatpush3.bf16.msra.mxu1 %v6529_v50 }
0x1c5b   :  { %5262 = vmatprep.subr.bf16.mxu1 %v6041_v0 }
0x1d28   :  { %v1644_v15 = vpop.f32.mrb[14].mxu1 }
0x1d29   :  { %v1648_v59 = vadd.f32 %v1644_v15, %v1255_v14  ;;  %v4853_v16 = vpop.f32.mrb[15].mxu1  ;;  %v2075_v14 = vld [vmem:[#allocation10 + $0x10] sm:$0xff]  ;;  %v2076_v15 = vld [vmem:[#allocation10 + $0x18] sm:$0xff] }
0x1d2b   :  { %5558 = vtanh.f32 %v1648_v59  ;;  %v4363_v18 = vmul.f32 -1.442695, %v1648_v59  ;;  %v5272_v59 = vpack.c.bf16 %v2076_v15, %v2075_v14 }
0x1d2d   :  { %5560 = vpow2.f32 %v4363_v18 }
0x1d35   :  { %v5559_v17 = vpop.eup %5558 }
0x1d36   :  { %1658 = vrot.lane.b32.xlu0 %v5559_v17, %s6044_s29 }
0x1d37   :  { %v5561_v19 = vpop.eup %5560 }
0x1d38   :  { %v1652_v20 = vadd.f32 1.0, %v5561_v19 }
0x1d3a   :  { %5562 = vrcp.f32 %v1652_v20 }
0x1d44   :  { %v5563_v21 = vpop.eup %5562 }
0x1d45   :  { %v1656_v26 = vmul.f32 %v5563_v21, %v1566_v32  ;;  %v5268_v32 = vpack.c.bf16 %v2074_v61, %v2073_v13 }
0x1da8   :  { %v1659_v23 = vpop.permute.xlu0 %1658 }
0x1da9   :  { %v1661_v25 = vmul.f32 %v5563_v21, %v1659_v23 }
0x1dab   :  { %1663 = vrot.lane.b32.xlu1 %v1661_v25, %s6045_s3 }
0x1e1d   :  { %v1664_v33 = vpop.permute.xlu1 %1663 }
0x1e1e   :  { %v1666_v31 = vadd.f32 %v1664_v33, %v1656_v26 }
0x1e20   :  { %5564 = vtanh.f32 %v1666_v31 }
0x1e2a   :  { %v5565_v27 = vpop.eup %5564 }
0x1e2b   :  { %1669 = vrot.lane.b32.xlu0 %v5565_v27, %s6044_s29 }
0x1e9d   :  { %v1670_v28 = vpop.permute.xlu0 %1669 }
0x1e9e   :  { %v1672_v29 = vmul.f32 %v5563_v21, %v1670_v28 }
0x1ea0   :  { %1674 = vrot.lane.b32.xlu1 %v1672_v29, %s6045_s3 }
0x1f12   :  { %v6618_v63 = vpop.permute.xlu1 %1674 }
0x1f13   :  { %4863 = vmatmul.mubr.msk.f32.vlgmr.msra.gmra.mrb[24].mxu0 %vm354_vm2, %v6618_v63 }
0x1f14   :  { %5258 = vmatpush3.bf16.msra.mxu0 %v6525_v47  ;;  %4884 = vmatprep.mubr.msk.f32.mxu0 %vm6042_vm0, %v6043_v1 }
0x1f15   :  { %5259 = vmatprep.subr.bf16.mxu0 %v6041_v0 }
0x1f18   :  { %5261 = vmatpush3.bf16.msra.mxu0 %v6529_v50 }
0x1f19   :  { %5269 = vmatprep.subr.bf16.mxu0 %v5268_v32 }
0x1fe6   :  { %v1744_v36 = vpop.f32.mrb[24].mxu0 }
0x1fe7   :  { %v1748_v62 = vadd.f32 %v1744_v36, %v1260_v22  ;;  %v4864_v37 = vpop.f32.mrb[25].mxu0 }
0x1fe8   :  { %v2077_v37 = vld [vmem:[#allocation11] sm:$0xff] }
0x1fe9   :  { %5566 = vtanh.f32 %v1748_v62  ;;  %v4365_v39 = vmul.f32 -1.442695, %v1748_v62 }
0x1feb   :  { %5568 = vpow2.f32 %v4365_v39 }
0x1ff3   :  { %v5567_v38 = vpop.eup %5566 }
0x1ff4   :  { %1758 = vrot.lane.b32.xlu0 %v5567_v38, %s6044_s29  ;;  %v2078_v38 = vld [vmem:[#allocation11 + $0x8] sm:$0xff] }
0x1ff5   :  { %v5569_v40 = vpop.eup %5568  ;;  %v6676_v39 = vpack.c.bf16 %v2078_v38, %v2077_v37 }
0x1ff6   :  { %v1752_v41 = vadd.f32 1.0, %v5569_v40  ;;  %v2079_v40 = vld [vmem:[#allocation11 + $0x10] sm:$0xff] }
0x1ff8   :  { %5570 = vrcp.f32 %v1752_v41  ;;  %v2080_v41 = vld [vmem:[#allocation11 + $0x18] sm:$0xff] }
0x2002   :  { %v5571_v42 = vpop.eup %5570 }
0x2003   :  { %v1756_v44 = vmul.f32 %v5571_v42, %v1666_v31 }
0x2066   :  { %v1759_v30 = vpop.permute.xlu0 %1758 }
0x2067   :  { %v1761_v43 = vmul.f32 %v5571_v42, %v1759_v30 }
0x2069   :  { %1763 = vrot.lane.b32.xlu1 %v1761_v43, %s6045_s3 }
0x20db   :  { %v1764_v45 = vpop.permute.xlu1 %1763 }
0x20dc   :  { %v1766_v35 = vadd.f32 %v1764_v45, %v1756_v44  ;;  %v1275_v45 = vadd.f32 %v6580_v48, %v6551_v58 }
0x20de   :  { %5572 = vtanh.f32 %v1766_v35 }
0x20e8   :  { %v5573_v46 = vpop.eup %5572 }
0x20e9   :  { %1769 = vrot.lane.b32.xlu0 %v5573_v46, %s6044_s29 }
0x215b   :  { %v1770_v51 = vpop.permute.xlu0 %1769 }
0x215c   :  { %v1772_v52 = vmul.f32 %v5571_v42, %v1770_v51  ;;  %v6680_v42 = vpack.c.bf16 %v2080_v41, %v2079_v40 }
0x215e   :  { %1774 = vrot.lane.b32.xlu1 %v1772_v52, %s6045_s3  ;;  %v6702_v52 = vld [vmem:[#allocation13] ss:$0 sm:$0xff] }
0x21d0   :  { %v1775_v53 = vpop.permute.xlu1 %1774 }
0x21d1   :  { %4874 = vmatmul.mubr.msk.f32.vlgmr.msra.gmra.mrb[16].mxu1 %vm354_vm2, %v1775_v53 }
0x21d2   :  { %5264 = vmatpush3.bf16.msra.mxu1 %v6525_v47  ;;  %4895 = vmatprep.mubr.msk.f32.mxu1 %vm6042_vm0, %v6043_v1 }
0x21d3   :  { %5265 = vmatprep.subr.bf16.mxu1 %v6041_v0 }
0x21d6   :  { %5267 = vmatpush3.bf16.msra.mxu1 %v6529_v50 }
0x21d7   :  { %5276 = vmatprep.subr.bf16.mxu1 %v6041_v0 }
0x22a4   :  { %v1844_v56 = vpop.f32.mrb[16].mxu1 }
0x22a5   :  { %v1848_v57 = vadd.f32 %v1844_v56, %v1265_v55  ;;  %v4875_v60 = vpop.f32.mrb[17].mxu1 }
0x22a7   :  { %5574 = vtanh.f32 %v1848_v57  ;;  %v4367_v47 = vmul.f32 -1.442695, %v1848_v57 }
0x22a9   :  { %5576 = vpow2.f32 %v4367_v47 }
0x22b1   :  { %v5575_v2 = vpop.eup %5574 }
0x22b2   :  { %1858 = vrot.lane.b32.xlu0 %v5575_v2, %s6044_s29 }
0x22b3   :  { %v5577_v3 = vpop.eup %5576 }
0x22b4   :  { %v1852_v4 = vadd.f32 1.0, %v5577_v3 }
0x22b6   :  { %5578 = vrcp.f32 %v1852_v4 }
0x22c0   :  { %v5579_v5 = vpop.eup %5578 }
0x22c1   :  { %v1856_v8 = vmul.f32 %v5579_v5, %v1766_v35 }
0x2324   :  { %v1859_v6 = vpop.permute.xlu0 %1858 }
0x2325   :  { %v1861_v50 = vmul.f32 %v5579_v5, %v1859_v6 }
0x2327   :  { %1863 = vrot.lane.b32.xlu1 %v1861_v50, %s6045_s3 }
0x2399   :  { %v1864_v7 = vpop.permute.xlu1 %1863 }
0x239a   :  { %v1866_v34 = vadd.f32 %v1864_v7, %v1856_v8 }
0x239c   :  { %5580 = vtanh.f32 %v1866_v34 }
0x23a6   :  { %v5581_v9 = vpop.eup %5580 }
0x23a7   :  { %1869 = vrot.lane.b32.xlu0 %v5581_v9, %s6044_s29 }
0x2419   :  { %v1870_v10 = vpop.permute.xlu0 %1869 }
0x241a   :  { %v1872_v11 = vmul.f32 %v5579_v5, %v1870_v10 }
0x241c   :  { %1874 = vrot.lane.b32.xlu1 %v1872_v11, %s6045_s3 }
0x248e   :  { %v1875_v16 = vpop.permute.xlu1 %1874 }
0x248f   :  { %4885 = vmatmul.mubr.msk.f32.vlgmr.msra.gmra.mrb[26].mxu0 %vm354_vm2, %v1875_v16 }
0x2490   :  { %5271 = vmatpush3.bf16.msra.mxu0 %v5268_v32  ;;  %4906 = vmatprep.mubr.msk.f32.mxu0 %vm354_vm2, %v6560_v24  ;;  %v1270_v24 = vadd.f32 %v6551_v58, %v6582_v49 }
0x2491   :  { %5273 = vmatprep.subr.bf16.mxu0 %v5272_v59 }
0x2494   :  { %5275 = vmatpush3.bf16.msra.mxu0 %v5272_v59 }
0x2495   :  { %5288 = vmatprep.subr.bf16.mxu0 %v6041_v0 }
0x2497   :  { %4907 = vmatmul.mubr.msk.f32.vlgmr.msra.gmra.mrb[28].mxu0 %vm354_vm2, %v6586_v54 }
0x2498   :  { %4909 = vmatprep.mubr.msk.f32.mxu0 %vm354_vm2, %v6602_v12  ;;  %5290 = vmatpush3.bf16.msra.mxu0 %v6676_v39 }
0x2499   :  { %5291 = vmatprep.subr.bf16.mxu0 %v6041_v0 }
0x249b   :  { %4910 = vmatmul.mubr.msk.f32.gmra.mrb[30].mxu0 %vm354_vm2, %v6618_v63 }
0x249c   :  { %4912 = vmatprep.mubr.msk.f32.mxu0 %vm354_vm2, %v1775_v53  ;;  %5293 = vmatpush3.bf16.msra.mxu0 %v6680_v42 }
0x249d   :  { %5300 = vmatprep.subr.bf16.mxu0 %v6041_v0 }
0x249f   :  { %4913 = vmatmul.mubr.msk.f32.gmra.mrb[32].mxu0 %vm354_vm2, %v1875_v16 }
0x2562   :  { %v1944_v17 = vpop.f32.mrb[26].mxu0 }
0x2563   :  { %v1948_v18 = vadd.f32 %v1944_v17, %v1270_v24  ;;  %v4886_v19 = vpop.f32.mrb[27].mxu0 }
0x2565   :  { %5582 = vtanh.f32 %v1948_v18  ;;  %v4369_v33 = vmul.f32 -1.442695, %v1948_v18 }
0x2567   :  { %5584 = vpow2.f32 %v4369_v33 }
0x256a   :  { %v6660_v20 = vpop.f32.mrb[28].mxu0 }
0x256b   :  { %v2159_v54 = vpop.f32.mrb[29].mxu0 }
0x256c   :  { %v2160_v53 = vadd.f32 %v6702_v52, %v2159_v54  ;;  %v2165_v54 = vadd.f32 %v6660_v20, %v6702_v52 }
0x256e   :  { %v6662_v21 = vpop.f32.mrb[30].mxu0 }
0x256f   :  { %v5583_v12 = vpop.eup %5582  ;;  %v6664_v23 = vpop.f32.mrb[31].mxu0 }
0x2570   :  { %1958 = vrot.lane.b32.xlu0 %v5583_v12, %s6044_s29 }
0x2571   :  { %v5585_v49 = vpop.eup %5584 }
0x2572   :  { %v6667_v25 = vpop.f32.mrb[32].mxu0  ;;  %v1952_v31 = vadd.f32 1.0, %v5585_v49 }
0x2573   :  { %v6669_v26 = vpop.f32.mrb[33].mxu0 }
0x2574   :  { %5586 = vrcp.f32 %v1952_v31 }
0x257e   :  { %v5587_v27 = vpop.eup %5586 }
0x257f   :  { %v1956_v63 = vmul.f32 %v5587_v27, %v1866_v34 }
0x25e2   :  { %v1959_v28 = vpop.permute.xlu0 %1958 }
0x25e3   :  { %v1961_v29 = vmul.f32 %v5587_v27, %v1959_v28 }
0x25e5   :  { %1963 = vrot.lane.b32.xlu1 %v1961_v29, %s6045_s3 }
0x2657   :  { %v1964_v22 = vpop.permute.xlu1 %1963 }
0x2658   :  { %v6672_v36 = vadd.f32 %v1964_v22, %v1956_v63 }
0x265a   :  { %5588 = vtanh.f32 %v6672_v36 }
0x2664   :  { %v5589_v62 = vpop.eup %5588 }
0x2665   :  { %1969 = vrot.lane.b32.xlu0 %v5589_v62, %s6044_s29 }
0x26d7   :  { %v1970_v30 = vpop.permute.xlu0 %1969 }
0x26d8   :  { %v1972_v43 = vmul.f32 %v5587_v27, %v1970_v30 }
0x26da   :  { %1974 = vrot.lane.b32.xlu1 %v1972_v43, %s6045_s3 }
0x274c   :  { %v1975_v44 = vpop.permute.xlu1 %1974 }
0x274d   :  { %4896 = vmatmul.mubr.msk.f32.vlgmr.msra.gmra.mrb[18].mxu1 %vm354_vm2, %v1975_v44  ;;  %4915 = vmatprep.mubr.msk.f32.mxu0 %vm354_vm2, %v1975_v44 }
0x274e   :  { %5278 = vmatpush3.bf16.msra.mxu1 %v6676_v39  ;;  %4926 = vmatprep.mubr.msk.f32.mxu1 %vm6042_vm0, %v6043_v1 }
0x274f   :  { %5279 = vmatprep.subr.bf16.mxu1 %v6041_v0 }
0x2752   :  { %5281 = vmatpush3.bf16.msra.mxu1 %v6680_v42 }
0x2753   :  { %5282 = vmatprep.subr.bf16.mxu1 %v6041_v0 }
0x2755   :  { %4927 = vmatmul.mubr.f32.vlgmr.msra.gmra.mrb[20].mxu1 %v6043_v1 }
0x2756   :  { %5284 = vmatpush3.bf16.msra.mxu1 %v6676_v39  ;;  %4937 = vmatprep.mubr.msk.f32.mxu1 %vm6042_vm0, %v6043_v1 }
0x2757   :  { %5285 = vmatprep.subr.bf16.mxu1 %v6041_v0 }
0x275a   :  { %5287 = vmatpush3.bf16.msra.mxu1 %v6680_v42 }
0x275b   :  { %5294 = vmatprep.subr.bf16.mxu1 %v6041_v0 }
0x2820   :  { %v2044_v35 = vpop.f32.mrb[18].mxu1 }
0x2821   :  { %v2048_v46 = vadd.f32 %v2044_v35, %v1275_v45  ;;  %v4897_v51 = vpop.f32.mrb[19].mxu1  ;;  %v2170_v35 = vadd.f32 %v6702_v52, %v6664_v23 }
0x2823   :  { %v4371_v34 = vmul.f32 -1.442695, %v2048_v46 }
0x2828   :  { %v2264_v55 = vpop.f32.mrb[20].mxu1 }
0x2829   :  { %v2268_v56 = vadd.f32 %v2264_v55, %v2160_v53  ;;  %v4928_v57 = vpop.f32.mrb[21].mxu1 }
0x282b   :  { %5590 = vtanh.f32 %v2268_v56  ;;  %v4381_v2 = vmul.f32 -1.442695, %v2268_v56 }
0x282d   :  { %5592 = vpow2.f32 %v4381_v2 }
0x2835   :  { %v5591_v60 = vpop.eup %5590 }
0x2836   :  { %2278 = vrot.lane.b32.xlu0 %v5591_v60, %s6044_s29 }
0x2837   :  { %v5593_v47 = vpop.eup %5592 }
0x2838   :  { %v2272_v3 = vadd.f32 1.0, %v5593_v47 }
0x283a   :  { %5594 = vrcp.f32 %v2272_v3 }
0x2844   :  { %v5595_v58 = vpop.eup %5594 }
0x2845   :  { %v2276_v5 = vmul.f32 0.0, %v5595_v58 }
0x28a8   :  { %v2279_v48 = vpop.permute.xlu0 %2278 }
0x28a9   :  { %v2281_v4 = vmul.f32 %v5595_v58, %v2279_v48 }
0x28ab   :  { %2283 = vrot.lane.b32.xlu1 %v2281_v4, %s6045_s3 }
0x291d   :  { %v2284_v6 = vpop.permute.xlu1 %2283 }
0x291e   :  { %v2286_v50 = vadd.f32 %v2284_v6, %v2276_v5 }
0x2920   :  { %5596 = vtanh.f32 %v2286_v50 }
0x2921   :  { %5598 = vtanh.f32 %v2048_v46 }
0x2922   :  { %5600 = vpow2.f32 %v4371_v34 }
0x292a   :  { %v5597_v8 = vpop.eup %5596 }
0x292b   :  { %2289 = vrot.lane.b32.xlu0 %v5597_v8, %s6044_s29  ;;  %v5599_v7 = vpop.eup %5598  ;;  %v2175_v8 = vadd.f32 %v6662_v21, %v6702_v52 }
0x292c   :  { %v5601_v13 = vpop.eup %5600 }
0x292d   :  { %v2052_v61 = vadd.f32 1.0, %v5601_v13 }
0x292f   :  { %2058 = vrot.lane.b32.xlu0 %v5599_v7, %s6044_s29  ;;  %5602 = vrcp.f32 %v2052_v61 }
0x2939   :  { %v5603_v10 = vpop.eup %5602 }
0x293a   :  { %v2056_v59 = vmul.f32 %v5603_v10, %v6672_v36 }
0x299d   :  { %v2290_v32 = vpop.permute.xlu0 %2289 }
0x299e   :  { %v2292_v9 = vmul.f32 %v5595_v58, %v2290_v32 }
0x29a0   :  { %2294 = vrot.lane.b32.xlu1 %v2292_v9, %s6045_s3 }
0x29a1   :  { %v2059_v11 = vpop.permute.xlu0 %2058 }
0x29a2   :  { %v2061_v14 = vmul.f32 %v5603_v10, %v2059_v11 }
0x29a4   :  { %2063 = vrot.lane.b32.xlu0 %v2061_v14, %s6045_s3 }
0x2a12   :  { %v6711_v15 = vpop.permute.xlu1 %2294 }
0x2a13   :  { %4938 = vmatmul.mubr.msk.f32.vlgmr.msra.gmra.mrb[22].mxu1 %vm354_vm2, %v6711_v15 }
0x2a14   :  { %5296 = vmatpush3.bf16.msra.mxu1 %v6676_v39  ;;  %4959 = vmatprep.mubr.msk.f32.mxu1 %vm6042_vm0, %v6043_v1 }
0x2a15   :  { %5297 = vmatprep.subr.bf16.mxu1 %v6041_v0 }
0x2a16   :  { %v2064_v16 = vpop.permute.xlu0 %2063 }
0x2a17   :  { %v2066_v24 = vadd.f32 %v2064_v16, %v2056_v59 }
0x2a18   :  { %5299 = vmatpush3.bf16.msra.mxu1 %v6680_v42 }
0x2a19   :  { %5604 = vtanh.f32 %v2066_v24  ;;  %5306 = vmatprep.subr.bf16.mxu1 %v6041_v0 }
0x2a23   :  { %v5605_v17 = vpop.eup %5604 }
0x2a24   :  { %2069 = vrot.lane.b32.xlu0 %v5605_v17, %s6044_s29 }
0x2a96   :  { %v2070_v18 = vpop.permute.xlu0 %2069 }
0x2a97   :  { %v2072_v19 = vmul.f32 %v5603_v10, %v2070_v18 }
0x2a99   :  { %2089 = vrot.lane.b32.xlu0 %v2072_v19, %s6045_s3 }
0x2ae6   :  { %v2364_v12 = vpop.f32.mrb[22].mxu1 }
0x2ae7   :  { %v2368_v33 = vadd.f32 %v2364_v12, %v2165_v54  ;;  %v4939_v49 = vpop.f32.mrb[23].mxu1  ;;  %v2180_v12 = vadd.f32 %v6702_v52, %v6669_v26 }
0x2ae9   :  { %5606 = vtanh.f32 %v2368_v33  ;;  %v4383_v28 = vmul.f32 -1.442695, %v2368_v33 }
0x2aeb   :  { %5608 = vpow2.f32 %v4383_v28 }
0x2af3   :  { %v5607_v31 = vpop.eup %5606 }
0x2af4   :  { %2378 = vrot.lane.b32.xlu1 %v5607_v31, %s6044_s29 }
0x2af5   :  { %v5609_v29 = vpop.eup %5608 }
0x2af6   :  { %v2372_v63 = vadd.f32 1.0, %v5609_v29 }
0x2af8   :  { %5610 = vrcp.f32 %v2372_v63 }
0x2b02   :  { %v5611_v22 = vpop.eup %5610 }
0x2b03   :  { %v2376_v62 = vmul.f32 %v5611_v22, %v2286_v50 }
0x2b0b   :  { %v2090_v27 = vpop.permute.xlu0 %2089 }
0x2b0c   :  { %4916 = vmatmul.mubr.msk.f32.gmra.mrb[34].mxu0 %vm354_vm2, %v2090_v27 }
0x2b0d   :  { %4948 = vmatprep.mubr.msk.f32.mxu0 %vm6042_vm0, %v6043_v1 }
0x2b66   :  { %v2379_v20 = vpop.permute.xlu1 %2378 }
0x2b67   :  { %v2381_v36 = vmul.f32 %v5611_v22, %v2379_v20 }
0x2b69   :  { %2383 = vrot.lane.b32.xlu1 %v2381_v36, %s6045_s3 }
0x2bdb   :  { %v2384_v37 = vpop.permute.xlu1 %2383 }
0x2bdc   :  { %v2386_v38 = vadd.f32 %v2384_v37, %v2376_v62 }
0x2bde   :  { %5612 = vtanh.f32 %v2386_v38 }
0x2bdf   :  { %v6731_v40 = vpop.f32.mrb[34].mxu0 }
0x2be0   :  { %v6733_v41 = vpop.f32.mrb[35].mxu0 }
0x2be8   :  { %v5613_v30 = vpop.eup %5612 }
0x2be9   :  { %2389 = vrot.lane.b32.xlu1 %v5613_v30, %s6044_s29 }
0x2c5b   :  { %v2390_v43 = vpop.permute.xlu1 %2389 }
0x2c5c   :  { %v2392_v44 = vmul.f32 %v5611_v22, %v2390_v43 }
0x2c5e   :  { %2394 = vrot.lane.b32.xlu1 %v2392_v44, %s6045_s3 }
0x2cd0   :  { %v6737_v45 = vpop.permute.xlu1 %2394 }
0x2cd1   :  { %4949 = vmatmul.mubr.msk.f32.vlgmr.msra.gmra.mrb[36].mxu0 %vm354_vm2, %v6737_v45 }
0x2cd2   :  { %5302 = vmatpush3.bf16.msra.mxu0 %v6676_v39  ;;  %4970 = vmatprep.mubr.msk.f32.mxu0 %vm6042_vm0, %v6043_v1 }
0x2cd3   :  { %5303 = vmatprep.subr.bf16.mxu0 %v6041_v0 }
0x2cd6   :  { %5305 = vmatpush3.bf16.msra.mxu0 %v6680_v42 }
0x2cd7   :  { %5312 = vmatprep.subr.bf16.mxu0 %v6041_v0 }
0x2da4   :  { %v2464_v46 = vpop.f32.mrb[36].mxu0 }
0x2da5   :  { %v2468_v51 = vadd.f32 %v2464_v46, %v2170_v35  ;;  %v4950_v53 = vpop.f32.mrb[37].mxu0  ;;  %v2185_v35 = vadd.f32 %v6667_v25, %v6702_v52 }
0x2da7   :  { %5614 = vtanh.f32 %v2468_v51  ;;  %v4385_v56 = vmul.f32 -1.442695, %v2468_v51 }
0x2da9   :  { %5616 = vpow2.f32 %v4385_v56 }
0x2db1   :  { %v5615_v55 = vpop.eup %5614 }
0x2db2   :  { %2478 = vrot.lane.b32.xlu0 %v5615_v55, %s6044_s29 }
0x2db3   :  { %v5617_v57 = vpop.eup %5616 }
0x2db4   :  { %v2472_v60 = vadd.f32 1.0, %v5617_v57 }
0x2db6   :  { %5618 = vrcp.f32 %v2472_v60 }
0x2dc0   :  { %v5619_v2 = vpop.eup %5618 }
0x2dc1   :  { %v2476_v58 = vmul.f32 %v5619_v2, %v2386_v38 }
0x2e24   :  { %v2479_v47 = vpop.permute.xlu0 %2478 }
0x2e25   :  { %v2481_v3 = vmul.f32 %v5619_v2, %v2479_v47 }
0x2e27   :  { %2483 = vrot.lane.b32.xlu1 %v2481_v3, %s6045_s3 }
0x2e99   :  { %v2484_v48 = vpop.permute.xlu1 %2483 }
0x2e9a   :  { %v2486_v23 = vadd.f32 %v2484_v48, %v2476_v58  ;;  %v2993_v58 = vld [vmem:[#allocation14] sm:$0xff]  ;;  %v2994_v48 = vld [vmem:[#allocation14 + $0x8] sm:$0xff] }
0x2e9c   :  { %5620 = vtanh.f32 %v2486_v23 }
0x2ea6   :  { %v5621_v4 = vpop.eup %5620 }
0x2ea7   :  { %2489 = vrot.lane.b32.xlu0 %v5621_v4, %s6044_s29 }
0x2f19   :  { %v2490_v5 = vpop.permute.xlu0 %2489 }
0x2f1a   :  { %v2492_v6 = vmul.f32 %v5619_v2, %v2490_v5 }
0x2f1c   :  { %2494 = vrot.lane.b32.xlu1 %v2492_v6, %s6045_s3 }
0x2f8e   :  { %v6753_v50 = vpop.permute.xlu1 %2494 }
0x2f8f   :  { %4960 = vmatmul.mubr.msk.f32.vlgmr.msra.gmra.mrb[24].mxu1 %vm354_vm2, %v6753_v50 }
0x2f90   :  { %5308 = vmatpush3.bf16.msra.mxu1 %v6676_v39  ;;  %4981 = vmatprep.mubr.msk.f32.mxu1 %vm6042_vm0, %v6043_v1 }
0x2f91   :  { %5309 = vmatprep.subr.bf16.mxu1 %v6041_v0 }
0x2f94   :  { %5311 = vmatpush3.bf16.msra.mxu1 %v6680_v42 }
0x2f95   :  { %5318 = vmatprep.subr.bf16.mxu1 %v6041_v0 }
0x3062   :  { %v2564_v7 = vpop.f32.mrb[24].mxu1 }
0x3063   :  { %v2568_v34 = vadd.f32 %v2564_v7, %v2175_v8  ;;  %v4961_v13 = vpop.f32.mrb[25].mxu1  ;;  %v2995_v8 = vld [vmem:[#allocation14 + $0x10] sm:$0xff]  ;;  %v2996_v7 = vld [vmem:[#allocation14 + $0x18] sm:$0xff] }
0x3065   :  { %5622 = vtanh.f32 %v2568_v34  ;;  %v4387_v32 = vmul.f32 -1.442695, %v2568_v34  ;;  %v5328_v34 = vpack.c.bf16 %v2996_v7, %v2995_v8 }
0x3067   :  { %5624 = vpow2.f32 %v4387_v32 }
0x306f   :  { %v5623_v61 = vpop.eup %5622 }
0x3070   :  { %2578 = vrot.lane.b32.xlu0 %v5623_v61, %s6044_s29 }
0x3071   :  { %v5625_v9 = vpop.eup %5624 }
0x3072   :  { %v2572_v10 = vadd.f32 1.0, %v5625_v9 }
0x3074   :  { %5626 = vrcp.f32 %v2572_v10 }
0x307e   :  { %v5627_v11 = vpop.eup %5626 }
0x307f   :  { %v2576_v16 = vmul.f32 %v5627_v11, %v2486_v23  ;;  %v5324_v23 = vpack.c.bf16 %v2994_v48, %v2993_v58 }
0x30e2   :  { %v2579_v14 = vpop.permute.xlu0 %2578 }
0x30e3   :  { %v2581_v59 = vmul.f32 %v5627_v11, %v2579_v14 }
0x30e5   :  { %2583 = vrot.lane.b32.xlu1 %v2581_v59, %s6045_s3 }
0x3157   :  { %v2584_v24 = vpop.permute.xlu1 %2583 }
0x3158   :  { %v2586_v21 = vadd.f32 %v2584_v24, %v2576_v16 }
0x315a   :  { %5628 = vtanh.f32 %v2586_v21 }
0x3164   :  { %v5629_v17 = vpop.eup %5628 }
0x3165   :  { %2589 = vrot.lane.b32.xlu0 %v5629_v17, %s6044_s29 }
0x31d7   :  { %v2590_v18 = vpop.permute.xlu0 %2589 }
0x31d8   :  { %v2592_v19 = vmul.f32 %v5627_v11, %v2590_v18 }
0x31da   :  { %2594 = vrot.lane.b32.xlu1 %v2592_v19, %s6045_s3 }
0x324c   :  { %v6769_v54 = vpop.permute.xlu1 %2594 }
0x324d   :  { %4971 = vmatmul.mubr.msk.f32.vlgmr.msra.gmra.mrb[38].mxu0 %vm354_vm2, %v6769_v54 }
0x324e   :  { %5314 = vmatpush3.bf16.msra.mxu0 %v6676_v39  ;;  %4992 = vmatprep.mubr.msk.f32.mxu0 %vm6042_vm0, %v6043_v1 }
0x324f   :  { %5315 = vmatprep.subr.bf16.mxu0 %v6041_v0 }
0x3252   :  { %5317 = vmatpush3.bf16.msra.mxu0 %v6680_v42 }
0x3253   :  { %5325 = vmatprep.subr.bf16.mxu0 %v5324_v23 }
0x3320   :  { %v2664_v33 = vpop.f32.mrb[38].mxu0 }
0x3321   :  { %v2668_v49 = vadd.f32 %v2664_v33, %v2180_v12  ;;  %v4972_v31 = vpop.f32.mrb[39].mxu0 }
0x3322   :  { %v2997_v31 = vld [vmem:[#allocation16] sm:$0xff] }
0x3323   :  { %5630 = vtanh.f32 %v2668_v49  ;;  %v4389_v28 = vmul.f32 -1.442695, %v2668_v49 }
0x3325   :  { %5632 = vpow2.f32 %v4389_v28 }
0x332d   :  { %v5631_v27 = vpop.eup %5630 }
0x332e   :  { %2678 = vrot.lane.b32.xlu0 %v5631_v27, %s6044_s29  ;;  %v2998_v27 = vld [vmem:[#allocation16 + $0x8] sm:$0xff] }
0x332f   :  { %v5633_v29 = vpop.eup %5632  ;;  %v6827_v28 = vpack.c.bf16 %v2998_v27, %v2997_v31 }
0x3330   :  { %v2672_v63 = vadd.f32 1.0, %v5633_v29  ;;  %v2999_v29 = vld [vmem:[#allocation16 + $0x10] sm:$0xff] }
0x3332   :  { %5634 = vrcp.f32 %v2672_v63  ;;  %v3000_v63 = vld [vmem:[#allocation16 + $0x18] sm:$0xff] }
0x333c   :  { %v5635_v22 = vpop.eup %5634 }
0x333d   :  { %v2676_v62 = vmul.f32 %v5635_v22, %v2586_v21 }
0x33a0   :  { %v2679_v20 = vpop.permute.xlu0 %2678 }
0x33a1   :  { %v2681_v36 = vmul.f32 %v5635_v22, %v2679_v20 }
0x33a3   :  { %2683 = vrot.lane.b32.xlu1 %v2681_v36, %s6045_s3 }
0x3415   :  { %v2684_v37 = vpop.permute.xlu1 %2683 }
0x3416   :  { %v2686_v26 = vadd.f32 %v2684_v37, %v2676_v62  ;;  %v2195_v37 = vadd.f32 %v6731_v40, %v6702_v52 }
0x3418   :  { %5636 = vtanh.f32 %v2686_v26 }
0x3422   :  { %v5637_v38 = vpop.eup %5636 }
0x3423   :  { %2689 = vrot.lane.b32.xlu0 %v5637_v38, %s6044_s29 }
0x3495   :  { %v2690_v30 = vpop.permute.xlu0 %2689 }
0x3496   :  { %v2692_v43 = vmul.f32 %v5635_v22, %v2690_v30  ;;  %v6831_v22 = vpack.c.bf16 %v3000_v63, %v2999_v29 }
0x3498   :  { %2694 = vrot.lane.b32.xlu1 %v2692_v43, %s6045_s3  ;;  %v6853_v43 = vld [vmem:[#allocation17] ss:$0 sm:$0xff] }
0x350a   :  { %v2695_v44 = vpop.permute.xlu1 %2694 }
0x350b   :  { %4982 = vmatmul.mubr.msk.f32.vlgmr.msra.gmra.mrb[26].mxu1 %vm354_vm2, %v2695_v44 }
0x350c   :  { %5320 = vmatpush3.bf16.msra.mxu1 %v6676_v39  ;;  %5003 = vmatprep.mubr.msk.f32.mxu1 %vm6042_vm0, %v6043_v1 }
0x350d   :  { %5321 = vmatprep.subr.bf16.mxu1 %v6041_v0 }
0x3510   :  { %5323 = vmatpush3.bf16.msra.mxu1 %v6680_v42 }
0x3511   :  { %5332 = vmatprep.subr.bf16.mxu1 %v6041_v0 }
0x35de   :  { %v2764_v46 = vpop.f32.mrb[26].mxu1 }
0x35df   :  { %v2768_v51 = vadd.f32 %v2764_v46, %v2185_v35  ;;  %v4983_v53 = vpop.f32.mrb[27].mxu1 }
0x35e1   :  { %5638 = vtanh.f32 %v2768_v51  ;;  %v4391_v39 = vmul.f32 -1.442695, %v2768_v51 }
0x35e3   :  { %5640 = vpow2.f32 %v4391_v39 }
0x35eb   :  { %v5639_v55 = vpop.eup %5638 }
0x35ec   :  { %2778 = vrot.lane.b32.xlu0 %v5639_v55, %s6044_s29 }
0x35ed   :  { %v5641_v56 = vpop.eup %5640 }
0x35ee   :  { %v2772_v57 = vadd.f32 1.0, %v5641_v56 }
0x35f0   :  { %5642 = vrcp.f32 %v2772_v57 }
0x35fa   :  { %v5643_v60 = vpop.eup %5642 }
0x35fb   :  { %v2776_v47 = vmul.f32 %v5643_v60, %v2686_v26 }
0x365e   :  { %v2779_v2 = vpop.permute.xlu0 %2778 }
0x365f   :  { %v2781_v42 = vmul.f32 %v5643_v60, %v2779_v2 }
0x3661   :  { %2783 = vrot.lane.b32.xlu1 %v2781_v42, %s6045_s3 }
0x36d3   :  { %v2784_v3 = vpop.permute.xlu1 %2783 }
0x36d4   :  { %v2786_v25 = vadd.f32 %v2784_v3, %v2776_v47 }
0x36d6   :  { %5644 = vtanh.f32 %v2786_v25 }
0x36e0   :  { %v5645_v4 = vpop.eup %5644 }
0x36e1   :  { %2789 = vrot.lane.b32.xlu0 %v5645_v4, %s6044_s29 }
0x3753   :  { %v2790_v5 = vpop.permute.xlu0 %2789 }
0x3754   :  { %v2792_v6 = vmul.f32 %v5643_v60, %v2790_v5 }
0x3756   :  { %2794 = vrot.lane.b32.xlu1 %v2792_v6, %s6045_s3 }
0x37c8   :  { %v2795_v13 = vpop.permute.xlu1 %2794 }
0x37c9   :  { %4993 = vmatmul.mubr.msk.f32.vlgmr.msra.gmra.mrb[40].mxu0 %vm354_vm2, %v2795_v13 }
0x37ca   :  { %5327 = vmatpush3.bf16.msra.mxu0 %v5324_v23  ;;  %5014 = vmatprep.mubr.msk.f32.mxu0 %vm354_vm2, %v6711_v15  ;;  %v2190_v15 = vadd.f32 %v6702_v52, %v6733_v41 }
0x37cb   :  { %5329 = vmatprep.subr.bf16.mxu0 %v5328_v34 }
0x37ce   :  { %5331 = vmatpush3.bf16.msra.mxu0 %v5328_v34 }
0x37cf   :  { %5344 = vmatprep.subr.bf16.mxu0 %v6041_v0 }
0x37d1   :  { %5015 = vmatmul.mubr.msk.f32.vlgmr.msra.gmra.mrb[42].mxu0 %vm354_vm2, %v6737_v45 }
0x37d2   :  { %5017 = vmatprep.mubr.msk.f32.mxu0 %vm354_vm2, %v6753_v50  ;;  %5346 = vmatpush3.bf16.msra.mxu0 %v6827_v28 }
0x37d3   :  { %5347 = vmatprep.subr.bf16.mxu0 %v6041_v0 }
0x37d5   :  { %5018 = vmatmul.mubr.msk.f32.gmra.mrb[44].mxu0 %vm354_vm2, %v6769_v54 }
0x37d6   :  { %5020 = vmatprep.mubr.msk.f32.mxu0 %vm354_vm2, %v2695_v44  ;;  %5349 = vmatpush3.bf16.msra.mxu0 %v6831_v22 }
0x37d7   :  { %5356 = vmatprep.subr.bf16.mxu0 %v6041_v0 }
0x37d9   :  { %5021 = vmatmul.mubr.msk.f32.gmra.mrb[46].mxu0 %vm354_vm2, %v2795_v13 }
0x389c   :  { %v2864_v61 = vpop.f32.mrb[40].mxu0 }
0x389d   :  { %v2868_v32 = vadd.f32 %v2864_v61, %v2190_v15  ;;  %v4994_v9 = vpop.f32.mrb[41].mxu0 }
0x389f   :  { %5646 = vtanh.f32 %v2868_v32  ;;  %v4393_v24 = vmul.f32 -1.442695, %v2868_v32 }
0x38a1   :  { %5648 = vpow2.f32 %v4393_v24 }
0x38a4   :  { %v6811_v10 = vpop.f32.mrb[42].mxu0 }
0x38a5   :  { %v3079_v45 = vpop.f32.mrb[43].mxu0 }
0x38a6   :  { %v3080_v44 = vadd.f32 %v6853_v43, %v3079_v45  ;;  %v3085_v45 = vadd.f32 %v6811_v10, %v6853_v43 }
0x38a8   :  { %v6813_v11 = vpop.f32.mrb[44].mxu0 }
0x38a9   :  { %v5647_v50 = vpop.eup %5646  ;;  %v6815_v14 = vpop.f32.mrb[45].mxu0 }
0x38aa   :  { %2878 = vrot.lane.b32.xlu0 %v5647_v50, %s6044_s29 }
0x38ab   :  { %v5649_v41 = vpop.eup %5648 }
0x38ac   :  { %v6818_v59 = vpop.f32.mrb[46].mxu0  ;;  %v2872_v21 = vadd.f32 1.0, %v5649_v41 }
0x38ad   :  { %v6820_v16 = vpop.f32.mrb[47].mxu0 }
0x38ae   :  { %5650 = vrcp.f32 %v2872_v21 }
0x38b8   :  { %v5651_v17 = vpop.eup %5650 }
0x38b9   :  { %v2876_v54 = vmul.f32 %v5651_v17, %v2786_v25 }
0x391c   :  { %v2879_v18 = vpop.permute.xlu0 %2878 }
0x391d   :  { %v2881_v19 = vmul.f32 %v5651_v17, %v2879_v18 }
0x391f   :  { %2883 = vrot.lane.b32.xlu1 %v2881_v19, %s6045_s3 }
0x3991   :  { %v2884_v12 = vpop.permute.xlu1 %2883 }
0x3992   :  { %v6823_v33 = vadd.f32 %v2884_v12, %v2876_v54 }
0x3994   :  { %5652 = vtanh.f32 %v6823_v33 }
0x399e   :  { %v5653_v49 = vpop.eup %5652 }
0x399f   :  { %2889 = vrot.lane.b32.xlu0 %v5653_v49, %s6044_s29 }
0x3a11   :  { %v2890_v20 = vpop.permute.xlu0 %2889 }
0x3a12   :  { %v2892_v36 = vmul.f32 %v5651_v17, %v2890_v20 }
0x3a14   :  { %2894 = vrot.lane.b32.xlu1 %v2892_v36, %s6045_s3 }
0x3a86   :  { %v2895_v62 = vpop.permute.xlu1 %2894 }
0x3a87   :  { %5004 = vmatmul.mubr.msk.f32.vlgmr.msra.gmra.mrb[28].mxu1 %vm354_vm2, %v2895_v62  ;;  %5023 = vmatprep.mubr.msk.f32.mxu0 %vm354_vm2, %v2895_v62 }
0x3a88   :  { %5334 = vmatpush3.bf16.msra.mxu1 %v6827_v28  ;;  %5034 = vmatprep.mubr.msk.f32.mxu1 %vm6042_vm0, %v6043_v1 }
0x3a89   :  { %5335 = vmatprep.subr.bf16.mxu1 %v6041_v0 }
0x3a8c   :  { %5337 = vmatpush3.bf16.msra.mxu1 %v6831_v22 }
0x3a8d   :  { %5338 = vmatprep.subr.bf16.mxu1 %v6041_v0 }
0x3a8f   :  { %5035 = vmatmul.mubr.f32.vlgmr.msra.gmra.mrb[30].mxu1 %v6043_v1 }
0x3a90   :  { %5340 = vmatpush3.bf16.msra.mxu1 %v6827_v28  ;;  %5045 = vmatprep.mubr.msk.f32.mxu1 %vm6042_vm0, %v6043_v1 }
0x3a91   :  { %5341 = vmatprep.subr.bf16.mxu1 %v6041_v0 }
0x3a94   :  { %5343 = vmatpush3.bf16.msra.mxu1 %v6831_v22 }
0x3a95   :  { %5350 = vmatprep.subr.bf16.mxu1 %v6041_v0 }
0x3b5a   :  { %v2964_v26 = vpop.f32.mrb[28].mxu1 }
0x3b5b   :  { %v2968_v38 = vadd.f32 %v2964_v26, %v2195_v37  ;;  %v5005_v30 = vpop.f32.mrb[29].mxu1  ;;  %v3090_v26 = vadd.f32 %v6853_v43, %v6815_v14 }
0x3b5d   :  { %v4395_v25 = vmul.f32 -1.442695, %v2968_v38 }
0x3b62   :  { %v3184_v35 = vpop.f32.mrb[30].mxu1 }
0x3b63   :  { %v3188_v46 = vadd.f32 %v3184_v35, %v3080_v44  ;;  %v5036_v51 = vpop.f32.mrb[31].mxu1 }
0x3b65   :  { %5654 = vtanh.f32 %v3188_v46  ;;  %v4405_v55 = vmul.f32 -1.442695, %v3188_v46 }
0x3b67   :  { %5656 = vpow2.f32 %v4405_v55 }
0x3b6f   :  { %v5655_v53 = vpop.eup %5654 }
0x3b70   :  { %3198 = vrot.lane.b32.xlu0 %v5655_v53, %s6044_s29 }
0x3b71   :  { %v5657_v39 = vpop.eup %5656 }
0x3b72   :  { %v3192_v56 = vadd.f32 1.0, %v5657_v39 }
0x3b74   :  { %5658 = vrcp.f32 %v3192_v56 }
0x3b7e   :  { %v5659_v52 = vpop.eup %5658 }
0x3b7f   :  { %v3196_v60 = vmul.f32 0.0, %v5659_v52 }
0x3be2   :  { %v3199_v40 = vpop.permute.xlu0 %3198 }
0x3be3   :  { %v3201_v57 = vmul.f32 %v5659_v52, %v3199_v40 }
0x3be5   :  { %3203 = vrot.lane.b32.xlu1 %v3201_v57, %s6045_s3 }
0x3c57   :  { %v3204_v2 = vpop.permute.xlu1 %3203 }
0x3c58   :  { %v3206_v42 = vadd.f32 %v3204_v2, %v3196_v60 }
0x3c5a   :  { %5660 = vtanh.f32 %v3206_v42 }
0x3c5b   :  { %5662 = vtanh.f32 %v2968_v38 }
0x3c5c   :  { %5664 = vpow2.f32 %v4395_v25 }
0x3c64   :  { %v5661_v47 = vpop.eup %5660 }
0x3c65   :  { %3209 = vrot.lane.b32.xlu0 %v5661_v47, %s6044_s29  ;;  %v5663_v3 = vpop.eup %5662  ;;  %v3095_v47 = vadd.f32 %v6813_v11, %v6853_v43 }
0x3c66   :  { %v5665_v58 = vpop.eup %5664 }
0x3c67   :  { %v2972_v48 = vadd.f32 1.0, %v5665_v58 }
0x3c69   :  { %2978 = vrot.lane.b32.xlu0 %v5663_v3, %s6044_s29  ;;  %5666 = vrcp.f32 %v2972_v48 }
0x3c73   :  { %v5667_v5 = vpop.eup %5666 }
0x3c74   :  { %v2976_v34 = vmul.f32 %v5667_v5, %v6823_v33 }
0x3cd7   :  { %v3210_v23 = vpop.permute.xlu0 %3209 }
0x3cd8   :  { %v3212_v4 = vmul.f32 %v5659_v52, %v3210_v23 }
0x3cda   :  { %3214 = vrot.lane.b32.xlu1 %v3212_v4, %s6045_s3 }
0x3cdb   :  { %v2979_v6 = vpop.permute.xlu0 %2978 }
0x3cdc   :  { %v2981_v8 = vmul.f32 %v5667_v5, %v2979_v6 }
0x3cde   :  { %2983 = vrot.lane.b32.xlu0 %v2981_v8, %s6045_s3 }
0x3d4c   :  { %v3215_v7 = vpop.permute.xlu1 %3214 }
0x3d4d   :  { %5046 = vmatmul.mubr.msk.f32.vlgmr.msra.gmra.mrb[32].mxu1 %vm354_vm2, %v3215_v7 }
0x3d4e   :  { %5352 = vmatpush3.bf16.msra.mxu1 %v6827_v28  ;;  %5067 = vmatprep.mubr.msk.f32.mxu1 %vm6042_vm0, %v6043_v1 }
0x3d4f   :  { %5353 = vmatprep.subr.bf16.mxu1 %v6041_v0 }
0x3d50   :  { %v2984_v13 = vpop.permute.xlu0 %2983 }
0x3d51   :  { %v2986_v15 = vadd.f32 %v2984_v13, %v2976_v34 }
0x3d52   :  { %5355 = vmatpush3.bf16.msra.mxu1 %v6831_v22 }
0x3d53   :  { %5668 = vtanh.f32 %v2986_v15  ;;  %5362 = vmatprep.subr.bf16.mxu1 %v6041_v0 }
0x3d5d   :  { %v5669_v61 = vpop.eup %5668 }
0x3d5e   :  { %2989 = vrot.lane.b32.xlu0 %v5669_v61, %s6044_s29 }
0x3dd0   :  { %v2990_v32 = vpop.permute.xlu0 %2989 }
0x3dd1   :  { %v2992_v9 = vmul.f32 %v5667_v5, %v2990_v32 }
0x3dd3   :  { %3009 = vrot.lane.b32.xlu0 %v2992_v9, %s6045_s3 }
0x3e20   :  { %v3284_v50 = vpop.f32.mrb[32].mxu1 }
0x3e21   :  { %v3288_v24 = vadd.f32 %v3284_v50, %v3085_v45  ;;  %v5047_v41 = vpop.f32.mrb[33].mxu1  ;;  %v3100_v45 = vadd.f32 %v6853_v43, %v6820_v16 }
0x3e23   :  { %5670 = vtanh.f32 %v3288_v24  ;;  %v4407_v18 = vmul.f32 -1.442695, %v3288_v24 }
0x3e25   :  { %5672 = vpow2.f32 %v4407_v18 }
0x3e2d   :  { %v5671_v21 = vpop.eup %5670 }
0x3e2e   :  { %3298 = vrot.lane.b32.xlu1 %v5671_v21, %s6044_s29 }
0x3e2f   :  { %v5673_v19 = vpop.eup %5672 }
0x3e30   :  { %v3292_v54 = vadd.f32 1.0, %v5673_v19 }
0x3e32   :  { %5674 = vrcp.f32 %v3292_v54 }
0x3e3c   :  { %v5675_v12 = vpop.eup %5674 }
0x3e3d   :  { %v3296_v49 = vmul.f32 %v5675_v12, %v3206_v42 }
0x3e45   :  { %v3010_v17 = vpop.permute.xlu0 %3009 }
0x3e46   :  { %5024 = vmatmul.mubr.msk.f32.gmra.mrb[48].mxu0 %vm354_vm2, %v3010_v17 }
0x3e47   :  { %5056 = vmatprep.mubr.msk.f32.mxu0 %vm6042_vm0, %v6043_v1 }
0x3ea0   :  { %v3299_v10 = vpop.permute.xlu1 %3298 }
0x3ea1   :  { %v3301_v33 = vmul.f32 %v5675_v12, %v3299_v10 }
0x3ea3   :  { %3303 = vrot.lane.b32.xlu1 %v3301_v33, %s6045_s3 }
0x3f15   :  { %v3304_v31 = vpop.permute.xlu1 %3303 }
0x3f16   :  { %v3306_v27 = vadd.f32 %v3304_v31, %v3296_v49 }
0x3f18   :  { %5676 = vtanh.f32 %v3306_v27 }
0x3f19   :  { %v6879_v29 = vpop.f32.mrb[48].mxu0 }
0x3f1a   :  { %v6881_v63 = vpop.f32.mrb[49].mxu0 }
0x3f22   :  { %v5677_v20 = vpop.eup %5676 }
0x3f23   :  { %3309 = vrot.lane.b32.xlu1 %v5677_v20, %s6044_s29 }
0x3f95   :  { %v3310_v36 = vpop.permute.xlu1 %3309 }
0x3f96   :  { %v3312_v62 = vmul.f32 %v5675_v12, %v3310_v36 }
0x3f98   :  { %3314 = vrot.lane.b32.xlu1 %v3312_v62, %s6045_s3  ;;  %v3105_v62 = vadd.f32 %v6818_v59, %v6853_v43 }
0x400a   :  { %v3315_v37 = vpop.permute.xlu1 %3314 }
0x400b   :  { %5057 = vmatmul.mubr.msk.f32.vlgmr.msra.gmra.mrb[50].mxu0 %vm354_vm2, %v3315_v37 }
0x400c   :  { %5358 = vmatpush3.bf16.msra.mxu0 %v6827_v28  ;;  %5078 = vmatprep.mubr.msk.f32.mxu0 %vm6042_vm0, %v6043_v1 }
0x400d   :  { %5359 = vmatprep.subr.bf16.mxu0 %v6041_v0 }
0x4010   :  { %5361 = vmatpush3.bf16.msra.mxu0 %v6831_v22 }
0x4011   :  { %5368 = vmatprep.subr.bf16.mxu0 %v6041_v0 }
0x40de   :  { %v3384_v38 = vpop.f32.mrb[50].mxu0 }
0x40df   :  { %v3388_v30 = vadd.f32 %v3384_v38, %v3090_v26  ;;  %v5058_v44 = vpop.f32.mrb[51].mxu0 }
0x40e1   :  { %5678 = vtanh.f32 %v3388_v30  ;;  %v4409_v46 = vmul.f32 -1.442695, %v3388_v30 }
0x40e3   :  { %5680 = vpow2.f32 %v4409_v46 }
0x40eb   :  { %v5679_v35 = vpop.eup %5678 }
0x40ec   :  { %3398 = vrot.lane.b32.xlu0 %v5679_v35, %s6044_s29 }
0x40ed   :  { %v5681_v51 = vpop.eup %5680 }
0x40ee   :  { %v3392_v53 = vadd.f32 1.0, %v5681_v51 }
0x40f0   :  { %5682 = vrcp.f32 %v3392_v53 }
0x40fa   :  { %v5683_v55 = vpop.eup %5682 }
0x40fb   :  { %v3396_v52 = vmul.f32 %v5683_v55, %v3306_v27 }
0x415e   :  { %v3399_v39 = vpop.permute.xlu0 %3398 }
0x415f   :  { %v3401_v56 = vmul.f32 %v5683_v55, %v3399_v39 }
0x4161   :  { %3403 = vrot.lane.b32.xlu1 %v3401_v56, %s6045_s3 }
0x41d3   :  { %v3404_v40 = vpop.permute.xlu1 %3403 }
0x41d4   :  { %v3406_v14 = vadd.f32 %v3404_v40, %v3396_v52 }
0x41d6   :  { %5684 = vtanh.f32 %v3406_v14 }
0x41e0   :  { %v5685_v57 = vpop.eup %5684 }
0x41e1   :  { %3409 = vrot.lane.b32.xlu0 %v5685_v57, %s6044_s29 }
0x4253   :  { %v3410_v60 = vpop.permute.xlu0 %3409 }
0x4254   :  { %v3412_v2 = vmul.f32 %v5683_v55, %v3410_v60 }
0x4256   :  { %3414 = vrot.lane.b32.xlu1 %v3412_v2, %s6045_s3 }
0x42c8   :  { %v3415_v42 = vpop.permute.xlu1 %3414 }
0x42c9   :  { %5068 = vmatmul.mubr.msk.f32.vlgmr.msra.gmra.mrb[34].mxu1 %vm354_vm2, %v3415_v42 }
0x42ca   :  { %5364 = vmatpush3.bf16.msra.mxu1 %v6827_v28  ;;  %5089 = vmatprep.mubr.msk.f32.mxu1 %vm6042_vm0, %v6043_v1 }
0x42cb   :  { %5365 = vmatprep.subr.bf16.mxu1 %v6041_v0 }
0x42ce   :  { %5367 = vmatpush3.bf16.msra.mxu1 %v6831_v22 }
0x42cf   :  { %5374 = vmatprep.subr.bf16.mxu1 %v6041_v0 }
0x439c   :  { %v3484_v3 = vpop.f32.mrb[34].mxu1 }
0x439d   :  { %v3488_v25 = vadd.f32 %v3484_v3, %v3095_v47  ;;  %v5069_v58 = vpop.f32.mrb[35].mxu1 }
0x439f   :  { %5686 = vtanh.f32 %v3488_v25  ;;  %v4411_v23 = vmul.f32 -1.442695, %v3488_v25 }
0x43a1   :  { %5688 = vpow2.f32 %v4411_v23 }
0x43a9   :  { %v5687_v48 = vpop.eup %5686 }
0x43aa   :  { %3498 = vrot.lane.b32.xlu0 %v5687_v48, %s6044_s29 }
0x43ab   :  { %v5689_v4 = vpop.eup %5688 }
0x43ac   :  { %v3492_v5 = vadd.f32 1.0, %v5689_v4 }
0x43ae   :  { %5690 = vrcp.f32 %v3492_v5 }
0x43b8   :  { %v5691_v6 = vpop.eup %5690 }
0x43b9   :  { %v3496_v34 = vmul.f32 %v5691_v6, %v3406_v14  ;;  %v3110_v14 = vadd.f32 %v6853_v43, %v6881_v63 }
0x441c   :  { %v3499_v8 = vpop.permute.xlu0 %3498 }
0x441d   :  { %v3501_v7 = vmul.f32 %v5691_v6, %v3499_v8 }
0x441f   :  { %3503 = vrot.lane.b32.xlu1 %v3501_v7, %s6045_s3 }
0x4491   :  { %v3504_v13 = vpop.permute.xlu1 %3503 }
0x4492   :  { %v3506_v11 = vadd.f32 %v3504_v13, %v3496_v34  ;;  %v3115_v13 = vadd.f32 %v6879_v29, %v6853_v43  ;;  %v3914_v29 = vld [vmem:[%s7045_s13 + $0x8] sm:$0xff] }
0x4494   :  { %5692 = vtanh.f32 %v3506_v11 }
0x449e   :  { %v5693_v15 = vpop.eup %5692 }
0x449f   :  { %3509 = vrot.lane.b32.xlu0 %v5693_v15, %s6044_s29 }
0x4511   :  { %v3510_v61 = vpop.permute.xlu0 %3509 }
0x4512   :  { %v3512_v32 = vmul.f32 %v5691_v6, %v3510_v61 }
0x4514   :  { %3514 = vrot.lane.b32.xlu1 %v3512_v32, %s6045_s3 }
0x4586   :  { %v3515_v9 = vpop.permute.xlu1 %3514 }
0x4587   :  { %5079 = vmatmul.mubr.msk.f32.vlgmr.msra.gmra.mrb[52].mxu0 %vm354_vm2, %v3515_v9 }
0x4588   :  { %5370 = vmatpush3.bf16.msra.mxu0 %v6827_v28  ;;  %5100 = vmatprep.mubr.msk.f32.mxu0 %vm6042_vm0, %v6043_v1 }
0x4589   :  { %5371 = vmatprep.subr.bf16.mxu0 %v6041_v0 }
0x458c   :  { %5373 = vmatpush3.bf16.msra.mxu0 %v6831_v22 }
0x465a   :  { %v3584_v50 = vpop.f32.mrb[52].mxu0 }
0x465b   :  { %v3588_v24 = vadd.f32 %v3584_v50, %v3100_v45  ;;  %v5080_v41 = vpop.f32.mrb[53].mxu0 }
0x465d   :  { %5694 = vtanh.f32 %v3588_v24  ;;  %v4413_v17 = vmul.f32 -1.442695, %v3588_v24 }
0x465f   :  { %5696 = vpow2.f32 %v4413_v17 }
0x4667   :  { %v5695_v21 = vpop.eup %5694 }
0x4668   :  { %3598 = vrot.lane.b32.xlu0 %v5695_v21, %s6044_s29 }
0x4669   :  { %v5697_v18 = vpop.eup %5696 }
0x466a   :  { %v3592_v19 = vadd.f32 1.0, %v5697_v18 }
0x466c   :  { %5698 = vrcp.f32 %v3592_v19  ;;  %v3917_v19 = vld [vmem:[%s7045_s13 + $0x20] sm:$0xff] }
0x4676   :  { %v5699_v54 = vpop.eup %5698 }
0x4677   :  { %v3596_v33 = vmul.f32 %v5699_v54, %v3506_v11 }
0x46da   :  { %v3599_v12 = vpop.permute.xlu0 %3598 }
0x46db   :  { %v3601_v10 = vmul.f32 %v5699_v54, %v3599_v12  ;;  %v5380_v12 = vpack.c.bf16 %v3917_v19, %v3914_v29  ;;  %v4096_v29 = vld [vmem:[#allocation19 + $0x40] sm:$0xff]  ;;  %v4097_v19 = vld [vmem:[#allocation19 + $0x48] sm:$0xff] }
0x46dd   :  { %3603 = vrot.lane.b32.xlu1 %v3601_v10, %s6045_s3  ;;  %v3916_v10 = vld [vmem:[%s7045_s13 + $0x18] sm:$0xff]  ;;  %5381 = vmatprep.subr.bf16.mxu0 %v5380_v12  ;;  %v4115_v12 = vld [vmem:[#allocation19 + $0xd8] sm:$0xff] }
0x474f   :  { %v3604_v49 = vpop.permute.xlu1 %3603 }
0x4750   :  { %v3606_v16 = vadd.f32 %v3604_v49, %v3596_v33  ;;  %v3915_v33 = vld [vmem:[%s7045_s13 + $0x10] sm:$0xff]  ;;  %v3918_v49 = vld [vmem:[%s7045_s13 + $0x28] sm:$0xff] }
0x4752   :  { %5700 = vtanh.f32 %v3606_v16 }
0x475c   :  { %v5701_v31 = vpop.eup %5700 }
0x475d   :  { %3609 = vrot.lane.b32.xlu0 %v5701_v31, %s6044_s29  ;;  %v5389_v31 = vpack.c.bf16 %v3918_v49, %v3915_v33  ;;  %v5412_v33 = vpack.c.bf16 %v4097_v19, %v4096_v29  ;;  %v4130_v49 = vld [vmem:[#allocation19 + $0x150] sm:$0xff] }
0x47cf   :  { %v3610_v27 = vpop.permute.xlu0 %3609 }
0x47d0   :  { %v3612_v20 = vmul.f32 %v5699_v54, %v3610_v27  ;;  %v3913_v54 = vld [vmem:[%s7045_s13] sm:$0xff]  ;;  %v3920_v27 = vld [vmem:[%s7045_s13 + $0x38] sm:$0xff] }
0x47d2   :  { %3614 = vrot.lane.b32.xlu1 %v3612_v20, %s6045_s3  ;;  %v3923_v20 = vld [vmem:[%s7045_s13 + $0x50] sm:$0xff] }
0x4844   :  { %v3615_v36 = vpop.permute.xlu1 %3614 }
0x4845   :  { %5090 = vmatmul.mubr.msk.f32.vlgmr.msra.gmra.mrb[36].mxu1 %vm354_vm2, %v3615_v36  ;;  %v3919_v36 = vld [vmem:[%s7045_s13 + $0x30] sm:$0xff] }
0x4846   :  { %5376 = vmatpush3.bf16.msra.mxu1 %v6827_v28  ;;  %5111 = vmatprep.mubr.msk.f32.mxu1 %vm6042_vm0, %v6043_v1 }
0x4847   :  { %5377 = vmatprep.subr.bf16.mxu1 %v6041_v0 }
0x484a   :  { %5379 = vmatpush3.bf16.msra.mxu1 %v6831_v22 }
0x484b   :  { %5388 = vmatprep.subr.bf16.mxu1 %v6041_v0 }
0x4918   :  { %v3684_v37 = vpop.f32.mrb[36].mxu1 }
0x4919   :  { %v3688_v26 = vadd.f32 %v3684_v37, %v3105_v62  ;;  %v5091_v38 = vpop.f32.mrb[37].mxu1  ;;  %v5384_v62 = vpack.c.bf16 %v3923_v20, %v3920_v27  ;;  %v3922_v37 = vld [vmem:[%s7045_s13 + $0x48] sm:$0xff] }
0x491a   :  { %v3924_v38 = vld [vmem:[%s7045_s13 + $0x58] sm:$0xff]  ;;  %v4098_v27 = vld [vmem:[#allocation19 + $0x50] sm:$0xff]  ;;  %v4099_v20 = vld [vmem:[#allocation19 + $0x58] sm:$0xff] }
0x491b   :  { %5702 = vtanh.f32 %v3688_v26  ;;  %v4415_v28 = vmul.f32 -1.442695, %v3688_v26  ;;  %v3921_v26 = vld [vmem:[%s7045_s13 + $0x40] sm:$0xff] }
0x491d   :  { %5704 = vpow2.f32 %v4415_v28  ;;  %v5392_v28 = vpack.c.bf16 %v3924_v38, %v3921_v26  ;;  %v5416_v26 = vpack.c.bf16 %v4099_v20, %v4098_v27  ;;  %v4132_v38 = vld [vmem:[#allocation19 + $0x160] sm:$0xff] }
0x4925   :  { %v5703_v30 = vpop.eup %5702 }
0x4926   :  { %3698 = vrot.lane.b32.xlu0 %v5703_v30, %s6044_s29  ;;  %v5386_v30 = vpack.c.bf16 %v3922_v37, %v3919_v36  ;;  %v4116_v36 = vld [vmem:[#allocation19 + $0xe0] sm:$0xff] }
0x4927   :  { %v5705_v44 = vpop.eup %5704 }
0x4928   :  { %v3692_v35 = vadd.f32 1.0, %v5705_v44 }
0x492a   :  { %5706 = vrcp.f32 %v3692_v35  ;;  %v4104_v35 = vld [vmem:[#allocation19 + $0x80] sm:$0xff] }
0x4934   :  { %v5707_v46 = vpop.eup %5706 }
0x4935   :  { %v3696_v53 = vmul.f32 %v5707_v46, %v3606_v16  ;;  %v5382_v16 = vpack.c.bf16 %v3916_v10, %v3913_v54  ;;  %v4114_v54 = vld [vmem:[#allocation19 + $0xd0] sm:$0xff] }
0x4998   :  { %v3699_v51 = vpop.permute.xlu0 %3698 }
0x4999   :  { %v3701_v22 = vmul.f32 %v5707_v46, %v3699_v51 }
0x499b   :  { %3703 = vrot.lane.b32.xlu1 %v3701_v22, %s6045_s3 }
0x4a0d   :  { %v3704_v55 = vpop.permute.xlu1 %3703 }
0x4a0e   :  { %v3706_v59 = vadd.f32 %v3704_v55, %v3696_v53  ;;  %v4120_v55 = vld [vmem:[#allocation19 + $0x100] sm:$0xff] }
0x4a10   :  { %5708 = vtanh.f32 %v3706_v59 }
0x4a1a   :  { %v5709_v39 = vpop.eup %5708 }
0x4a1b   :  { %3709 = vrot.lane.b32.xlu0 %v5709_v39, %s6044_s29  ;;  %v4088_v39 = vld [vmem:[#allocation19] sm:$0xff] }
0x4a8d   :  { %v3710_v56 = vpop.permute.xlu0 %3709 }
0x4a8e   :  { %v3712_v52 = vmul.f32 %v5707_v46, %v3710_v56  ;;  %v4105_v46 = vld [vmem:[#allocation19 + $0x88] sm:$0xff] }
0x4a8f   :  { %v5394_v51 = vpack.c.bf16 %v4105_v46, %v4104_v35  ;;  %v4089_v56 = vld [vmem:[#allocation19 + $0x8] sm:$0xff] }
0x4a90   :  { %3714 = vrot.lane.b32.xlu1 %v3712_v52, %s6045_s3  ;;  %v4106_v52 = vld [vmem:[#allocation19 + $0x90] sm:$0xff]  ;;  %v4101_v35 = vld [vmem:[#allocation19 + $0x68] sm:$0xff] }
0x4b02   :  { %v3715_v40 = vpop.permute.xlu1 %3714 }
0x4b03   :  { %5101 = vmatmul.mubr.msk.f32.vlgmr.msra.gmra.mrb[54].mxu0 %vm354_vm2, %v3715_v40  ;;  %v4107_v40 = vld [vmem:[#allocation19 + $0x98] sm:$0xff] }
0x4b04   :  { %4011 = vmatprep.mubr.f32.mxu0 %v6043_v1  ;;  %5383 = vmatpush1.bf16.msra.mxu0 %v5382_v16  ;;  %v4131_v16 = vld [vmem:[#allocation19 + $0x158] sm:$0xff] }
0x4b05   :  { %5385 = vmatprep.subr.bf16.mxu0 %v5384_v62  ;;  %v4117_v62 = vld [vmem:[#allocation19 + $0xe8] sm:$0xff]  ;;  %v5442_v37 = vpack.c.bf16 %v4131_v16, %v4130_v49 }
0x4b08   :  { %5387 = vmatpush1.bf16.msra.mxu0 %v5386_v30  ;;  %v4133_v30 = vld [vmem:[#allocation19 + $0x168] sm:$0xff] }
0x4b09   :  { %5395 = vmatprep.subr.bf16.mxu0 %v5394_v51  ;;  %v5445_v46 = vpack.c.bf16 %v4133_v30, %v4132_v38 }
0x4bd6   :  { %v3784_v57 = vpop.f32.mrb[54].mxu0 }
0x4bd7   :  { %v3788_v60 = vadd.f32 %v3784_v57, %v3110_v14  ;;  %v5102_v2 = vpop.f32.mrb[55].mxu0  ;;  %v5396_v57 = vpack.c.bf16 %v4089_v56, %v4088_v39  ;;  %v4119_v39 = vld [vmem:[#allocation19 + $0xf8] sm:$0xff] }
0x4bd8   :  { %v4123_v2 = vld [vmem:[#allocation19 + $0x118] sm:$0xff] }
0x4bd9   :  { %5710 = vtanh.f32 %v3788_v60  ;;  %v4417_v47 = vmul.f32 -1.442695, %v3788_v60  ;;  %v4122_v60 = vld [vmem:[#allocation19 + $0x110] sm:$0xff] }
0x4bdb   :  { %5712 = vpow2.f32 %v4417_v47  ;;  %v4090_v47 = vld [vmem:[#allocation19 + $0x10] sm:$0xff] }
0x4be3   :  { %v5711_v42 = vpop.eup %5710 }
0x4be4   :  { %3798 = vrot.lane.b32.xlu0 %v5711_v42, %s6044_s29  ;;  %v5398_v42 = vpack.c.bf16 %v4107_v40, %v4106_v52  ;;  %v4102_v52 = vld [vmem:[#allocation19 + $0x70] sm:$0xff]  ;;  %v4103_v40 = vld [vmem:[#allocation19 + $0x78] sm:$0xff] }
0x4be5   :  { %v5713_v3 = vpop.eup %5712 }
0x4be6   :  { %v3792_v25 = vadd.f32 1.0, %v5713_v3  ;;  %v4091_v3 = vld [vmem:[#allocation19 + $0x18] sm:$0xff] }
0x4be8   :  { %5714 = vrcp.f32 %v3792_v25 }
0x4bf2   :  { %v5715_v58 = vpop.eup %5714 }
0x4bf3   :  { %v3796_v4 = vmul.f32 %v5715_v58, %v3706_v59  ;;  %v4121_v59 = vld [vmem:[#allocation19 + $0x108] sm:$0xff] }
0x4bf4   :  { %v5427_v14 = vpack.c.bf16 %v4121_v59, %v4120_v55  ;;  %v4118_v59 = vld [vmem:[#allocation19 + $0xf0] sm:$0xff] }
0x4bf5   :  { %v5422_v56 = vpack.c.bf16 %v4119_v39, %v4118_v59 }
0x4c56   :  { %v3799_v48 = vpop.permute.xlu0 %3798 }
0x4c57   :  { %v3801_v23 = vmul.f32 %v5715_v58, %v3799_v48  ;;  %v4109_v48 = vld [vmem:[#allocation19 + $0xa8] sm:$0xff] }
0x4c59   :  { %3803 = vrot.lane.b32.xlu1 %v3801_v23, %s6045_s3  ;;  %v5430_v23 = vpack.c.bf16 %v4123_v2, %v4122_v60 }
0x4ccb   :  { %v3804_v5 = vpop.permute.xlu1 %3803 }
0x4ccc   :  { %v3806_v63 = vadd.f32 %v3804_v5, %v3796_v4  ;;  %v5400_v4 = vpack.c.bf16 %v4091_v3, %v4090_v47  ;;  %v4124_v5 = vld [vmem:[#allocation19 + $0x120] sm:$0xff] }
0x4cce   :  { %5716 = vtanh.f32 %v3806_v63 }
0x4cd8   :  { %v5717_v6 = vpop.eup %5716 }
0x4cd9   :  { %3809 = vrot.lane.b32.xlu0 %v5717_v6, %s6044_s29 }
0x4d4b   :  { %v3810_v8 = vpop.permute.xlu0 %3809 }
0x4d4c   :  { %v3812_v7 = vmul.f32 %v5715_v58, %v3810_v8  ;;  %v4108_v58 = vld [vmem:[#allocation19 + $0xa0] sm:$0xff] }
0x4d4d   :  { %v5402_v6 = vpack.c.bf16 %v4109_v48, %v4108_v58  ;;  %v4092_v8 = vld [vmem:[#allocation19 + $0x20] sm:$0xff] }
0x4d4e   :  { %3814 = vrot.lane.b32.xlu1 %v3812_v7, %s6045_s3  ;;  %v4093_v7 = vld [vmem:[#allocation19 + $0x28] sm:$0xff] }
0x4dc0   :  { %v3815_v34 = vpop.permute.xlu1 %3814 }
0x4dc1   :  { %5112 = vmatmul.mubr.msk.f32.vlgmr.msra.gmra.mrb[38].mxu1 %vm354_vm2, %v3815_v34  ;;  %v4110_v34 = vld [vmem:[#allocation19 + $0xb0] sm:$0xff] }
0x4dc2   :  { %5122 = vmatprep.mubr.msk.f32.mxu1 %vm6042_vm0, %v6043_v1  ;;  %5390 = vmatpush3.bf16.msra.mxu1 %v5389_v31  ;;  %v5414_v31 = vpack.c.bf16 %v4115_v12, %v4114_v54 }
0x4dc3   :  { %5391 = vmatprep.subr.bf16.mxu1 %v6041_v0 }
0x4dc6   :  { %5393 = vmatpush3.bf16.msra.mxu1 %v5392_v28  ;;  %v5418_v28 = vpack.c.bf16 %v4117_v62, %v4116_v36 }
0x4dc7   :  { %5426 = vmatprep.subr.bf16.mxu1 %v6041_v0 }
0x4e94   :  { %v3884_v11 = vpop.f32.mrb[38].mxu1 }
0x4e95   :  { %v3888_v15 = vadd.f32 %v3884_v11, %v3115_v13  ;;  %v5113_v61 = vpop.f32.mrb[39].mxu1  ;;  %v4111_v13 = vld [vmem:[#allocation19 + $0xb8] sm:$0xff] }
0x4e96   :  { %v4126_v61 = vld [vmem:[#allocation19 + $0x130] sm:$0xff] }
0x4e97   :  { %5718 = vtanh.f32 %v3888_v15  ;;  %v4419_v9 = vmul.f32 -1.442695, %v3888_v15  ;;  %v5404_v15 = vpack.c.bf16 %v4093_v7, %v4092_v8 }
0x4e99   :  { %5720 = vpow2.f32 %v4419_v9  ;;  %v5406_v9 = vpack.c.bf16 %v4111_v13, %v4110_v34 }
0x4ea1   :  { %v5719_v32 = vpop.eup %5718 }
0x4ea2   :  { %3898 = vrot.lane.b32.xlu0 %v5719_v32, %s6044_s29  ;;  %v4127_v32 = vld [vmem:[#allocation19 + $0x138] sm:$0xff] }
0x4ea3   :  { %v5721_v45 = vpop.eup %5720 }
0x4ea4   :  { %v3892_v50 = vadd.f32 1.0, %v5721_v45  ;;  %v4094_v45 = vld [vmem:[#allocation19 + $0x30] sm:$0xff] }
0x4ea6   :  { %5722 = vrcp.f32 %v3892_v50  ;;  %v4095_v50 = vld [vmem:[#allocation19 + $0x38] sm:$0xff] }
0x4eb0   :  { %v5723_v24 = vpop.eup %5722 }
0x4eb1   :  { %v3896_v17 = vmul.f32 %v5723_v24, %v3806_v63  ;;  %v4125_v63 = vld [vmem:[#allocation19 + $0x128] sm:$0xff] }
0x4eb2   :  { %v5433_v11 = vpack.c.bf16 %v4125_v63, %v4124_v5 }
0x4f14   :  { %v3899_v41 = vpop.permute.xlu0 %3898 }
0x4f15   :  { %v3901_v21 = vmul.f32 %v5723_v24, %v3899_v41  ;;  %v4113_v41 = vld [vmem:[#allocation19 + $0xc8] sm:$0xff] }
0x4f17   :  { %3903 = vrot.lane.b32.xlu1 %v3901_v21, %s6045_s3  ;;  %v5436_v21 = vpack.c.bf16 %v4127_v32, %v4126_v61 }
0x4f89   :  { %v3904_v18 = vpop.permute.xlu1 %3903 }
0x4f8a   :  { %v3906_v43 = vadd.f32 %v3904_v18, %v3896_v17  ;;  %v5408_v17 = vpack.c.bf16 %v4095_v50, %v4094_v45  ;;  %v4128_v18 = vld [vmem:[#allocation19 + $0x140] sm:$0xff] }
0x4f8c   :  { %5724 = vtanh.f32 %v3906_v43 }
0x4f96   :  { %v5725_v44 = vpop.eup %5724 }
0x4f97   :  { %3909 = vrot.lane.b32.xlu0 %v5725_v44, %s6044_s29  ;;  %v4100_v44 = vld [vmem:[#allocation19 + $0x60] sm:$0xff] }
0x4f98   :  { %v5420_v51 = vpack.c.bf16 %v4101_v35, %v4100_v44 }
0x5009   :  { %v3910_v22 = vpop.permute.xlu0 %3909 }
0x500a   :  { %v3912_v53 = vmul.f32 %v5723_v24, %v3910_v22  ;;  %v4112_v24 = vld [vmem:[#allocation19 + $0xc0] sm:$0xff]  ;;  %v4134_v22 = vld [vmem:[#allocation19 + $0x170] sm:$0xff] }
0x500b   :  { %v5410_v43 = vpack.c.bf16 %v4113_v41, %v4112_v24 }
0x500c   :  { %3943 = vrot.lane.b32.xlu1 %v3912_v53, %s6045_s3  ;;  %v4135_v53 = vld [vmem:[#allocation19 + $0x178] sm:$0xff] }
0x500d   :  { %v5448_v55 = vpack.c.bf16 %v4135_v53, %v4134_v22 }
0x507e   :  { %v3944_v25 = vpop.permute.xlu1 %3943 }
0x507f   :  { %4420 = vmatmul.mubr.msk.f32.vlgmr.msra.gmra.mrb[56].mxu0 %vm354_vm2, %v3944_v25  ;;  %5123 = vmatmul.mubr.msk.f32.vlgmr.msra.gmra.mrb[40].mxu1 %vm354_vm2, %v3944_v25 }
0x5080   :  { %5428 = vmatpush3.bf16.msra.mxu1 %v5427_v14  ;;  %5397 = vmatpush3.bf16.msra.mxu0 %v5396_v57  ;;  %v5424_v14 = vpack.c.bf16 %v4103_v40, %v4102_v52  ;;  %v3927_v57 = vlaneseq }
0x5081   :  { %5429 = vmatprep.subr.bf16.mxu1 %v6041_v0  ;;  %5399 = vmatprep.subr.bf16.mxu0 %v5398_v42 }
0x5082   :  { %5157 = vmatprep.mubr.msk.f32.mxu1 %vm6042_vm0, %v6043_v1  ;;  %v4129_v1 = vld [vmem:[#allocation19 + $0x148] sm:$0xff]  ;;  %v3928_v60 = vshrl.u32 %v3927_v57, 7 }
0x5083   :  { %v5439_v10 = vpack.c.bf16 %v4129_v1, %v4128_v18 }
0x5084   :  { %5431 = vmatpush3.bf16.msra.mxu1 %v5430_v23  ;;  %5401 = vmatpush3.bf16.msra.mxu0 %v5400_v4  ;;  %v3929_v2 = vsub.s32 0, %v3928_v60  ;;  %v3937_v42 = vsub.s32 2, %v3928_v60  ;;  %v3933_v47 = vsub.s32 1, %v3928_v60 }
0x5085   :  { %5432 = vmatprep.subr.bf16.mxu1 %v6041_v0  ;;  %5403 = vmatprep.subr.bf16.mxu0 %v5402_v6 }
0x5088   :  { %5434 = vmatpush3.bf16.msra.mxu1 %v5433_v11  ;;  %5405 = vmatpush3.bf16.msra.mxu0 %v5404_v15 }
0x5089   :  { %5435 = vmatprep.subr.bf16.mxu1 %v6041_v0  ;;  %5407 = vmatprep.subr.bf16.mxu0 %v5406_v9 }
0x508c   :  { %5437 = vmatpush3.bf16.msra.mxu1 %v5436_v21  ;;  %5409 = vmatpush3.bf16.msra.mxu0 %v5408_v17 }
0x508d   :  { %5438 = vmatprep.subr.bf16.mxu1 %v6041_v0  ;;  %5411 = vmatprep.subr.bf16.mxu0 %v5410_v43 }
0x5090   :  { %5440 = vmatpush3.bf16.msra.mxu1 %v5439_v10  ;;  %5413 = vmatpush3.bf16.msra.mxu0 %v5412_v33 }
0x5091   :  { %5441 = vmatprep.subr.bf16.mxu1 %v6041_v0  ;;  %5415 = vmatprep.subr.bf16.mxu0 %v5414_v31 }
0x5094   :  { %5443 = vmatpush3.bf16.msra.mxu1 %v5442_v37  ;;  %5417 = vmatpush3.bf16.msra.mxu0 %v5416_v26 }
0x5095   :  { %5444 = vmatprep.subr.bf16.mxu1 %v6041_v0  ;;  %5419 = vmatprep.subr.bf16.mxu0 %v5418_v28 }
0x5098   :  { %5446 = vmatpush3.bf16.msra.mxu1 %v5445_v46  ;;  %5421 = vmatpush3.bf16.msra.mxu0 %v5420_v51 }
0x5099   :  { %5447 = vmatprep.subr.bf16.mxu1 %v6041_v0  ;;  %5423 = vmatprep.subr.bf16.mxu0 %v5422_v56  ;;  %v3925_v0 = vld [vmem:[%s7046_s14] sm:$0x7]  ;;  %s6046_s14 = smov [#allocation20]  }
0x509a   :  { %v3930_v3 = vrot.slane %v3925_v0, %v3929_v2  ;;  %v3938_v25 = vrot.slane %v3925_v0, %v3937_v42  ;;  %v3934_v58 = vrot.slane %v3925_v0, %v3933_v47  ;;  %s4296_s3 = sshll.u32 %s6046_s14, 4  ;;  %s4297_s3 = int_to_ptr.vmem [resolvable:$true] %s4296_s3 }
0x509b   :  { %s5968_s21 = scalar_lea.vmem %s4297_s3, 384  ;;  %p5973_p5 = scmp.lt.s32.totalorder %s4297_s3, %s4297_s3 }
0x509c   :  { %5449 = vmatpush3.bf16.msra.mxu1 %v5448_v55  ;;  %5425 = vmatpush3.bf16.msra.mxu0 %v5424_v14  ;;  %p5969_p4 = scmp.ne.s32.totalorder %s4297_s3, %s5968_s21  ;;  %p5974_p6 = scmp.lt.s32.totalorder %s5968_s21, %s5968_s21 }
0x509e   :  { %p5975_p7 = por %p5974_p6, %p5973_p5 }
0x50a0   :  { %p5976_p8 = pnand %p5975_p7, %p5969_p4 }
0x5152   :  { %v4013_v48 = vpop.f32.mrb[56].mxu0  ;;  %v4084_v23 = vpop.f32.mrb[40].mxu1 }
0x5153   :  { %v4014_v4 = vadd.f32 %v4013_v48, %v3930_v3  ;;  %v4085_v5 = vadd.f32 %v4084_v23, %v3938_v25  ;;  %v4015_v63 = vpop.f32.mrb[57].mxu0  ;;  %v5124_v6 = vpop.f32.mrb[41].mxu1 }
0x5154   :  { %v4016_v8 = vadd.f32 %v4015_v63, %v3934_v58 }
0x5155   :  { %v4283_v7 = vmax.f32 %v4014_v4, 0.0  ;;  %v4285_v34 = vmax.f32 %v4085_v5, 0.0  ;;  %5158 = vmatmul.mubr.f32.vlgmr.msra.gmra.mrb[42].mxu1 %v4085_v5 }
0x5156   :  { %v4284_v13 = vmax.f32 %v4016_v8, 0.0  ;;  %4207 = vmatprep.mubr.f32.mxu0 %v4016_v8 }
0x5157   :  { %4286 = vst [vmem:[#allocation20] sm:$0xff] %v4283_v7  ;;  %4288 = vst [vmem:[#allocation20 + $0x10] sm:$0xff] %v4285_v34  ;;  %4208 = vmatmul.mubr.f32.vlgmr.msra.gmra.mrb[58].mxu0 %v4014_v4 }
0x5158   :  { %4287 = vst [vmem:[#allocation20 + $0x8] sm:$0xff] %v4284_v13 }
0x5159   :  { %5979 = shalt.err (!%p5976_p8)
}
0x515a   :  { %s5980_s20 = scalar_lea.hbm %s7049_s17, 384 }
0x515b   :  { %p5981_p9 = scmp.ne.s32.totalorder %s7049_s17, %s5980_s20  ;;  %p5984_p10 = scmp.lt.u32.totalorder %s5980_s20, %s7049_s17 }
0x515d   :  { %p5986_p11 = pnand %p5984_p10, %p5981_p9 }
0x515f   :  { %5989 = shalt.err (!%p5986_p11)
}
0x5160   :  { %4299 = dma.vmem_to_hbm [thread:$0]  %s4297_s3, 384, %s7049_s17, [#allocation4]   ;;  %v4422_v32 = vld [vmem:[%s7048_s16] ss:$0 sm:$0xff] }
0x5161   :  { %s6047_s19 = smov [#allocation21]  }
0x5162   :  { %s4306_s12 = sshll.u32 %s6047_s19, 4  ;;  %s4307_s12 = int_to_ptr.vmem [resolvable:$true] %s4306_s12 }
0x5163   :  { %s5990_s7 = scalar_lea.vmem %s4307_s12, 128  ;;  %p5995_p13 = scmp.lt.s32.totalorder %s4307_s12, %s4307_s12 }
0x5164   :  { %p5991_p12 = scmp.ne.s32.totalorder %s4307_s12, %s5990_s7  ;;  %p5996_p0 = scmp.lt.s32.totalorder %s5990_s7, %s5990_s7 }
0x5166   :  { %p5997_p1 = por %p5996_p0, %p5995_p13 }
0x5168   :  { %p5998_p2 = pnand %p5997_p1, %p5991_p12 }
0x5228   :  { %v4279_v11 = vpop.f32.mrb[42].mxu1 }
0x5229   :  { %v5159_v15 = vpop.f32.mrb[43].mxu1 }
0x522a   :  { %v4666_v61 = vpop.f32.mrb[58].mxu0 }
0x522b   :  { %v4667_v9 = vpop.f32.mrb[59].mxu0 }
0x522c   :  { %v4668_v45 = vadd.f32 %v4667_v9, %v4666_v61 }
0x522e   :  { %v4210_v50 = vadd.f32 %v4668_v45, %v4422_v32 }
0x5230   :  { %v4280_v24 = vadd.f32 %v4279_v11, %v4210_v50 }
0x5232   :  { %4289 = vst [vmem:[#allocation21] sm:$0xff] %v4280_v24 }
0x5233   :  { %6001 = shalt.err (!%p5998_p2)
}
0x5234   :  { %s6002_s4 = scalar_lea.hbm %s7050_s18, 128 }
0x5235   :  { %p6003_p3 = scmp.ne.s32.totalorder %s7050_s18, %s6002_s4  ;;  %p6006_p4 = scmp.lt.u32.totalorder %s6002_s4, %s7050_s18 }
0x5237   :  { %p6008_p5 = pnand %p6006_p4, %p6003_p3 }
0x5239   :  { %6011 = shalt.err (!%p6008_p5)
}
0x523a   :  { %4309 = dma.vmem_to_hbm [thread:$0]  %s4307_s12, 128, %s7050_s18, [#allocation22]  }
0x523b   :  { %6024 = dma.done.wait [#allocation4], 384  }
0x523c   :  { %6025 = vsyncadd [#allocation4], 4294966912 }
0x523d   :  { %6026 = dma.done.wait [#allocation22], 128  }
0x523e   :  { %6027 = vsyncadd [#allocation22], 4294967168 }
0x523f   :  { %4316 = vsyncpa [#allocation3], 1 }
0x5240   :  { %4317 = vsyncpa [#allocation6], 1 }
0x5241   :  { %4318 = vsyncpa [#allocation9], 1 }
0x5242   :  { %4319 = vsyncpa [#allocation12], 1 }
0x5243   :  { %4320 = vsyncpa [#allocation15], 1 }
0x5244   :  { %4321 = vsyncpa [#allocation18], 1 }
0x5245   :  { %4322 = vsyncpa [#allocation4], 1 }
0x5246   :  { %4323 = vsyncpa [#allocation22], 1 }

</bundles_post_ra>
